<compile_context>
chip_gen: v6e
topology: v6e:2x2x1
jax: 0.10.0
libtpu: 0.0.40
codegen_flags: <defaults>
</compile_context>

<pallas_src>
import jax
import jax.numpy as jnp
from jax.experimental import pallas as pl
from jax.experimental.pallas import tpu as pltpu

EMBEDDING_DIM = 128
HIDDEN_DIM = 512
OUTPUT_DIM = 80
TIME_STEPS = 50
OUT_FEATURES = OUTPUT_DIM * TIME_STEPS       # 4000 (not a multiple of 128)
OUT_FEATURES_PAD = 4096                      # padded once at init -> lane-dense
TILE_N = 2048                                # 4096 / 2048 = 2 output tiles
N_TILES = OUT_FEATURES_PAD // TILE_N


def mel_fused_kernel(x_ref, w1_ref, b1_ref, w2_ref, b2_ref, out_ref):
    # x: (B,128) f32 resident | w1: (128,512) bf16 resident | b1: (1,512) f32
    # w2 tile: (512,TILE_N) bf16 streamed | b2 tile: (1,TILE_N) f32 streamed
    # out tile: (B, TILE_N) f32
    h = jnp.dot(x_ref[...], w1_ref[...].astype(jnp.float32),
                preferred_element_type=jnp.float32) + b1_ref[...]
    h = jnp.maximum(h, 0.0)                                    # ReLU on VPU
    out_ref[...] = (jnp.dot(h, w2_ref[...].astype(jnp.float32),
                            preferred_element_type=jnp.float32)
                    + b2_ref[...]).astype(out_ref.dtype)


def prepare_weights(w1, b1, w2, b2):
    """One-time (init-time) weight prep: pad 4000->4096 and store bf16.

    Must NOT be called per forward pass — the whole point is to keep the
    per-call HBM traffic to a single bf16 read of w2."""
    pad_n = OUT_FEATURES_PAD - OUT_FEATURES
    w1_bf16 = w1.astype(jnp.bfloat16)
    w2p_bf16 = jnp.pad(w2, ((0, 0), (0, pad_n))).astype(jnp.bfloat16)
    b2p = jnp.pad(b2, ((0, 0), (0, pad_n)))
    return w1_bf16, b1, w2p_bf16, b2p


def mel_decoder_forward(embedding, w1_bf16, b1, w2p_bf16, b2p):
    """Forward pass. Weights must come from prepare_weights()."""
    B = embedding.shape[0]

    flops = 2 * B * (EMBEDDING_DIM * HIDDEN_DIM * N_TILES
                     + HIDDEN_DIM * OUT_FEATURES_PAD)
    bytes_accessed = (2 * (w2p_bf16.size + w1_bf16.size)          # bf16 reads
                      + 4 * (b1.size + b2p.size + embedding.size
                             + B * OUT_FEATURES))                 # f32 traffic

    out2d = pl.pallas_call(
        mel_fused_kernel,
        out_shape=jax.ShapeDtypeStruct((B, OUT_FEATURES), jnp.float32),
        grid=(N_TILES,),
        in_specs=[
            pl.BlockSpec((B, EMBEDDING_DIM), lambda j: (0, 0)),        # resident
            pl.BlockSpec((EMBEDDING_DIM, HIDDEN_DIM), lambda j: (0, 0)),
            pl.BlockSpec((1, HIDDEN_DIM), lambda j: (0, 0)),
            pl.BlockSpec((HIDDEN_DIM, TILE_N), lambda j: (0, j)),      # streamed
            pl.BlockSpec((1, TILE_N), lambda j: (0, j)),               # streamed
        ],
        out_specs=pl.BlockSpec((B, TILE_N), lambda j: (0, j)),
        compiler_params=pltpu.CompilerParams(
            dimension_semantics=("parallel",),
            vmem_limit_bytes=32 * 1024 * 1024,
        ),
        cost_estimate=pl.CostEstimate(
            flops=flops, bytes_accessed=bytes_accessed, transcendentals=0),
    )(embedding, w1_bf16, b1, w2p_bf16, b2p)

    # (B, 4000) -> (B, 80, 50), same as torch .view(-1, 80, 50)
    return out2d.reshape(B, OUTPUT_DIM, TIME_STEPS)


def init_params(key):
    """Deterministic init mimicking nn.Linear (uniform +/- 1/sqrt(fan_in)).

    Weights are stored as (in_features, out_features), i.e. the transpose of
    PyTorch's layout, so the hot path is `x @ W + b`."""
    k1, k2, k3, k4 = jax.random.split(key, 4)
    lim1 = 1.0 / jnp.sqrt(EMBEDDING_DIM)
    lim2 = 1.0 / jnp.sqrt(HIDDEN_DIM)
    w1 = jax.random.uniform(k1, (EMBEDDING_DIM, HIDDEN_DIM),
                            jnp.float32, -lim1, lim1)
    b1 = jax.random.uniform(k2, (1, HIDDEN_DIM), jnp.float32, -lim1, lim1)
    w2 = jax.random.uniform(k3, (HIDDEN_DIM, OUT_FEATURES),
                            jnp.float32, -lim2, lim2)
    b2 = jax.random.uniform(k4, (1, OUT_FEATURES), jnp.float32, -lim2, lim2)
    return w1, b1, w2, b2


if __name__ == "__main__":
    key = jax.random.PRNGKey(0)
    kx, kp = jax.random.split(key)

    B = 2
    embedding = jax.random.normal(kx, (B, EMBEDDING_DIM), jnp.float32)
    w1, b1, w2, b2 = init_params(kp)

    # One-time weight prep (padding + bf16 cast) outside the forward path.
    params = prepare_weights(w1, b1, w2, b2)

    fwd = jax.jit(mel_decoder_forward)
    out = fwd(embedding, *params)
    jax.block_until_ready(out)

    # Pure-JAX reference using the same bf16-rounded weights (bf16 storage
    # requires a looser tolerance than the original f32-only check).
    w1f = params[0].astype(jnp.float32)
    w2f = params[2][:, :OUT_FEATURES].astype(jnp.float32)
    ref = (jnp.maximum(embedding @ w1f + b1, 0.0) @ w2f + b2)
    ref = ref.reshape(B, OUTPUT_DIM, TIME_STEPS)

    assert out.shape == (B, OUTPUT_DIM, TIME_STEPS)
    assert jnp.allclose(out, ref, atol=1e-2, rtol=1e-2)

    print("KERNEL_OK")
</pallas_src>

<mosaic_0001>
module attributes {stable_mosaic.version = 11 : i64} {
  func.func @mel_fused_kernel(%arg0: i32, %arg1: memref<2x128xf32, #tpu.memory_space<vmem>>, %arg2: memref<128x512xbf16, #tpu.memory_space<vmem>>, %arg3: memref<1x512xf32, #tpu.memory_space<vmem>>, %arg4: memref<512x2048xbf16, #tpu.memory_space<vmem>>, %arg5: memref<1x2048xf32, #tpu.memory_space<vmem>>, %arg6: memref<2x2048xf32, #tpu.memory_space<vmem>>) attributes {dimension_semantics = [#tpu.dimension_semantics<parallel>], iteration_bounds = array<i64: 2>, scalar_prefetch = 0 : i64, scratch_operands = 0 : i64, tpu.core_type = #tpu.core_type<tc>, window_params = [{pipeline_mode = #tpu.pipeline_mode<synchronous>, transform_indices = @transform_0, window_bounds = array<i64: 2, 128>}, {pipeline_mode = #tpu.pipeline_mode<synchronous>, transform_indices = @transform_1, window_bounds = array<i64: 128, 512>}, {pipeline_mode = #tpu.pipeline_mode<synchronous>, transform_indices = @transform_2, window_bounds = array<i64: 1, 512>}, {transform_indices = @transform_3, window_bounds = array<i64: 512, 2048>}, {transform_indices = @transform_4, window_bounds = array<i64: 1, 2048>}, {transform_indices = @transform_5, window_bounds = array<i64: 2, 2048>}]} {
    %c0 = arith.constant 0 : index
    %c0_0 = arith.constant 0 : index
    %0 = vector.load %arg1[%c0, %c0_0] : memref<2x128xf32, #tpu.memory_space<vmem>>, vector<2x128xf32>
    %c0_1 = arith.constant 0 : index
    %c0_2 = arith.constant 0 : index
    %1 = vector.load %arg2[%c0_1, %c0_2] : memref<128x512xbf16, #tpu.memory_space<vmem>>, vector<128x512xbf16>
    %2 = arith.extf %1 : vector<128x512xbf16> to vector<128x512xf32>
    %cst = arith.constant dense<0.000000e+00> : vector<2x512xf32>
    %3 = tpu.matmul %0, %2, %cst {dimension_numbers = #tpu.dot_dimension_numbers<[1], [0], [0], [1], [0, 0, 1, 1], [], []>} : vector<2x128xf32>, vector<128x512xf32>, vector<2x512xf32> -> vector<2x512xf32>
    %c0_3 = arith.constant 0 : index
    %c0_4 = arith.constant 0 : index
    %4 = vector.load %arg3[%c0_3, %c0_4] : memref<1x512xf32, #tpu.memory_space<vmem>>, vector<1x512xf32>
    %5 = vector.broadcast %4 : vector<1x512xf32> to vector<2x512xf32>
    %6 = arith.addf %3, %5 : vector<2x512xf32>
    %cst_5 = arith.constant 0.000000e+00 : f32
    %7 = vector.broadcast %cst_5 : f32 to vector<2x512xf32>
    %8 = arith.maximumf %6, %7 : vector<2x512xf32>
    %c0_6 = arith.constant 0 : index
    %c0_7 = arith.constant 0 : index
    %9 = vector.load %arg4[%c0_6, %c0_7] : memref<512x2048xbf16, #tpu.memory_space<vmem>>, vector<512x2048xbf16>
    %10 = arith.extf %9 : vector<512x2048xbf16> to vector<512x2048xf32>
    %cst_8 = arith.constant dense<0.000000e+00> : vector<2x2048xf32>
    %11 = tpu.matmul %8, %10, %cst_8 {dimension_numbers = #tpu.dot_dimension_numbers<[1], [0], [0], [1], [0, 0, 1, 1], [], []>} : vector<2x512xf32>, vector<512x2048xf32>, vector<2x2048xf32> -> vector<2x2048xf32>
    %c0_9 = arith.constant 0 : index
    %c0_10 = arith.constant 0 : index
    %12 = vector.load %arg5[%c0_9, %c0_10] : memref<1x2048xf32, #tpu.memory_space<vmem>>, vector<1x2048xf32>
    %13 = vector.broadcast %12 : vector<1x2048xf32> to vector<2x2048xf32>
    %14 = arith.addf %11, %13 : vector<2x2048xf32>
    %c0_11 = arith.constant 0 : index
    %c0_12 = arith.constant 0 : index
    %15 = vector.load %arg6[%c0_11, %c0_12] : memref<2x2048xf32, #tpu.memory_space<vmem>>, vector<2x2048xf32>
    tpu.vector_store %arg6[%c0_11, %c0_12], %14 {strides = array<i32>} : memref<2x2048xf32, #tpu.memory_space<vmem>>, vector<2x2048xf32>,
    return
  }
  func.func @transform_0(%arg0: i32) -> (i32, i32) {
    %c0_i32 = arith.constant 0 : i32
    %c0_i32_0 = arith.constant 0 : i32
    %c0_i32_1 = arith.constant 0 : i32
    return %c0_i32, %c0_i32_0 : i32, i32
  }
  func.func @transform_1(%arg0: i32) -> (i32, i32) {
    %c0_i32 = arith.constant 0 : i32
    %c0_i32_0 = arith.constant 0 : i32
    %c0_i32_1 = arith.constant 0 : i32
    return %c0_i32, %c0_i32_0 : i32, i32
  }
  func.func @transform_2(%arg0: i32) -> (i32, i32) {
    %c0_i32 = arith.constant 0 : i32
    %c0_i32_0 = arith.constant 0 : i32
    %c0_i32_1 = arith.constant 0 : i32
    return %c0_i32, %c0_i32_0 : i32, i32
  }
  func.func @transform_3(%arg0: i32) -> (i32, i32) {
    %c0_i32 = arith.constant 0 : i32
    %c0_i32_0 = arith.constant 0 : i32
    return %c0_i32, %arg0 : i32, i32
  }
  func.func @transform_4(%arg0: i32) -> (i32, i32) {
    %c0_i32 = arith.constant 0 : i32
    %c0_i32_0 = arith.constant 0 : i32
    return %c0_i32, %arg0 : i32, i32
  }
  func.func @transform_5(%arg0: i32) -> (i32, i32) {
    %c0_i32 = arith.constant 0 : i32
    %c0_i32_0 = arith.constant 0 : i32
    return %c0_i32, %arg0 : i32, i32
  }
}

</mosaic_0001>

<bundles_post_ra>
// kernel: mel_decoder_forward.1
= control target key start
LH: loop header
LB: loop body
LE: loop exit
PB: predicated region body
PF: predicated region fallthrough
CT: control target
= control target key end

     0   :  { %10 = vsyncpa [#allocation3], 0  ;;  %s4715_s0 = inlined_call_operand.hbm [shape: f32[2,128], index: 0, kind: input, shape index: {}]   ;;  %s4716_s1 = inlined_call_operand.hbm [shape: bf16[128,512], index: 1, kind: input, shape index: {}]   ;;  %s4717_s2 = inlined_call_operand.hbm [shape: f32[1,512], index: 2, kind: input, shape index: {}]   ;;  %s4718_s3 = inlined_call_operand.hbm [shape: bf16[512,4096], index: 3, kind: input, shape index: {}]   ;;  %s4719_s4 = inlined_call_operand.hbm [shape: f32[1,4096], index: 4, kind: input, shape index: {}]   ;;  %s4720_s5 = inlined_call_operand.vmem [shape: f32[2,4000], index: 5, kind: output, shape index: {}]  }
   0x1   :  { %11 = vsyncpa [#allocation5], 0 }
   0x2   :  { %12 = vsyncpa [#allocation8], 0 }
   0x3   :  { %14 = vsyncpa [#allocation8 + $0x1], 0  ;;  %s3882_s18 = smov 0   ;;  %s3884_s19 = smov 0  }
   0x4   :  { %s3886_s20 = smov 0   ;;  %s3888_s21 = smov 0  }
   0x5 LB: > { %s3901_s22 = sadd.s32 4294967295, %s3838_s21   ;;  %s3904_s23 = sadd.s32 1, %s3838_s21   ;;  %s3838_s21 = sphi %s3888_s21, %s4744_s21   ;;  %s3834_s20 = sphi %s3886_s20, %s4743_s20   ;;  %s3830_s19 = sphi %s3884_s19, %s4742_s19   ;;  %s3826_s18 = sphi %s3882_s18, %s4741_s18  }
   0x6   : > { %s87_s24 = ssub.s32 %s3838_s21, %s3904_s23  ;;  %s90_s25 = sadd.s32 1, %s3834_s20 }
   0x7   : > { %p88_p0 = scmp.eq.s32.totalorder %s87_s24, 0  ;;  %p97_p1 = scmp.ne.s32.totalorder %s3834_s20, %s3830_s19 }
   0x8   : > { %p98_p2 = scmp.eq.s32.totalorder %s3838_s21, 0  ;;  %p103_p3 = scmp.ne.s32.totalorder %s3830_s19, %s3826_s18 }
   0x9   : > { %s3914_s26 = scalar_select %p88_p0, %s3834_s20, %s90_s25  }
   0xa   : > { %p3916_p4 = por %p98_p2, %p97_p1  ;;  %p4721_p5 = scmp.eq.s32.totalorder %s3901_s22, 0 }
   0xb   : > { %4725 = sst [smem:[#allocation13_spill]] %s3914_s26  ;;  %p3556_p6 = scmp.ge.s32.totalorder %s3838_s21, 1 }
   0xc   : > { %p166_p7 = scmp.lt.s32.totalorder %s3838_s21, 3  ;;  %p3925_p8 = por %p4721_p5, %p103_p3 }
   0xd   : > { %s3840_s30 = smov [#allocation4]   ;;  %p3615_p12 = scmp.lt.s32.totalorder %s3838_s21, 2 }
   0xe   : > { %s4727_s28 = scalar_select %p3925_p8, 1, 0 }
   0xf   : > { %p3929_p9 = pnand %p3556_p6, %p166_p7  ;;  %s189_s6 = sshll.u32 %s3840_s30, 4  ;;  %s190_s6 = int_to_ptr.vmem [resolvable:$true] %s189_s6 }
  0x10   : > { %s214_s8 = sand.u32 1, %s3838_s21   ;;  %s216_s9 = sand.u32 1, %s3834_s20  }
  0x11   : > { %s4728_s29 = scalar_select %p3929_p9, 1, 0 }
  0x12   : > { %p3595_p10 = pneg %p3929_p9  ;;  %p3946_p13 = pnand %p3615_p12, %p3916_p4 }
  0x13   : > { %s3673_s11 = scalar_lea.vmem %s190_s6, 4096  ;;  %p3681_p6 = scmp.lt.s32.totalorder %s190_s6, %s190_s6 }
  0x14   : > { %p3937_p11 = pnand %p3595_p10, %p4721_p5  ;;  %p3674_p1 = scmp.ne.s32.totalorder %s190_s6, %s3673_s11 }
  0x15   : > { %p3682_p7 = scmp.lt.s32.totalorder %s3673_s11, %s3673_s11 }
  0x16   : > { %p4722_p0 = pneg %p3937_p11 }
  0x17   : > { %p3683_p10 = por %p3682_p7, %p3681_p6 }
  0x18   : > { %p3676_p2 = pnand %p3674_p1, %p4722_p0 }
  0x1a   : > { %p3677_p3 = pneg %p3676_p2 }
  0x1c   : > { %p3684_p5 = pnand %p3683_p10, %p3677_p3 }
  0x1e   : > { %3687 = shalt.err (!%p3684_p5)
}
  0x1f   : > { %s3841_s12 = smov 256   ;;  %s3842_s13 = smov 16  }
  0x20   : > { %3601 = dma.hbm_to_vmem [thread:$0]  (!%p3937_p11), %s4716_s1, 4096, %s190_s6, [#allocation5], %s3841_s12, %s3841_s12, %s3842_s13  }
  0x21   : > { %s3561_s16 = sshll.u32 %s216_s9, 12  ;;  %s3577_s17 = sshll.u32 %s3838_s21, 10 }
  0x22   : > { %s3966_s25 = scalar_lea.hbm %s4718_s3, %s3577_s17  ;;  %s218_s27 = scalar_lea.vmem [#allocation7], %s3561_s16 }
  0x23   : > { %s225_s30 = sshll.u32 %s218_s27, 4  ;;  %s3970_s11 = scalar_lea.sflag [#allocation8], %s214_s8  ;;  %s3968_s30 = int_to_ptr.vmem [resolvable:$true] %s225_s30 }
  0x24   : > { %s3688_s26 = scalar_lea.hbm %s3966_s25, 65536  ;;  %p3690_p5 = pneg %p3946_p13 }
  0x25   : > { %p3689_p4 = scmp.ne.s32.totalorder %s3966_s25, %s3688_s26  ;;  %s3693_s13 = scalar_lea.hbm %s4718_s3, 131072 }
  0x26   : > { %p3694_p2 = scmp.lt.s32.totalorder %s3966_s25, %s4718_s3  ;;  %p3695_p3 = scmp.lt.s32.totalorder %s3693_s13, %s3688_s26 }
  0x27   : > { %p3691_p12 = pnand %p3690_p5, %p3689_p4 }
  0x28   : > { %p3696_p6 = por %p3695_p3, %p3694_p2 }
  0x29   : > { %p3692_p1 = pneg %p3691_p12 }
  0x2b   : > { %p3697_p7 = pnand %p3696_p6, %p3692_p1 }
  0x2d   : > { %3700 = shalt.err (!%p3697_p7)
}
  0x2e   : > { %s3701_s8 = scalar_lea.vmem %s3968_s30, 65536  ;;  %s3843_s16 = smov [#allocation7]  }
  0x2f   : > { %p3702_p10 = scmp.ne.s32.totalorder %s3968_s30, %s3701_s8  ;;  %s3706_s17 = sshll.u32 %s3843_s16, 4  ;;  %s3707_s17 = int_to_ptr.vmem [resolvable:$false] %s3706_s17 }
  0x30   : > { %s3708_s18 = scalar_lea.vmem %s3707_s17, 131072  ;;  %p3709_p0 = scmp.lt.s32.totalorder %s3968_s30, %s3707_s17 }
  0x31   : > { %p3704_p4 = pnand %p3702_p10, %p3690_p5  ;;  %p3710_p8 = scmp.lt.s32.totalorder %s3708_s18, %s3701_s8 }
  0x33   : > { %p3705_p12 = pneg %p3704_p4  ;;  %p3711_p9 = por %p3710_p8, %p3709_p0 }
  0x35   : > { %p3712_p2 = pnand %p3711_p9, %p3705_p12 }
  0x37   : > { %3715 = shalt.err (!%p3712_p2)
}
  0x38   : > { %s3844_s26 = smov 2048   ;;  %s3845_s24 = smov 1024  }
  0x39   : > { %s3846_s27 = smov 64   ;;  %s3847_s6 = smov [#allocation2]  }
  0x3a   : > { %3608 = dma.hbm_to_vmem [thread:$0]  (!%p3946_p13), %s3966_s25, 65536, %s3968_s30, %s3970_s11, %s3844_s26, %s3845_s24, %s3846_s27  }
  0x3b   : > { %s179_s12 = sshll.u32 %s3847_s6, 4  ;;  %s3848_s13 = smov [#allocation6]   ;;  %s180_s12 = int_to_ptr.vmem [resolvable:$true] %s179_s12 }
  0x3c   : > { %s203_s14 = sshll.u32 %s3848_s13, 4  ;;  %s3727_s15 = scalar_lea.vmem %s180_s12, 32  ;;  %s204_s14 = int_to_ptr.vmem [resolvable:$true] %s203_s14 }
  0x3d   : > { %p3728_p1 = scmp.ne.s32.totalorder %s180_s12, %s3727_s15  ;;  %p4731_p8 = pneg %p3937_p11 }
  0x3e   : > { %p3735_p3 = scmp.lt.s32.totalorder %s180_s12, %s180_s12  ;;  %p3736_p6 = scmp.lt.s32.totalorder %s3727_s15, %s3727_s15 }
  0x3f   : > { %p3730_p9 = pnand %p3728_p1, %p4731_p8 }
  0x40   : > { %p3737_p7 = por %p3736_p6, %p3735_p3 }
  0x41   : > { %p3731_p0 = pneg %p3730_p9 }
  0x43   : > { %p3738_p10 = pnand %p3737_p7, %p3731_p0 }
  0x45   : > { %3741 = shalt.err (!%p3738_p10)
}
  0x46   : > { %3598 = dma.hbm_to_vmem [thread:$0]  (!%p3937_p11), %s4715_s0, 32, %s180_s12, [#allocation3]  }
  0x47   : > { %s3564_s30 = sshll.u32 %s216_s9, 4  ;;  %s3753_s16 = scalar_lea.vmem %s204_s14, 64 }
  0x48   : > { %p3754_p4 = scmp.ne.s32.totalorder %s204_s14, %s3753_s16  ;;  %p4732_p12 = pmov %p4731_p8 }
  0x49   : > { %p3761_p8 = scmp.lt.s32.totalorder %s204_s14, %s204_s14  ;;  %p3762_p9 = scmp.lt.s32.totalorder %s3753_s16, %s3753_s16 }
  0x4a   : > { %p3756_p2 = pnand %p3754_p4, %p4732_p12 }
  0x4b   : > { %p3763_p0 = por %p3762_p9, %p3761_p8 }
  0x4c   : > { %p3757_p1 = pneg %p3756_p2 }
  0x4e   : > { %p3764_p3 = pnand %p3763_p0, %p3757_p1 }
  0x50   : > { %3767 = shalt.err (!%p3764_p3)
}
  0x51   : > { %3604 = dma.hbm_to_vmem [thread:$0]  (!%p3937_p11), %s4717_s2, 64, %s204_s14, [#allocation5]  }
  0x52   : > { %s3578_s9 = sshll.u32 %s3838_s21, 8  ;;  %s239_s6 = scalar_lea.vmem [#allocation9], %s3564_s30 }
  0x53   : > { %s245_s27 = scalar_lea.hbm %s4719_s4, %s3578_s9  ;;  %s247_s12 = sshll.u32 %s239_s6, 4  ;;  %s248_s12 = int_to_ptr.vmem [resolvable:$true] %s247_s12 }
  0x54   : > { %s3768_s13 = scalar_lea.hbm %s245_s27, 256  ;;  %s3773_s8 = scalar_lea.hbm %s4719_s4, 512 }
  0x55   : > { %p3769_p6 = scmp.ne.s32.totalorder %s245_s27, %s3768_s13  ;;  %p3774_p11 = scmp.lt.s32.totalorder %s245_s27, %s4719_s4 }
  0x56   : > { %p3775_p4 = scmp.lt.s32.totalorder %s3773_s8, %s3768_s13 }
  0x57   : > { %p3771_p7 = pnand %p3769_p6, %p3690_p5 }
  0x58   : > { %p3776_p12 = por %p3775_p4, %p3774_p11 }
  0x59   : > { %p3772_p10 = pneg %p3771_p7 }
  0x5b   : > { %p3777_p2 = pnand %p3776_p12, %p3772_p10 }
  0x5d   : > { %3780 = shalt.err (!%p3777_p2)
}
  0x5e   : > { %s3781_s21 = scalar_lea.vmem %s248_s12, 256  ;;  %s3849_s30 = smov [#allocation9]  }
  0x5f   : > { %p3782_p1 = scmp.ne.s32.totalorder %s248_s12, %s3781_s21  ;;  %s3786_s16 = sshll.u32 %s3849_s30, 4  ;;  %s3787_s16 = int_to_ptr.vmem [resolvable:$false] %s3786_s16 }
  0x60   : > { %s3788_s17 = scalar_lea.vmem %s3787_s16, 512  ;;  %p3789_p0 = scmp.lt.s32.totalorder %s248_s12, %s3787_s16 }
  0x61   : > { %p3784_p8 = pnand %p3782_p1, %p3690_p5  ;;  %p3790_p3 = scmp.lt.s32.totalorder %s3788_s17, %s3781_s21 }
  0x63   : > { %p3785_p9 = pneg %p3784_p8  ;;  %p3791_p6 = por %p3790_p3, %p3789_p0 }
  0x65   : > { %p3792_p7 = pnand %p3791_p6, %p3785_p9 }
  0x67   : > { %3795 = shalt.err (!%p3792_p7)
}
  0x68   : > { %3611 = dma.hbm_to_vmem [thread:$0]  (!%p3946_p13), %s245_s27, 256, %s248_s12, %s3970_s11  }
  0x69   : > { %p4733_p10 = scmp.ne.s32.totalorder %s4728_s29, 0 }
  0x6a   : > { %p4734_p11 = scmp.eq.s32.totalorder (!%p4733_p10), %s3901_s22, 0 }
  0x6b   : > { %256 = sbr.rel (%p4733_p10) target bundleno = 1024 (0x400), region = 40 }
  0x70   : > { %3813 = dma.done.wait (%p4734_p11), [#allocation3], 32   ;;  %p4735_p5 = pmov %p4734_p11 }
  0x72   : > { %3815 = vsyncadd (%p4735_p5), [#allocation3], 4294967264  ;;  %p4736_p4 = pmov %p4735_p5 }
  0x74   : > { %3817 = dma.done.wait (%p4736_p4), [#allocation5], 4160   ;;  %p4737_p12 = pmov %p4736_p4 }
  0x75   : > { %s270_s10 = sand.u32 1, %s3901_s22   ;;  %s272_s11 = sand.u32 1, %s3830_s19  }
  0x76   : > { %3819 = vsyncadd (%p4737_p12), [#allocation5], 4294963136  ;;  %s3571_s29 = sshll.u32 %s272_s11, 12  ;;  %s271_s18 = scalar_lea.sflag [#allocation8], %s270_s10 }
  0x77   : > { %s4048_s9 = scalar_lea.vmem [#allocation7], %s3571_s29  ;;  %p4738_p13 = scmp.ne.s32.totalorder %s4727_s28, 0 }
  0x79   : > { %3821 = dma.done.wait (%p4738_p13), %s271_s18, 65792  }
  0x7a   : > { %3823 = vsyncadd (%p4738_p13), %s271_s18, 4294901504  ;;  %v3850_v0 = vmov 0.0   ;;  %v354_v1 = vld [vmem:[#allocation4 + $0xf0] sm:$0xff]  ;;  %v355_v2 = vld [vmem:[#allocation4 + $0xf8] sm:$0xff]  ;;  %s4408_s28 = sshll.u32 %s272_s11, 4  ;;  %s3573_s24 = sshll.u32 %s3901_s22, 4 }
  0x7b   : > { %506 = vmatprep.mubr.f32.mxu0 %v3850_v0  ;;  %577 = vmatprep.mubr.f32.mxu1 %v3850_v0  ;;  %v352_v3 = vld [vmem:[#allocation4 + $0xe0] sm:$0xff]  ;;  %v417_v4 = vunpack.c.h.bf16 %v354_v1  ;;  %v419_v5 = vunpack.c.h.bf16 %v355_v2  ;;  %v416_v6 = vunpack.c.l.bf16 %v354_v1  ;;  %v418_v7 = vunpack.c.l.bf16 %v355_v2  ;;  %v353_v8 = vld [vmem:[#allocation4 + $0xe8] sm:$0xff]  ;;  %v350_v9 = vld [vmem:[#allocation4 + $0xd0] sm:$0xff]  ;;  %s4417_s26 = scalar_lea.vmem [#allocation9], %s4408_s28  ;;  %p4439_p2 = scmp.lt.s32.totalorder %s3573_s24, 31 }
  0x7c   : > { %v351_v10 = vld [vmem:[#allocation4 + $0xd8] sm:$0xff]  ;;  %v413_v11 = vunpack.c.h.bf16 %v352_v3  ;;  %v415_v12 = vunpack.c.h.bf16 %v353_v8  ;;  %v412_v13 = vunpack.c.l.bf16 %v352_v3  ;;  %v414_v14 = vunpack.c.l.bf16 %v353_v8  ;;  %v348_v15 = vld [vmem:[#allocation4 + $0xc0] sm:$0xff]  ;;  %v349_v16 = vld [vmem:[#allocation4 + $0xc8] sm:$0xff] }
  0x7d   : > { %442 = vmatprep.subr.mxu0 %v417_v4  ;;  %513 = vmatprep.subr.mxu1 %v419_v5  ;;  %v409_v17 = vunpack.c.h.bf16 %v350_v9  ;;  %v411_v18 = vunpack.c.h.bf16 %v351_v10  ;;  %v408_v19 = vunpack.c.l.bf16 %v350_v9  ;;  %v410_v20 = vunpack.c.l.bf16 %v351_v10  ;;  %v346_v21 = vld [vmem:[#allocation4 + $0xb0] sm:$0xff]  ;;  %v347_v22 = vld [vmem:[#allocation4 + $0xb8] sm:$0xff]  ;;  %v344_v27 = vld [vmem:[#allocation4 + $0xa0] sm:$0xff]  ;;  %s4746_s24 = smov (!%p4439_p2, %s3573_s24), 31 }
  0x7e   : > { %443 = vmatpush1.msra.mxu0 %v416_v6  ;;  %514 = vmatpush1.msra.mxu1 %v418_v7  ;;  %v405_v23 = vunpack.c.h.bf16 %v348_v15  ;;  %v407_v24 = vunpack.c.h.bf16 %v349_v16  ;;  %v404_v25 = vunpack.c.l.bf16 %v348_v15  ;;  %v406_v26 = vunpack.c.l.bf16 %v349_v16  ;;  %v345_v28 = vld [vmem:[#allocation4 + $0xa8] sm:$0xff]  ;;  %v342_v33 = vld [vmem:[#allocation4 + $0x90] sm:$0xff]  ;;  %v343_v34 = vld [vmem:[#allocation4 + $0x98] sm:$0xff]  ;;  %s3574_s22 = sshll.u32 %s4746_s24, 1 }
  0x7f   : > { %444 = vmatprep.subr.mxu0 %v413_v11  ;;  %515 = vmatprep.subr.mxu1 %v415_v12  ;;  %v401_v29 = vunpack.c.h.bf16 %v346_v21  ;;  %v403_v30 = vunpack.c.h.bf16 %v347_v22  ;;  %v400_v31 = vunpack.c.l.bf16 %v346_v21  ;;  %v402_v32 = vunpack.c.l.bf16 %v347_v22  ;;  %v340_v39 = vld [vmem:[#allocation4 + $0x80] sm:$0xff]  ;;  %v341_v40 = vld [vmem:[#allocation4 + $0x88] sm:$0xff]  ;;  %v338_v45 = vld [vmem:[#allocation4 + $0x70] sm:$0xff]  ;;  %s4472_s13 = scalar_lea.vmem %s4720_s5, %s3574_s22 }
  0x80   : > { %445 = vmatpush1.msra.mxu0 %v412_v13  ;;  %516 = vmatpush1.msra.mxu1 %v414_v14  ;;  %v397_v35 = vunpack.c.h.bf16 %v344_v27  ;;  %v399_v36 = vunpack.c.h.bf16 %v345_v28  ;;  %v396_v37 = vunpack.c.l.bf16 %v344_v27  ;;  %v398_v38 = vunpack.c.l.bf16 %v345_v28  ;;  %v339_v46 = vld [vmem:[#allocation4 + $0x78] sm:$0xff]  ;;  %v336_v51 = vld [vmem:[#allocation4 + $0x60] sm:$0xff]  ;;  %v337_v52 = vld [vmem:[#allocation4 + $0x68] sm:$0xff] }
  0x81   : > { %446 = vmatprep.subr.mxu0 %v409_v17  ;;  %517 = vmatprep.subr.mxu1 %v411_v18  ;;  %v393_v41 = vunpack.c.h.bf16 %v342_v33  ;;  %v395_v42 = vunpack.c.h.bf16 %v343_v34  ;;  %v392_v43 = vunpack.c.l.bf16 %v342_v33  ;;  %v394_v44 = vunpack.c.l.bf16 %v343_v34  ;;  %v334_v57 = vld [vmem:[#allocation4 + $0x50] sm:$0xff]  ;;  %v335_v58 = vld [vmem:[#allocation4 + $0x58] sm:$0xff]  ;;  %v332_v63 = vld [vmem:[#allocation4 + $0x40] sm:$0xff] }
  0x82   : > { %447 = vmatpush1.msra.mxu0 %v408_v19  ;;  %518 = vmatpush1.msra.mxu1 %v410_v20  ;;  %v389_v47 = vunpack.c.h.bf16 %v340_v39  ;;  %v391_v48 = vunpack.c.h.bf16 %v341_v40  ;;  %v388_v49 = vunpack.c.l.bf16 %v340_v39  ;;  %v390_v50 = vunpack.c.l.bf16 %v341_v40  ;;  %v333_v0 = vld [vmem:[#allocation4 + $0x48] sm:$0xff]  ;;  %v330_v5 = vld [vmem:[#allocation4 + $0x30] sm:$0xff]  ;;  %v331_v6 = vld [vmem:[#allocation4 + $0x38] sm:$0xff] }
  0x83   : > { %448 = vmatprep.subr.mxu0 %v405_v23  ;;  %519 = vmatprep.subr.mxu1 %v407_v24  ;;  %v385_v53 = vunpack.c.h.bf16 %v338_v45  ;;  %v387_v54 = vunpack.c.h.bf16 %v339_v46  ;;  %v384_v55 = vunpack.c.l.bf16 %v338_v45  ;;  %v386_v56 = vunpack.c.l.bf16 %v339_v46  ;;  %v328_v11 = vld [vmem:[#allocation4 + $0x20] sm:$0xff]  ;;  %v329_v12 = vld [vmem:[#allocation4 + $0x28] sm:$0xff]  ;;  %v326_v17 = vld [vmem:[#allocation4 + $0x10] sm:$0xff] }
  0x84   : > { %449 = vmatpush1.msra.mxu0 %v404_v25  ;;  %520 = vmatpush1.msra.mxu1 %v406_v26  ;;  %v381_v59 = vunpack.c.h.bf16 %v336_v51  ;;  %v383_v60 = vunpack.c.h.bf16 %v337_v52  ;;  %v380_v61 = vunpack.c.l.bf16 %v336_v51  ;;  %v382_v62 = vunpack.c.l.bf16 %v337_v52  ;;  %v327_v18 = vld [vmem:[#allocation4 + $0x18] sm:$0xff]  ;;  %v324_v23 = vld [vmem:[#allocation4] sm:$0xff]  ;;  %v325_v24 = vld [vmem:[#allocation4 + $0x8] sm:$0xff] }
  0x85   : > { %450 = vmatprep.subr.mxu0 %v401_v29  ;;  %521 = vmatprep.subr.mxu1 %v403_v30  ;;  %v377_v1 = vunpack.c.h.bf16 %v334_v57  ;;  %v379_v2 = vunpack.c.h.bf16 %v335_v58  ;;  %v376_v3 = vunpack.c.l.bf16 %v334_v57  ;;  %v378_v4 = vunpack.c.l.bf16 %v335_v58 }
  0x86   : > { %451 = vmatpush1.msra.mxu0 %v400_v31  ;;  %522 = vmatpush1.msra.mxu1 %v402_v32  ;;  %v373_v7 = vunpack.c.h.bf16 %v332_v63  ;;  %v375_v8 = vunpack.c.h.bf16 %v333_v0  ;;  %v372_v9 = vunpack.c.l.bf16 %v332_v63  ;;  %v374_v10 = vunpack.c.l.bf16 %v333_v0  ;;  %v708_v31 = vld [vmem:[%s4048_s9 + $0x3c0] sm:$0xff] }
  0x87   : > { %452 = vmatprep.subr.mxu0 %v397_v35  ;;  %523 = vmatprep.subr.mxu1 %v399_v36  ;;  %v369_v13 = vunpack.c.h.bf16 %v330_v5  ;;  %v371_v14 = vunpack.c.h.bf16 %v331_v6  ;;  %v368_v15 = vunpack.c.l.bf16 %v330_v5  ;;  %v370_v16 = vunpack.c.l.bf16 %v331_v6  ;;  %v964_v32 = vld [vmem:[%s4048_s9 + $0xbc0] sm:$0xff] }
  0x88   : > { %453 = vmatpush1.msra.mxu0 %v396_v37  ;;  %524 = vmatpush1.msra.mxu1 %v398_v38  ;;  %v365_v19 = vunpack.c.h.bf16 %v328_v11  ;;  %v367_v20 = vunpack.c.h.bf16 %v329_v12  ;;  %v364_v21 = vunpack.c.l.bf16 %v328_v11  ;;  %v366_v22 = vunpack.c.l.bf16 %v329_v12  ;;  %v700_v35 = vld [vmem:[%s4048_s9 + $0x380] sm:$0xff]  ;;  %v323_v37 = vld [vmem:[#allocation2] sm:$0x3] }
  0x89   : > { %454 = vmatprep.subr.mxu0 %v393_v41  ;;  %525 = vmatprep.subr.mxu1 %v395_v42  ;;  %v361_v25 = vunpack.c.h.bf16 %v326_v17  ;;  %v363_v26 = vunpack.c.h.bf16 %v327_v18  ;;  %v360_v27 = vunpack.c.l.bf16 %v326_v17  ;;  %v362_v28 = vunpack.c.l.bf16 %v327_v18  ;;  %v956_v36 = vld [vmem:[%s4048_s9 + $0xb80] sm:$0xff] }
  0x8a   : > { %455 = vmatpush1.msra.mxu0 %v392_v43  ;;  %526 = vmatpush1.msra.mxu1 %v394_v44  ;;  %v357_v29 = vunpack.c.h.bf16 %v324_v23  ;;  %v359_v30 = vunpack.c.h.bf16 %v325_v24  ;;  %v356_v33 = vunpack.c.l.bf16 %v324_v23  ;;  %v358_v34 = vunpack.c.l.bf16 %v325_v24  ;;  %v692_v42 = vld [vmem:[%s4048_s9 + $0x340] sm:$0xff] }
  0x8b   : > { %456 = vmatprep.subr.mxu0 %v389_v47  ;;  %527 = vmatprep.subr.mxu1 %v391_v48  ;;  %v1341_v38 = vunpack.c.h.bf16 %v708_v31  ;;  %v1853_v39 = vunpack.c.h.bf16 %v964_v32  ;;  %v1340_v40 = vunpack.c.l.bf16 %v708_v31  ;;  %v1852_v41 = vunpack.c.l.bf16 %v964_v32  ;;  %v948_v43 = vld [vmem:[%s4048_s9 + $0xb40] sm:$0xff] }
  0x8c   : > { %457 = vmatpush1.msra.mxu0 %v388_v49  ;;  %528 = vmatpush1.msra.mxu1 %v390_v50  ;;  %v1325_v44 = vunpack.c.h.bf16 %v700_v35  ;;  %v1837_v45 = vunpack.c.h.bf16 %v956_v36  ;;  %v1324_v46 = vunpack.c.l.bf16 %v700_v35  ;;  %v1836_v47 = vunpack.c.l.bf16 %v956_v36  ;;  %v684_v48 = vld [vmem:[%s4048_s9 + $0x300] sm:$0xff] }
  0x8d   : > { %458 = vmatprep.subr.mxu0 %v385_v53  ;;  %529 = vmatprep.subr.mxu1 %v387_v54  ;;  %v940_v49 = vld [vmem:[%s4048_s9 + $0xb00] sm:$0xff]  ;;  %v1309_v50 = vunpack.c.h.bf16 %v692_v42  ;;  %v1821_v51 = vunpack.c.h.bf16 %v948_v43  ;;  %v1308_v52 = vunpack.c.l.bf16 %v692_v42  ;;  %v1820_v53 = vunpack.c.l.bf16 %v948_v43 }
  0x8e   : > { %459 = vmatpush1.msra.mxu0 %v384_v55  ;;  %530 = vmatpush1.msra.mxu1 %v386_v56  ;;  %v676_v54 = vld [vmem:[%s4048_s9 + $0x2c0] sm:$0xff]  ;;  %v1293_v56 = vunpack.c.h.bf16 %v684_v48  ;;  %v1805_v57 = vunpack.c.h.bf16 %v940_v49  ;;  %v1292_v58 = vunpack.c.l.bf16 %v684_v48 }
  0x8f   : > { %460 = vmatprep.subr.mxu0 %v381_v59  ;;  %531 = vmatprep.subr.mxu1 %v383_v60  ;;  %v932_v55 = vld [vmem:[%s4048_s9 + $0xac0] sm:$0xff]  ;;  %v1804_v59 = vunpack.c.l.bf16 %v940_v49  ;;  %v1276_v0 = vunpack.c.l.bf16 %v676_v54 }
  0x90   : > { %461 = vmatpush1.msra.mxu0 %v380_v61  ;;  %532 = vmatpush1.msra.mxu1 %v382_v62  ;;  %v668_v60 = vld [vmem:[%s4048_s9 + $0x280] sm:$0xff]  ;;  %v1277_v62 = vunpack.c.h.bf16 %v676_v54  ;;  %v1789_v63 = vunpack.c.h.bf16 %v932_v55 }
  0x91   : > { %462 = vmatprep.subr.mxu0 %v377_v1  ;;  %533 = vmatprep.subr.mxu1 %v379_v2  ;;  %v924_v61 = vld [vmem:[%s4048_s9 + $0xa80] sm:$0xff]  ;;  %v1788_v1 = vunpack.c.l.bf16 %v932_v55  ;;  %v1260_v6 = vunpack.c.l.bf16 %v668_v60 }
  0x92   : > { %463 = vmatpush1.msra.mxu0 %v376_v3  ;;  %534 = vmatpush1.msra.mxu1 %v378_v4  ;;  %v660_v2 = vld [vmem:[%s4048_s9 + $0x240] sm:$0xff]  ;;  %v1261_v4 = vunpack.c.h.bf16 %v668_v60  ;;  %v1773_v5 = vunpack.c.h.bf16 %v924_v61 }
  0x93   : > { %464 = vmatprep.subr.mxu0 %v373_v7  ;;  %535 = vmatprep.subr.mxu1 %v375_v8  ;;  %v916_v3 = vld [vmem:[%s4048_s9 + $0xa40] sm:$0xff]  ;;  %v1772_v7 = vunpack.c.l.bf16 %v924_v61  ;;  %v1244_v12 = vunpack.c.l.bf16 %v660_v2 }
  0x94   : > { %465 = vmatpush1.msra.mxu0 %v372_v9  ;;  %536 = vmatpush1.msra.mxu1 %v374_v10  ;;  %v652_v8 = vld [vmem:[%s4048_s9 + $0x200] sm:$0xff]  ;;  %v1245_v10 = vunpack.c.h.bf16 %v660_v2  ;;  %v1757_v11 = vunpack.c.h.bf16 %v916_v3 }
  0x95   : > { %466 = vmatprep.subr.mxu0 %v369_v13  ;;  %537 = vmatprep.subr.mxu1 %v371_v14  ;;  %v908_v9 = vld [vmem:[%s4048_s9 + $0xa00] sm:$0xff]  ;;  %v1756_v13 = vunpack.c.l.bf16 %v916_v3  ;;  %v1228_v18 = vunpack.c.l.bf16 %v652_v8 }
  0x96   : > { %467 = vmatpush1.msra.mxu0 %v368_v15  ;;  %538 = vmatpush1.msra.mxu1 %v370_v16  ;;  %v644_v14 = vld [vmem:[%s4048_s9 + $0x1c0] sm:$0xff]  ;;  %v1229_v16 = vunpack.c.h.bf16 %v652_v8  ;;  %v1741_v17 = vunpack.c.h.bf16 %v908_v9 }
  0x97   : > { %468 = vmatprep.subr.mxu0 %v365_v19  ;;  %539 = vmatprep.subr.mxu1 %v367_v20  ;;  %v900_v15 = vld [vmem:[%s4048_s9 + $0x9c0] sm:$0xff]  ;;  %v1740_v19 = vunpack.c.l.bf16 %v908_v9  ;;  %v1212_v24 = vunpack.c.l.bf16 %v644_v14 }
  0x98   : > { %469 = vmatpush1.msra.mxu0 %v364_v21  ;;  %540 = vmatpush1.msra.mxu1 %v366_v22  ;;  %v636_v20 = vld [vmem:[%s4048_s9 + $0x180] sm:$0xff]  ;;  %v1213_v22 = vunpack.c.h.bf16 %v644_v14  ;;  %v1725_v23 = vunpack.c.h.bf16 %v900_v15 }
  0x99   : > { %470 = vmatprep.subr.mxu0 %v361_v25  ;;  %541 = vmatprep.subr.mxu1 %v363_v26  ;;  %v892_v21 = vld [vmem:[%s4048_s9 + $0x980] sm:$0xff]  ;;  %v1724_v25 = vunpack.c.l.bf16 %v900_v15 }
  0x9a   : > { %471 = vmatpush1.msra.mxu0 %v360_v27  ;;  %542 = vmatpush1.msra.mxu1 %v362_v28  ;;  %v628_v26 = vld [vmem:[%s4048_s9 + $0x140] sm:$0xff]  ;;  %v1197_v28 = vunpack.c.h.bf16 %v636_v20  ;;  %v1708_v31 = vunpack.c.l.bf16 %v892_v21 }
  0x9b   : > { %472 = vmatprep.subr.mxu0 %v357_v29  ;;  %543 = vmatprep.subr.mxu1 %v359_v30  ;;  %v884_v27 = vld [vmem:[%s4048_s9 + $0x940] sm:$0xff]  ;;  %v1709_v29 = vunpack.c.h.bf16 %v892_v21  ;;  %v1196_v30 = vunpack.c.l.bf16 %v636_v20  ;;  %v1180_v36 = vunpack.c.l.bf16 %v628_v26 }
  0x9c   : > { %473 = vmatpush1.msra.mxu0 %v356_v33  ;;  %544 = vmatpush1.msra.mxu1 %v358_v34  ;;  %v620_v32 = vld [vmem:[%s4048_s9 + $0x100] sm:$0xff]  ;;  %v1181_v34 = vunpack.c.h.bf16 %v628_v26  ;;  %v1693_v35 = vunpack.c.h.bf16 %v884_v27 }
  0x9d   : > { %507 = vmatmul.mubr.f32.vlgmr.msra.gmra.mxu0 %v323_v37  ;;  %578 = vmatmul.mubr.f32.vlgmr.msra.gmra.mxu1 %v323_v37  ;;  %v876_v33 = vld [vmem:[%s4048_s9 + $0x900] sm:$0xff]  ;;  %v1692_v37 = vunpack.c.l.bf16 %v884_v27  ;;  %v1164_v42 = vunpack.c.l.bf16 %v620_v32 }
  0x9e   : > { %2208 = vmatprep.subr.mxu0 %v1341_v38  ;;  %2279 = vmatprep.subr.mxu1 %v1853_v39  ;;  %v612_v38 = vld [vmem:[%s4048_s9 + $0xc0] sm:$0xff]  ;;  %v1676_v43 = vunpack.c.l.bf16 %v876_v33 }
  0x9f   : > { %2209 = vmatpush1.msra.mxu0 %v1340_v40  ;;  %2280 = vmatpush1.msra.mxu1 %v1852_v41  ;;  %v868_v39 = vld [vmem:[%s4048_s9 + $0x8c0] sm:$0xff]  ;;  %v1165_v40 = vunpack.c.h.bf16 %v620_v32  ;;  %v1677_v41 = vunpack.c.h.bf16 %v876_v33  ;;  %v1148_v48 = vunpack.c.l.bf16 %v612_v38 }
  0xa0   : > { %2210 = vmatprep.subr.mxu0 %v1325_v44  ;;  %2281 = vmatprep.subr.mxu1 %v1837_v45  ;;  %v604_v44 = vld [vmem:[%s4048_s9 + $0x80] sm:$0xff]  ;;  %v1660_v49 = vunpack.c.l.bf16 %v868_v39 }
  0xa1   : > { %2211 = vmatpush1.msra.mxu0 %v1324_v46  ;;  %2282 = vmatpush1.msra.mxu1 %v1836_v47  ;;  %v860_v45 = vld [vmem:[%s4048_s9 + $0x880] sm:$0xff]  ;;  %v1149_v46 = vunpack.c.h.bf16 %v612_v38  ;;  %v1661_v47 = vunpack.c.h.bf16 %v868_v39  ;;  %v1132_v54 = vunpack.c.l.bf16 %v604_v44 }
  0xa2   : > { %2212 = vmatprep.subr.mxu0 %v1309_v50  ;;  %2283 = vmatprep.subr.mxu1 %v1821_v51  ;;  %v596_v50 = vld [vmem:[%s4048_s9 + $0x40] sm:$0xff]  ;;  %v1644_v55 = vunpack.c.l.bf16 %v860_v45 }
  0xa3   : > { %2213 = vmatpush1.msra.mxu0 %v1308_v52  ;;  %2284 = vmatpush1.msra.mxu1 %v1820_v53  ;;  %v852_v51 = vld [vmem:[%s4048_s9 + $0x840] sm:$0xff]  ;;  %v1133_v52 = vunpack.c.h.bf16 %v604_v44  ;;  %v1645_v53 = vunpack.c.h.bf16 %v860_v45  ;;  %v1116_v60 = vunpack.c.l.bf16 %v596_v50 }
  0xa4   : > { %2214 = vmatprep.subr.mxu0 %v1293_v56  ;;  %2285 = vmatprep.subr.mxu1 %v1805_v57  ;;  %v588_v56 = vld [vmem:[%s4048_s9] sm:$0xff]  ;;  %v1628_v61 = vunpack.c.l.bf16 %v852_v51 }
  0xa5   : > { %2215 = vmatpush1.msra.mxu0 %v1292_v58  ;;  %2286 = vmatpush1.msra.mxu1 %v1804_v59  ;;  %v844_v57 = vld [vmem:[%s4048_s9 + $0x800] sm:$0xff]  ;;  %v1117_v58 = vunpack.c.h.bf16 %v596_v50  ;;  %v1629_v59 = vunpack.c.h.bf16 %v852_v51  ;;  %v1100_v2 = vunpack.c.l.bf16 %v588_v56 }
  0xa6   : > { %2216 = vmatprep.subr.mxu0 %v1277_v62  ;;  %2287 = vmatprep.subr.mxu1 %v1789_v63  ;;  %v836_v62 = vld [vmem:[%s4048_s9 + $0x7c0] sm:$0xff]  ;;  %v1612_v3 = vunpack.c.l.bf16 %v844_v57 }
  0xa7   : > { %2217 = vmatpush1.msra.mxu0 %v1276_v0  ;;  %2288 = vmatpush1.msra.mxu1 %v1788_v1  ;;  %v1092_v63 = vld [vmem:[%s4048_s9 + $0xfc0] sm:$0xff]  ;;  %v1101_v0 = vunpack.c.h.bf16 %v588_v56  ;;  %v1613_v1 = vunpack.c.h.bf16 %v844_v57  ;;  %v1596_v8 = vunpack.c.l.bf16 %v836_v62 }
  0xa8   : > { %2218 = vmatprep.subr.mxu0 %v1261_v4  ;;  %2289 = vmatprep.subr.mxu1 %v1773_v5  ;;  %v828_v4 = vld [vmem:[%s4048_s9 + $0x780] sm:$0xff]  ;;  %v2108_v9 = vunpack.c.l.bf16 %v1092_v63 }
  0xa9   : > { %2219 = vmatpush1.msra.mxu0 %v1260_v6  ;;  %2290 = vmatpush1.msra.mxu1 %v1772_v7  ;;  %v1084_v5 = vld [vmem:[%s4048_s9 + $0xf80] sm:$0xff]  ;;  %v1597_v6 = vunpack.c.h.bf16 %v836_v62  ;;  %v2109_v7 = vunpack.c.h.bf16 %v1092_v63  ;;  %v1580_v14 = vunpack.c.l.bf16 %v828_v4 }
  0xaa   : > { %2220 = vmatprep.subr.mxu0 %v1245_v10  ;;  %2291 = vmatprep.subr.mxu1 %v1757_v11  ;;  %v820_v10 = vld [vmem:[%s4048_s9 + $0x740] sm:$0xff]  ;;  %v2092_v15 = vunpack.c.l.bf16 %v1084_v5 }
  0xab   : > { %2221 = vmatpush1.msra.mxu0 %v1244_v12  ;;  %2292 = vmatpush1.msra.mxu1 %v1756_v13  ;;  %v1076_v11 = vld [vmem:[%s4048_s9 + $0xf40] sm:$0xff]  ;;  %v1581_v12 = vunpack.c.h.bf16 %v828_v4  ;;  %v2093_v13 = vunpack.c.h.bf16 %v1084_v5  ;;  %v1564_v20 = vunpack.c.l.bf16 %v820_v10 }
  0xac   : > { %2222 = vmatprep.subr.mxu0 %v1229_v16  ;;  %2293 = vmatprep.subr.mxu1 %v1741_v17  ;;  %v812_v16 = vld [vmem:[%s4048_s9 + $0x700] sm:$0xff]  ;;  %v2076_v21 = vunpack.c.l.bf16 %v1076_v11 }
  0xad   : > { %2223 = vmatpush1.msra.mxu0 %v1228_v18  ;;  %2294 = vmatpush1.msra.mxu1 %v1740_v19  ;;  %v1068_v17 = vld [vmem:[%s4048_s9 + $0xf00] sm:$0xff]  ;;  %v1565_v18 = vunpack.c.h.bf16 %v820_v10  ;;  %v2077_v19 = vunpack.c.h.bf16 %v1076_v11  ;;  %v1548_v26 = vunpack.c.l.bf16 %v812_v16 }
  0xae   : > { %2224 = vmatprep.subr.mxu0 %v1213_v22  ;;  %2295 = vmatprep.subr.mxu1 %v1725_v23  ;;  %v804_v22 = vld [vmem:[%s4048_s9 + $0x6c0] sm:$0xff]  ;;  %v2060_v27 = vunpack.c.l.bf16 %v1068_v17 }
  0xaf   : > { %2225 = vmatpush1.msra.mxu0 %v1212_v24  ;;  %2296 = vmatpush1.msra.mxu1 %v1724_v25  ;;  %v1060_v23 = vld [vmem:[%s4048_s9 + $0xec0] sm:$0xff]  ;;  %v1549_v24 = vunpack.c.h.bf16 %v812_v16  ;;  %v2061_v25 = vunpack.c.h.bf16 %v1068_v17  ;;  %v1532_v32 = vunpack.c.l.bf16 %v804_v22 }
  0xb0   : > { %2226 = vmatprep.subr.mxu0 %v1197_v28  ;;  %2297 = vmatprep.subr.mxu1 %v1709_v29  ;;  %v796_v28 = vld [vmem:[%s4048_s9 + $0x680] sm:$0xff]  ;;  %v2044_v33 = vunpack.c.l.bf16 %v1060_v23 }
  0xb1   : > { %2227 = vmatpush1.msra.mxu0 %v1196_v30  ;;  %2298 = vmatpush1.msra.mxu1 %v1708_v31  ;;  %v1052_v29 = vld [vmem:[%s4048_s9 + $0xe80] sm:$0xff]  ;;  %v1533_v30 = vunpack.c.h.bf16 %v804_v22  ;;  %v2045_v31 = vunpack.c.h.bf16 %v1060_v23  ;;  %v1516_v38 = vunpack.c.l.bf16 %v796_v28 }
  0xb2   : > { %2228 = vmatprep.subr.mxu0 %v1181_v34  ;;  %2299 = vmatprep.subr.mxu1 %v1693_v35  ;;  %v788_v34 = vld [vmem:[%s4048_s9 + $0x640] sm:$0xff]  ;;  %v2028_v39 = vunpack.c.l.bf16 %v1052_v29 }
  0xb3   : > { %2229 = vmatpush1.msra.mxu0 %v1180_v36  ;;  %2300 = vmatpush1.msra.mxu1 %v1692_v37  ;;  %v1044_v35 = vld [vmem:[%s4048_s9 + $0xe40] sm:$0xff]  ;;  %v1517_v36 = vunpack.c.h.bf16 %v796_v28  ;;  %v2029_v37 = vunpack.c.h.bf16 %v1052_v29  ;;  %v1500_v44 = vunpack.c.l.bf16 %v788_v34 }
  0xb4   : > { %2230 = vmatprep.subr.mxu0 %v1165_v40  ;;  %2301 = vmatprep.subr.mxu1 %v1677_v41  ;;  %v780_v40 = vld [vmem:[%s4048_s9 + $0x600] sm:$0xff]  ;;  %v2012_v45 = vunpack.c.l.bf16 %v1044_v35 }
  0xb5   : > { %2231 = vmatpush1.msra.mxu0 %v1164_v42  ;;  %2302 = vmatpush1.msra.mxu1 %v1676_v43  ;;  %v1036_v41 = vld [vmem:[%s4048_s9 + $0xe00] sm:$0xff]  ;;  %v1501_v42 = vunpack.c.h.bf16 %v788_v34  ;;  %v2013_v43 = vunpack.c.h.bf16 %v1044_v35  ;;  %v1484_v50 = vunpack.c.l.bf16 %v780_v40  ;;  %v709_v34 = vld [vmem:[%s4048_s9 + $0x3c8] sm:$0xff] }
  0xb6   : > { %2232 = vmatprep.subr.mxu0 %v1149_v46  ;;  %2303 = vmatprep.subr.mxu1 %v1661_v47  ;;  %v772_v46 = vld [vmem:[%s4048_s9 + $0x5c0] sm:$0xff]  ;;  %v1996_v51 = vunpack.c.l.bf16 %v1036_v41  ;;  %v965_v35 = vld [vmem:[%s4048_s9 + $0xbc8] sm:$0xff] }
  0xb7   : > { %2233 = vmatpush1.msra.mxu0 %v1148_v48  ;;  %2304 = vmatpush1.msra.mxu1 %v1660_v49  ;;  %v1028_v47 = vld [vmem:[%s4048_s9 + $0xdc0] sm:$0xff]  ;;  %v1485_v48 = vunpack.c.h.bf16 %v780_v40  ;;  %v1997_v49 = vunpack.c.h.bf16 %v1036_v41  ;;  %v1468_v56 = vunpack.c.l.bf16 %v772_v46 }
  0xb8   : > { %2234 = vmatprep.subr.mxu0 %v1133_v52  ;;  %2305 = vmatprep.subr.mxu1 %v1645_v53  ;;  %v764_v52 = vld [vmem:[%s4048_s9 + $0x580] sm:$0xff]  ;;  %v1980_v57 = vunpack.c.l.bf16 %v1028_v47 }
  0xb9   : > { %2235 = vmatpush1.msra.mxu0 %v1132_v54  ;;  %2306 = vmatpush1.msra.mxu1 %v1644_v55  ;;  %v1020_v53 = vld [vmem:[%s4048_s9 + $0xd80] sm:$0xff]  ;;  %v1469_v54 = vunpack.c.h.bf16 %v772_v46  ;;  %v1981_v55 = vunpack.c.h.bf16 %v1028_v47  ;;  %v1452_v62 = vunpack.c.l.bf16 %v764_v52 }
  0xba   : > { %2236 = vmatprep.subr.mxu0 %v1117_v58  ;;  %2307 = vmatprep.subr.mxu1 %v1629_v59  ;;  %v756_v58 = vld [vmem:[%s4048_s9 + $0x540] sm:$0xff]  ;;  %v1964_v63 = vunpack.c.l.bf16 %v1020_v53 }
  0xbb   : > { %2237 = vmatpush1.msra.mxu0 %v1116_v60  ;;  %2308 = vmatpush1.msra.mxu1 %v1628_v61  ;;  %v1012_v59 = vld [vmem:[%s4048_s9 + $0xd40] sm:$0xff]  ;;  %v1453_v60 = vunpack.c.h.bf16 %v764_v52  ;;  %v1965_v61 = vunpack.c.h.bf16 %v1020_v53  ;;  %v1436_v4 = vunpack.c.l.bf16 %v756_v58 }
  0xbc   : > { %2238 = vmatprep.subr.mxu0 %v1101_v0  ;;  %2309 = vmatprep.subr.mxu1 %v1613_v1  ;;  %v748_v0 = vld [vmem:[%s4048_s9 + $0x500] sm:$0xff]  ;;  %v1948_v5 = vunpack.c.l.bf16 %v1012_v59 }
  0xbd   : > { %2239 = vmatpush1.msra.mxu0 %v1100_v2  ;;  %2310 = vmatpush1.msra.mxu1 %v1612_v3  ;;  %v1004_v1 = vld [vmem:[%s4048_s9 + $0xd00] sm:$0xff]  ;;  %v1437_v2 = vunpack.c.h.bf16 %v756_v58  ;;  %v1949_v3 = vunpack.c.h.bf16 %v1012_v59  ;;  %v1420_v10 = vunpack.c.l.bf16 %v748_v0  ;;  %v957_v59 = vld [vmem:[%s4048_s9 + $0xb88] sm:$0xff] }
  0xbe   : > { %2240 = vmatprep.subr.mxu0 %v1597_v6  ;;  %2311 = vmatprep.subr.mxu1 %v2109_v7  ;;  %v740_v6 = vld [vmem:[%s4048_s9 + $0x4c0] sm:$0xff]  ;;  %v1932_v11 = vunpack.c.l.bf16 %v1004_v1 }
  0xbf   : > { %2241 = vmatpush2.msra.mxu0 %v1596_v8  ;;  %2312 = vmatpush2.msra.mxu1 %v2108_v9  ;;  %v996_v7 = vld [vmem:[%s4048_s9 + $0xcc0] sm:$0xff]  ;;  %v1421_v8 = vunpack.c.h.bf16 %v748_v0  ;;  %v1933_v9 = vunpack.c.h.bf16 %v1004_v1 }
  0xc0   : > { %2242 = vmatprep.subr.mxu0 %v1581_v12  ;;  %2313 = vmatprep.subr.mxu1 %v2093_v13  ;;  %v1405_v12 = vunpack.c.h.bf16 %v740_v6  ;;  %v1917_v13 = vunpack.c.h.bf16 %v996_v7  ;;  %v732_v16 = vld [vmem:[%s4048_s9 + $0x480] sm:$0xff] }
  0xc1   : > { %2243 = vmatpush2.msra.mxu0 %v1580_v14  ;;  %2314 = vmatpush2.msra.mxu1 %v2092_v15  ;;  %v1404_v14 = vunpack.c.l.bf16 %v740_v6  ;;  %v1916_v15 = vunpack.c.l.bf16 %v996_v7  ;;  %v988_v17 = vld [vmem:[%s4048_s9 + $0xc80] sm:$0xff]  ;;  %v1838_v6 = vunpack.c.l.bf16 %v957_v59  ;;  %v685_v7 = vld [vmem:[%s4048_s9 + $0x308] sm:$0xff] }
  0xc2   : > { %2244 = vmatprep.subr.mxu0 %v1565_v18  ;;  %2315 = vmatprep.subr.mxu1 %v2077_v19  ;;  %v1389_v18 = vunpack.c.h.bf16 %v732_v16  ;;  %v1901_v19 = vunpack.c.h.bf16 %v988_v17  ;;  %v724_v22 = vld [vmem:[%s4048_s9 + $0x440] sm:$0xff] }
  0xc3   : > { %2245 = vmatpush2.msra.mxu0 %v1564_v20  ;;  %2316 = vmatpush2.msra.mxu1 %v2076_v21  ;;  %v1388_v20 = vunpack.c.l.bf16 %v732_v16  ;;  %v1900_v21 = vunpack.c.l.bf16 %v988_v17  ;;  %v980_v23 = vld [vmem:[%s4048_s9 + $0xc40] sm:$0xff]  ;;  %v1294_v17 = vunpack.c.l.bf16 %v685_v7 }
  0xc4   : > { %2246 = vmatprep.subr.mxu0 %v1549_v24  ;;  %2317 = vmatprep.subr.mxu1 %v2061_v25  ;;  %v1373_v24 = vunpack.c.h.bf16 %v724_v22  ;;  %v1885_v25 = vunpack.c.h.bf16 %v980_v23  ;;  %v716_v28 = vld [vmem:[%s4048_s9 + $0x400] sm:$0xff] }
  0xc5   : > { %2247 = vmatpush2.msra.mxu0 %v1548_v26  ;;  %2318 = vmatpush2.msra.mxu1 %v2060_v27  ;;  %v1372_v26 = vunpack.c.l.bf16 %v724_v22  ;;  %v1884_v27 = vunpack.c.l.bf16 %v980_v23  ;;  %v972_v29 = vld [vmem:[%s4048_s9 + $0xc00] sm:$0xff] }
  0xc6   : > { %2248 = vmatprep.subr.mxu0 %v1533_v30  ;;  %2319 = vmatprep.subr.mxu1 %v2045_v31  ;;  %v1357_v30 = vunpack.c.h.bf16 %v716_v28  ;;  %v1869_v31 = vunpack.c.h.bf16 %v972_v29 }
  0xc7   : > { %2249 = vmatpush2.msra.mxu0 %v1532_v32  ;;  %2320 = vmatpush2.msra.mxu1 %v2044_v33  ;;  %v1356_v32 = vunpack.c.l.bf16 %v716_v28  ;;  %v1868_v33 = vunpack.c.l.bf16 %v972_v29 }
  0xc8   : > { %2250 = vmatprep.subr.mxu0 %v1517_v36  ;;  %2321 = vmatprep.subr.mxu1 %v2029_v37  ;;  %v1343_v36 = vunpack.c.h.bf16 %v709_v34  ;;  %v1855_v37 = vunpack.c.h.bf16 %v965_v35 }
  0xc9   : > { %2251 = vmatpush2.msra.mxu0 %v1516_v38  ;;  %2322 = vmatpush2.msra.mxu1 %v2028_v39  ;;  %v422_v38 = vlaneseq }
  0xca   : > { %2252 = vmatprep.subr.mxu0 %v1501_v42  ;;  %2323 = vmatprep.subr.mxu1 %v2013_v43  ;;  %v420_v42 = vld [vmem:[#allocation6] sm:$0xf] }
  0xcb   : > { %2253 = vmatpush2.msra.mxu0 %v1500_v44  ;;  %2324 = vmatpush2.msra.mxu1 %v2012_v45  ;;  %v4120_v39 = vshrl.u32 %v422_v38, 7  ;;  %v901_v38 = vld [vmem:[%s4048_s9 + $0x9c8] sm:$0xff] }
  0xcc   : > { %2254 = vmatprep.subr.mxu0 %v1485_v48  ;;  %2325 = vmatprep.subr.mxu1 %v1997_v49 }
  0xcd   : > { %2255 = vmatpush2.msra.mxu0 %v1484_v50  ;;  %2326 = vmatpush2.msra.mxu1 %v1996_v51  ;;  %v4123_v40 = vsub.s32 2, %v4120_v39  ;;  %v4126_v41 = vsub.s32 0, %v4120_v39  ;;  %v4129_v43 = vsub.s32 1, %v4120_v39  ;;  %v4132_v44 = vsub.s32 3, %v4120_v39 }
  0xce   : > { %2256 = vmatprep.subr.mxu0 %v1469_v54  ;;  %2327 = vmatprep.subr.mxu1 %v1981_v55 }
  0xcf   : > { %2257 = vmatpush2.msra.mxu0 %v1468_v56  ;;  %2328 = vmatpush2.msra.mxu1 %v1980_v57  ;;  %v433_v45 = vrot.slane %v420_v42, %v4123_v40  ;;  %v425_v46 = vrot.slane %v420_v42, %v4126_v41  ;;  %v429_v47 = vrot.slane %v420_v42, %v4129_v43  ;;  %v701_v57 = vld [vmem:[%s4048_s9 + $0x388] sm:$0xff] }
  0xd0   : > { %2258 = vmatprep.subr.mxu0 %v1453_v60  ;;  %2329 = vmatprep.subr.mxu1 %v1965_v61  ;;  %v437_v48 = vrot.slane %v420_v42, %v4132_v44  ;;  %v1327_v1 = vunpack.c.h.bf16 %v701_v57 }
  0xd1   : > { %2259 = vmatpush2.msra.mxu0 %v1452_v62  ;;  %2330 = vmatpush2.msra.mxu1 %v1964_v63  ;;  %v1342_v62 = vunpack.c.l.bf16 %v709_v34  ;;  %v1854_v63 = vunpack.c.l.bf16 %v965_v35 }
  0xd2   : > { %2260 = vmatprep.subr.mxu0 %v1437_v2  ;;  %2331 = vmatprep.subr.mxu1 %v1949_v3  ;;  %v693_v2 = vld [vmem:[%s4048_s9 + $0x348] sm:$0xff] }
  0xd3   : > { %2261 = vmatpush2.msra.mxu0 %v1436_v4  ;;  %2332 = vmatpush2.msra.mxu1 %v1948_v5  ;;  %v949_v3 = vld [vmem:[%s4048_s9 + $0xb48] sm:$0xff]  ;;  %v1839_v4 = vunpack.c.h.bf16 %v957_v59  ;;  %v1326_v5 = vunpack.c.l.bf16 %v701_v57 }
  0xd4   : > { %2262 = vmatprep.subr.mxu0 %v1421_v8  ;;  %2333 = vmatprep.subr.mxu1 %v1933_v9  ;;  %v941_v8 = vld [vmem:[%s4048_s9 + $0xb08] sm:$0xff]  ;;  %v1311_v9 = vunpack.c.h.bf16 %v693_v2 }
  0xd5   : > { %2263 = vmatpush2.msra.mxu0 %v1420_v10  ;;  %2334 = vmatpush2.msra.mxu1 %v1932_v11  ;;  %v1823_v10 = vunpack.c.h.bf16 %v949_v3  ;;  %v1310_v11 = vunpack.c.l.bf16 %v693_v2  ;;  %v1807_v16 = vunpack.c.h.bf16 %v941_v8 }
  0xd6   : > { %2264 = vmatprep.subr.mxu0 %v1405_v12  ;;  %2335 = vmatprep.subr.mxu1 %v1917_v13  ;;  %v1822_v12 = vunpack.c.l.bf16 %v949_v3  ;;  %v677_v13 = vld [vmem:[%s4048_s9 + $0x2c8] sm:$0xff] }
  0xd7   : > { %2265 = vmatpush2.msra.mxu0 %v1404_v14  ;;  %2336 = vmatpush2.msra.mxu1 %v1916_v15  ;;  %v933_v14 = vld [vmem:[%s4048_s9 + $0xac8] sm:$0xff]  ;;  %v1295_v15 = vunpack.c.h.bf16 %v685_v7  ;;  %v1278_v23 = vunpack.c.l.bf16 %v677_v13 }
  0xd8   : > { %2266 = vmatprep.subr.mxu0 %v1389_v18  ;;  %2337 = vmatprep.subr.mxu1 %v1901_v19  ;;  %v1806_v18 = vunpack.c.l.bf16 %v941_v8  ;;  %v669_v19 = vld [vmem:[%s4048_s9 + $0x288] sm:$0xff]  ;;  %v1791_v22 = vunpack.c.h.bf16 %v933_v14 }
  0xd9   : > { %2267 = vmatpush2.msra.mxu0 %v1388_v20  ;;  %2338 = vmatpush2.msra.mxu1 %v1900_v21  ;;  %v925_v20 = vld [vmem:[%s4048_s9 + $0xa88] sm:$0xff]  ;;  %v1279_v21 = vunpack.c.h.bf16 %v677_v13  ;;  %v1262_v29 = vunpack.c.l.bf16 %v669_v19 }
  0xda   : > { %2268 = vmatprep.subr.mxu0 %v1373_v24  ;;  %2339 = vmatprep.subr.mxu1 %v1885_v25  ;;  %v1790_v24 = vunpack.c.l.bf16 %v933_v14  ;;  %v661_v25 = vld [vmem:[%s4048_s9 + $0x248] sm:$0xff]  ;;  %v1775_v28 = vunpack.c.h.bf16 %v925_v20 }
  0xdb   : > { %2269 = vmatpush2.msra.mxu0 %v1372_v26  ;;  %2340 = vmatpush2.msra.mxu1 %v1884_v27  ;;  %v917_v26 = vld [vmem:[%s4048_s9 + $0xa48] sm:$0xff]  ;;  %v1263_v27 = vunpack.c.h.bf16 %v669_v19  ;;  %v1246_v35 = vunpack.c.l.bf16 %v661_v25 }
  0xdc   : > { %2270 = vmatprep.subr.mxu0 %v1357_v30  ;;  %2341 = vmatprep.subr.mxu1 %v1869_v31  ;;  %v1774_v30 = vunpack.c.l.bf16 %v925_v20  ;;  %v653_v31 = vld [vmem:[%s4048_s9 + $0x208] sm:$0xff]  ;;  %v1759_v34 = vunpack.c.h.bf16 %v917_v26 }
  0xdd   : > { %2271 = vmatpush2.msra.mxu0 %v1356_v32  ;;  %2342 = vmatpush2.msra.mxu1 %v1868_v33  ;;  %v909_v32 = vld [vmem:[%s4048_s9 + $0xa08] sm:$0xff]  ;;  %v1247_v33 = vunpack.c.h.bf16 %v661_v25  ;;  %v1231_v42 = vunpack.c.h.bf16 %v653_v31 }
  0xde   : > { %2350 = vmatprep.subr.mxu0 %v1343_v36  ;;  %2421 = vmatprep.subr.mxu1 %v1855_v37  ;;  %v1758_v36 = vunpack.c.l.bf16 %v917_v26  ;;  %v645_v37 = vld [vmem:[%s4048_s9 + $0x1c8] sm:$0xff] }
  0xdf   : > { %v869_v7 = vld [vmem:[%s4048_s9 + $0x8c8] sm:$0xff] }
  0xe0   : > { %v861_v13 = vld [vmem:[%s4048_s9 + $0x888] sm:$0xff] }
  0xe1   : > { %v853_v19 = vld [vmem:[%s4048_s9 + $0x848] sm:$0xff] }
  0xe2   : > { %v845_v25 = vld [vmem:[%s4048_s9 + $0x808] sm:$0xff] }
 0x15d   : > { %v508_v49 = vpop.f32.mrf.mxu0  ;;  %v579_v50 = vpop.f32.mrf.mxu1 }
 0x15e   : > { %v580_v51 = vadd.f32 %v579_v50, %v433_v45  ;;  %v509_v52 = vadd.f32 %v508_v49, %v425_v46  ;;  %v1743_v45 = vunpack.c.h.bf16 %v909_v32  ;;  %v1230_v46 = vunpack.c.l.bf16 %v653_v31  ;;  %v893_v49 = vld [vmem:[%s4048_s9 + $0x988] sm:$0xff] }
 0x15f   : > { %v510_v53 = vpop.f32.mrf.mxu0  ;;  %v581_v54 = vpop.f32.mrf.mxu1  ;;  %v1215_v50 = vunpack.c.h.bf16 %v645_v37  ;;  %v1711_v57 = vunpack.c.h.bf16 %v893_v49  ;;  %v1093_v31 = vld [vmem:[%s4048_s9 + $0xfc8] sm:$0xff] }
 0x160   : > { %v511_v55 = vadd.f32 %v510_v53, %v429_v47  ;;  %v582_v56 = vadd.f32 %v581_v54, %v437_v48  ;;  %v4139_v58 = vmax.f32 %v580_v51, 0.0  ;;  %v4146_v0 = vmax.f32 %v509_v52, 0.0  ;;  %v637_v48 = vld [vmem:[%s4048_s9 + $0x188] sm:$0xff] }
 0x161   : > { %v1742_v47 = vunpack.c.l.bf16 %v909_v32  ;;  %v1727_v51 = vunpack.c.h.bf16 %v901_v38  ;;  %v1214_v52 = vunpack.c.l.bf16 %v645_v37  ;;  %v1726_v53 = vunpack.c.l.bf16 %v901_v38  ;;  %v629_v54 = vld [vmem:[%s4048_s9 + $0x148] sm:$0xff] }
 0x162   : > { %v4142_v60 = vmax.f32 %v511_v55, 0.0  ;;  %v4144_v61 = vmax.f32 %v582_v56, 0.0  ;;  %v885_v55 = vld [vmem:[%s4048_s9 + $0x948] sm:$0xff]  ;;  %v1199_v56 = vunpack.c.h.bf16 %v637_v48  ;;  %v1198_v59 = vunpack.c.l.bf16 %v637_v48 }
 0x163   : > { %v1183_v2 = vunpack.c.h.bf16 %v629_v54  ;;  %v1695_v3 = vunpack.c.h.bf16 %v885_v55  ;;  %v1085_v37 = vld [vmem:[%s4048_s9 + $0xf88] sm:$0xff] }
 0x164   : > { %2272 = vmatprep.mubr.f32.mxu0 %v4142_v60  ;;  %2343 = vmatprep.mubr.f32.mxu1 %v4144_v61  ;;  %v1077_v48 = vld [vmem:[%s4048_s9 + $0xf48] sm:$0xff] }
 0x165   : > { %2273 = vmatmul.mubr.f32.vlgmr.msra.gmra.mxu0 %v4146_v0  ;;  %2344 = vmatmul.mubr.f32.vlgmr.msra.gmra.mxu1 %v4139_v58 }
 0x166   : > { %2351 = vmatpush1.msra.mxu0 %v1342_v62  ;;  %2422 = vmatpush1.msra.mxu1 %v1854_v63  ;;  %v1710_v62 = vunpack.c.l.bf16 %v893_v49  ;;  %v621_v63 = vld [vmem:[%s4048_s9 + $0x108] sm:$0xff] }
 0x167   : > { %2352 = vmatprep.subr.mxu0 %v1327_v1  ;;  %2414 = vmatprep.mubr.f32.mxu0 %v4142_v60  ;;  %v877_v1 = vld [vmem:[%s4048_s9 + $0x908] sm:$0xff]  ;;  %v1167_v8 = vunpack.c.h.bf16 %v621_v63 }
 0x168   : > { %2423 = vmatprep.subr.mxu1 %v1839_v4  ;;  %2485 = vmatprep.mubr.f32.mxu1 %v4144_v61  ;;  %v1182_v4 = vunpack.c.l.bf16 %v629_v54  ;;  %v1069_v54 = vld [vmem:[%s4048_s9 + $0xf08] sm:$0xff] }
 0x169   : > { %2353 = vmatpush1.msra.mxu0 %v1326_v5  ;;  %2424 = vmatpush1.msra.mxu1 %v1838_v6  ;;  %v1694_v5 = vunpack.c.l.bf16 %v885_v55  ;;  %v613_v6 = vld [vmem:[%s4048_s9 + $0xc8] sm:$0xff] }
 0x16a   : > { %2354 = vmatprep.subr.mxu0 %v1311_v9  ;;  %2425 = vmatprep.subr.mxu1 %v1823_v10  ;;  %v1679_v9 = vunpack.c.h.bf16 %v877_v1  ;;  %v1166_v10 = vunpack.c.l.bf16 %v621_v63  ;;  %v1151_v14 = vunpack.c.h.bf16 %v613_v6  ;;  %v1061_v63 = vld [vmem:[%s4048_s9 + $0xec8] sm:$0xff] }
 0x16b   : > { %2355 = vmatpush1.msra.mxu0 %v1310_v11  ;;  %2426 = vmatpush1.msra.mxu1 %v1822_v12  ;;  %v1678_v11 = vunpack.c.l.bf16 %v877_v1  ;;  %v605_v12 = vld [vmem:[%s4048_s9 + $0x88] sm:$0xff] }
 0x16c   : > { %2356 = vmatprep.subr.mxu0 %v1295_v15  ;;  %2427 = vmatprep.subr.mxu1 %v1807_v16  ;;  %v1663_v15 = vunpack.c.h.bf16 %v869_v7  ;;  %v1150_v16 = vunpack.c.l.bf16 %v613_v6  ;;  %v1135_v20 = vunpack.c.h.bf16 %v605_v12  ;;  %v1053_v6 = vld [vmem:[%s4048_s9 + $0xe88] sm:$0xff] }
 0x16d   : > { %2357 = vmatpush1.msra.mxu0 %v1294_v17  ;;  %2428 = vmatpush1.msra.mxu1 %v1806_v18  ;;  %v1662_v17 = vunpack.c.l.bf16 %v869_v7  ;;  %v597_v18 = vld [vmem:[%s4048_s9 + $0x48] sm:$0xff] }
 0x16e   : > { %2358 = vmatprep.subr.mxu0 %v1279_v21  ;;  %2429 = vmatprep.subr.mxu1 %v1791_v22  ;;  %v1647_v21 = vunpack.c.h.bf16 %v861_v13  ;;  %v1134_v22 = vunpack.c.l.bf16 %v605_v12  ;;  %v1119_v26 = vunpack.c.h.bf16 %v597_v18  ;;  %v1045_v12 = vld [vmem:[%s4048_s9 + $0xe48] sm:$0xff] }
 0x16f   : > { %2359 = vmatpush1.msra.mxu0 %v1278_v23  ;;  %2430 = vmatpush1.msra.mxu1 %v1790_v24  ;;  %v1646_v23 = vunpack.c.l.bf16 %v861_v13  ;;  %v589_v24 = vld [vmem:[%s4048_s9 + $0x8] sm:$0xff] }
 0x170   : > { %2360 = vmatprep.subr.mxu0 %v1263_v27  ;;  %2431 = vmatprep.subr.mxu1 %v1775_v28  ;;  %v1631_v27 = vunpack.c.h.bf16 %v853_v19  ;;  %v1118_v28 = vunpack.c.l.bf16 %v597_v18  ;;  %v1103_v32 = vunpack.c.h.bf16 %v589_v24  ;;  %v1037_v18 = vld [vmem:[%s4048_s9 + $0xe08] sm:$0xff] }
 0x171   : > { %2361 = vmatpush1.msra.mxu0 %v1262_v29  ;;  %2432 = vmatpush1.msra.mxu1 %v1774_v30  ;;  %v1630_v29 = vunpack.c.l.bf16 %v853_v19  ;;  %v837_v30 = vld [vmem:[%s4048_s9 + $0x7c8] sm:$0xff] }
 0x172   : > { %2362 = vmatprep.subr.mxu0 %v1247_v33  ;;  %2433 = vmatprep.subr.mxu1 %v1759_v34  ;;  %v1615_v33 = vunpack.c.h.bf16 %v845_v25  ;;  %v1102_v34 = vunpack.c.l.bf16 %v589_v24  ;;  %v1599_v38 = vunpack.c.h.bf16 %v837_v30  ;;  %v1029_v24 = vld [vmem:[%s4048_s9 + $0xdc8] sm:$0xff] }
 0x173   : > { %2363 = vmatpush1.msra.mxu0 %v1246_v35  ;;  %2434 = vmatpush1.msra.mxu1 %v1758_v36  ;;  %v1614_v35 = vunpack.c.l.bf16 %v845_v25  ;;  %v829_v36 = vld [vmem:[%s4048_s9 + $0x788] sm:$0xff] }
 0x174   : > { %2364 = vmatprep.subr.mxu0 %v1231_v42  ;;  %2435 = vmatprep.subr.mxu1 %v1743_v45  ;;  %v2111_v42 = vunpack.c.h.bf16 %v1093_v31  ;;  %v1598_v45 = vunpack.c.l.bf16 %v837_v30  ;;  %v1583_v49 = vunpack.c.h.bf16 %v829_v36  ;;  %v1021_v30 = vld [vmem:[%s4048_s9 + $0xd88] sm:$0xff] }
 0x175   : > { %2365 = vmatpush1.msra.mxu0 %v1230_v46  ;;  %2436 = vmatpush1.msra.mxu1 %v1742_v47  ;;  %v2110_v46 = vunpack.c.l.bf16 %v1093_v31  ;;  %v821_v47 = vld [vmem:[%s4048_s9 + $0x748] sm:$0xff] }
 0x176   : > { %2366 = vmatprep.subr.mxu0 %v1215_v50  ;;  %2437 = vmatprep.subr.mxu1 %v1727_v51  ;;  %v2095_v50 = vunpack.c.h.bf16 %v1085_v37  ;;  %v1582_v51 = vunpack.c.l.bf16 %v829_v36  ;;  %v1567_v55 = vunpack.c.h.bf16 %v821_v47  ;;  %v1013_v36 = vld [vmem:[%s4048_s9 + $0xd48] sm:$0xff] }
 0x177   : > { %2367 = vmatpush1.msra.mxu0 %v1214_v52  ;;  %2438 = vmatpush1.msra.mxu1 %v1726_v53  ;;  %v2094_v52 = vunpack.c.l.bf16 %v1085_v37  ;;  %v813_v53 = vld [vmem:[%s4048_s9 + $0x708] sm:$0xff] }
 0x178   : > { %2368 = vmatprep.subr.mxu0 %v1199_v56  ;;  %2439 = vmatprep.subr.mxu1 %v1711_v57  ;;  %v2079_v56 = vunpack.c.h.bf16 %v1077_v48  ;;  %v1566_v57 = vunpack.c.l.bf16 %v821_v47  ;;  %v1551_v1 = vunpack.c.h.bf16 %v813_v53  ;;  %v1005_v47 = vld [vmem:[%s4048_s9 + $0xd08] sm:$0xff] }
 0x179   : > { %2369 = vmatpush1.msra.mxu0 %v1198_v59  ;;  %2440 = vmatpush1.msra.mxu1 %v1710_v62  ;;  %v2078_v59 = vunpack.c.l.bf16 %v1077_v48  ;;  %v805_v62 = vld [vmem:[%s4048_s9 + $0x6c8] sm:$0xff] }
 0x17a   : > { %2370 = vmatprep.subr.mxu0 %v1183_v2  ;;  %2441 = vmatprep.subr.mxu1 %v1695_v3  ;;  %v2063_v2 = vunpack.c.h.bf16 %v1069_v54  ;;  %v1550_v3 = vunpack.c.l.bf16 %v813_v53  ;;  %v1535_v7 = vunpack.c.h.bf16 %v805_v62  ;;  %v997_v53 = vld [vmem:[%s4048_s9 + $0xcc8] sm:$0xff] }
 0x17b   : > { %2371 = vmatpush1.msra.mxu0 %v1182_v4  ;;  %2442 = vmatpush1.msra.mxu1 %v1694_v5  ;;  %v2062_v4 = vunpack.c.l.bf16 %v1069_v54  ;;  %v797_v5 = vld [vmem:[%s4048_s9 + $0x688] sm:$0xff] }
 0x17c   : > { %2372 = vmatprep.subr.mxu0 %v1167_v8  ;;  %2443 = vmatprep.subr.mxu1 %v1679_v9  ;;  %v2047_v8 = vunpack.c.h.bf16 %v1061_v63  ;;  %v1534_v9 = vunpack.c.l.bf16 %v805_v62  ;;  %v1519_v13 = vunpack.c.h.bf16 %v797_v5  ;;  %v989_v62 = vld [vmem:[%s4048_s9 + $0xc88] sm:$0xff] }
 0x17d   : > { %2373 = vmatpush1.msra.mxu0 %v1166_v10  ;;  %2444 = vmatpush1.msra.mxu1 %v1678_v11  ;;  %v2046_v10 = vunpack.c.l.bf16 %v1061_v63  ;;  %v789_v11 = vld [vmem:[%s4048_s9 + $0x648] sm:$0xff] }
 0x17e   : > { %2374 = vmatprep.subr.mxu0 %v1151_v14  ;;  %2445 = vmatprep.subr.mxu1 %v1663_v15  ;;  %v2031_v14 = vunpack.c.h.bf16 %v1053_v6  ;;  %v1518_v15 = vunpack.c.l.bf16 %v797_v5  ;;  %v1503_v19 = vunpack.c.h.bf16 %v789_v11  ;;  %v981_v5 = vld [vmem:[%s4048_s9 + $0xc48] sm:$0xff] }
 0x17f   : > { %2375 = vmatpush1.msra.mxu0 %v1150_v16  ;;  %2446 = vmatpush1.msra.mxu1 %v1662_v17  ;;  %v2030_v16 = vunpack.c.l.bf16 %v1053_v6  ;;  %v781_v17 = vld [vmem:[%s4048_s9 + $0x608] sm:$0xff] }
 0x180   : > { %2376 = vmatprep.subr.mxu0 %v1135_v20  ;;  %2447 = vmatprep.subr.mxu1 %v1647_v21  ;;  %v2015_v20 = vunpack.c.h.bf16 %v1045_v12  ;;  %v1502_v21 = vunpack.c.l.bf16 %v789_v11  ;;  %v1487_v25 = vunpack.c.h.bf16 %v781_v17  ;;  %v973_v11 = vld [vmem:[%s4048_s9 + $0xc08] sm:$0xff] }
 0x181   : > { %2377 = vmatpush1.msra.mxu0 %v1134_v22  ;;  %2448 = vmatpush1.msra.mxu1 %v1646_v23  ;;  %v2014_v22 = vunpack.c.l.bf16 %v1045_v12  ;;  %v773_v23 = vld [vmem:[%s4048_s9 + $0x5c8] sm:$0xff] }
 0x182   : > { %2378 = vmatprep.subr.mxu0 %v1119_v26  ;;  %2449 = vmatprep.subr.mxu1 %v1631_v27  ;;  %v1999_v26 = vunpack.c.h.bf16 %v1037_v18  ;;  %v1486_v27 = vunpack.c.l.bf16 %v781_v17  ;;  %v1471_v31 = vunpack.c.h.bf16 %v773_v23  ;;  %v1871_v17 = vunpack.c.h.bf16 %v973_v11 }
 0x183   : > { %2379 = vmatpush1.msra.mxu0 %v1118_v28  ;;  %2450 = vmatpush1.msra.mxu1 %v1630_v29  ;;  %v1998_v28 = vunpack.c.l.bf16 %v1037_v18  ;;  %v765_v29 = vld [vmem:[%s4048_s9 + $0x588] sm:$0xff]  ;;  %v710_v18 = vld [vmem:[%s4048_s9 + $0x3d0] sm:$0xff] }
 0x184   : > { %2380 = vmatprep.subr.mxu0 %v1103_v32  ;;  %2451 = vmatprep.subr.mxu1 %v1615_v33  ;;  %v1983_v32 = vunpack.c.h.bf16 %v1029_v24  ;;  %v1470_v33 = vunpack.c.l.bf16 %v773_v23  ;;  %v1455_v37 = vunpack.c.h.bf16 %v765_v29 }
 0x185   : > { %2381 = vmatpush1.msra.mxu0 %v1102_v34  ;;  %2452 = vmatpush1.msra.mxu1 %v1614_v35  ;;  %v1982_v34 = vunpack.c.l.bf16 %v1029_v24  ;;  %v757_v35 = vld [vmem:[%s4048_s9 + $0x548] sm:$0xff]  ;;  %v702_v24 = vld [vmem:[%s4048_s9 + $0x390] sm:$0xff] }
 0x186   : > { %2382 = vmatprep.subr.mxu0 %v1599_v38  ;;  %2453 = vmatprep.subr.mxu1 %v2111_v42  ;;  %v1967_v38 = vunpack.c.h.bf16 %v1021_v30  ;;  %v1454_v42 = vunpack.c.l.bf16 %v765_v29  ;;  %v1439_v48 = vunpack.c.h.bf16 %v757_v35  ;;  %v950_v29 = vld [vmem:[%s4048_s9 + $0xb50] sm:$0xff] }
 0x187   : > { %2383 = vmatpush2.msra.mxu0 %v1598_v45  ;;  %2454 = vmatpush2.msra.mxu1 %v2110_v46  ;;  %v1966_v45 = vunpack.c.l.bf16 %v1021_v30  ;;  %v749_v46 = vld [vmem:[%s4048_s9 + $0x508] sm:$0xff]  ;;  %v1329_v30 = vunpack.c.h.bf16 %v702_v24 }
 0x188   : > { %2384 = vmatprep.subr.mxu0 %v1583_v49  ;;  %2455 = vmatprep.subr.mxu1 %v2095_v50  ;;  %v1951_v49 = vunpack.c.h.bf16 %v1013_v36  ;;  %v1438_v50 = vunpack.c.l.bf16 %v757_v35  ;;  %v1423_v54 = vunpack.c.h.bf16 %v749_v46  ;;  %v942_v35 = vld [vmem:[%s4048_s9 + $0xb10] sm:$0xff] }
 0x189   : > { %2385 = vmatpush2.msra.mxu0 %v1582_v51  ;;  %2456 = vmatpush2.msra.mxu1 %v2094_v52  ;;  %v1950_v51 = vunpack.c.l.bf16 %v1013_v36  ;;  %v741_v52 = vld [vmem:[%s4048_s9 + $0x4c8] sm:$0xff] }
 0x18a   : > { %2386 = vmatprep.subr.mxu0 %v1567_v55  ;;  %2457 = vmatprep.subr.mxu1 %v2079_v56  ;;  %v1935_v55 = vunpack.c.h.bf16 %v1005_v47  ;;  %v1422_v56 = vunpack.c.l.bf16 %v749_v46  ;;  %v1407_v63 = vunpack.c.h.bf16 %v741_v52  ;;  %v934_v46 = vld [vmem:[%s4048_s9 + $0xad0] sm:$0xff] }
 0x18b   : > { %2387 = vmatpush2.msra.mxu0 %v1566_v57  ;;  %2458 = vmatpush2.msra.mxu1 %v2078_v59  ;;  %v1934_v57 = vunpack.c.l.bf16 %v1005_v47  ;;  %v733_v59 = vld [vmem:[%s4048_s9 + $0x488] sm:$0xff] }
 0x18c   : > { %2388 = vmatprep.subr.mxu0 %v1551_v1  ;;  %2459 = vmatprep.subr.mxu1 %v2063_v2  ;;  %v1919_v1 = vunpack.c.h.bf16 %v997_v53  ;;  %v1406_v2 = vunpack.c.l.bf16 %v741_v52  ;;  %v1391_v6 = vunpack.c.h.bf16 %v733_v59  ;;  %v926_v52 = vld [vmem:[%s4048_s9 + $0xa90] sm:$0xff] }
 0x18d   : > { %2389 = vmatpush2.msra.mxu0 %v1550_v3  ;;  %2460 = vmatpush2.msra.mxu1 %v2062_v4  ;;  %v1918_v3 = vunpack.c.l.bf16 %v997_v53  ;;  %v725_v4 = vld [vmem:[%s4048_s9 + $0x448] sm:$0xff] }
 0x18e   : > { %2390 = vmatprep.subr.mxu0 %v1535_v7  ;;  %2461 = vmatprep.subr.mxu1 %v2047_v8  ;;  %v1903_v7 = vunpack.c.h.bf16 %v989_v62  ;;  %v1390_v8 = vunpack.c.l.bf16 %v733_v59  ;;  %v1375_v12 = vunpack.c.h.bf16 %v725_v4  ;;  %v918_v59 = vld [vmem:[%s4048_s9 + $0xa50] sm:$0xff] }
 0x18f   : > { %2391 = vmatpush2.msra.mxu0 %v1534_v9  ;;  %2462 = vmatpush2.msra.mxu1 %v2046_v10  ;;  %v1902_v9 = vunpack.c.l.bf16 %v989_v62  ;;  %v717_v10 = vld [vmem:[%s4048_s9 + $0x408] sm:$0xff] }
 0x190   : > { %2392 = vmatprep.subr.mxu0 %v1519_v13  ;;  %2463 = vmatprep.subr.mxu1 %v2031_v14  ;;  %v1887_v13 = vunpack.c.h.bf16 %v981_v5  ;;  %v1374_v14 = vunpack.c.l.bf16 %v725_v4  ;;  %v910_v4 = vld [vmem:[%s4048_s9 + $0xa10] sm:$0xff] }
 0x191   : > { %2393 = vmatpush2.msra.mxu0 %v1518_v15  ;;  %2464 = vmatpush2.msra.mxu1 %v2030_v16  ;;  %v1886_v15 = vunpack.c.l.bf16 %v981_v5  ;;  %v1359_v16 = vunpack.c.h.bf16 %v717_v10 }
 0x192   : > { %2394 = vmatprep.subr.mxu0 %v1503_v19  ;;  %2465 = vmatprep.subr.mxu1 %v2015_v20  ;;  %v966_v19 = vld [vmem:[%s4048_s9 + $0xbd0] sm:$0xff]  ;;  %v1358_v20 = vunpack.c.l.bf16 %v717_v10 }
 0x193   : > { %2395 = vmatpush2.msra.mxu0 %v1502_v21  ;;  %2466 = vmatpush2.msra.mxu1 %v2014_v22  ;;  %v1870_v21 = vunpack.c.l.bf16 %v973_v11  ;;  %v1345_v22 = vunpack.c.h.bf16 %v710_v18  ;;  %v1857_v23 = vunpack.c.h.bf16 %v966_v19  ;;  %v902_v10 = vld [vmem:[%s4048_s9 + $0x9d0] sm:$0xff] }
 0x194   : > { %2396 = vmatprep.subr.mxu0 %v1487_v25  ;;  %2467 = vmatprep.subr.mxu1 %v1999_v26  ;;  %v958_v25 = vld [vmem:[%s4048_s9 + $0xb90] sm:$0xff]  ;;  %v1344_v26 = vunpack.c.l.bf16 %v710_v18  ;;  %v1729_v18 = vunpack.c.h.bf16 %v902_v10 }
 0x195   : > { %2397 = vmatpush2.msra.mxu0 %v1486_v27  ;;  %2468 = vmatpush2.msra.mxu1 %v1998_v28  ;;  %v1856_v27 = vunpack.c.l.bf16 %v966_v19  ;;  %v694_v28 = vld [vmem:[%s4048_s9 + $0x350] sm:$0xff] }
 0x196   : > { %2398 = vmatprep.subr.mxu0 %v1471_v31  ;;  %2469 = vmatprep.subr.mxu1 %v1983_v32  ;;  %v1841_v31 = vunpack.c.h.bf16 %v958_v25  ;;  %v1328_v32 = vunpack.c.l.bf16 %v702_v24  ;;  %v1313_v36 = vunpack.c.h.bf16 %v694_v28 }
 0x197   : > { %2399 = vmatpush2.msra.mxu0 %v1470_v33  ;;  %2470 = vmatpush2.msra.mxu1 %v1982_v34  ;;  %v1840_v33 = vunpack.c.l.bf16 %v958_v25  ;;  %v686_v34 = vld [vmem:[%s4048_s9 + $0x310] sm:$0xff] }
 0x198   : > { %2400 = vmatprep.subr.mxu0 %v1455_v37  ;;  %2471 = vmatprep.subr.mxu1 %v1967_v38  ;;  %v1825_v37 = vunpack.c.h.bf16 %v950_v29  ;;  %v1312_v38 = vunpack.c.l.bf16 %v694_v28  ;;  %v1297_v47 = vunpack.c.h.bf16 %v686_v34  ;;  %v878_v28 = vld [vmem:[%s4048_s9 + $0x910] sm:$0xff] }
 0x199   : > { %2401 = vmatpush2.msra.mxu0 %v1454_v42  ;;  %2472 = vmatpush2.msra.mxu1 %v1966_v45  ;;  %v1824_v42 = vunpack.c.l.bf16 %v950_v29  ;;  %v678_v45 = vld [vmem:[%s4048_s9 + $0x2d0] sm:$0xff] }
 0x19a   : > { %2402 = vmatprep.subr.mxu0 %v1439_v48  ;;  %2473 = vmatprep.subr.mxu1 %v1951_v49  ;;  %v1809_v48 = vunpack.c.h.bf16 %v942_v35  ;;  %v1296_v49 = vunpack.c.l.bf16 %v686_v34  ;;  %v1281_v53 = vunpack.c.h.bf16 %v678_v45  ;;  %v870_v34 = vld [vmem:[%s4048_s9 + $0x8d0] sm:$0xff] }
 0x19b   : > { %2403 = vmatpush2.msra.mxu0 %v1438_v50  ;;  %2474 = vmatpush2.msra.mxu1 %v1950_v51  ;;  %v1808_v50 = vunpack.c.l.bf16 %v942_v35  ;;  %v670_v51 = vld [vmem:[%s4048_s9 + $0x290] sm:$0xff] }
 0x19c   : > { %2404 = vmatprep.subr.mxu0 %v1423_v54  ;;  %2475 = vmatprep.subr.mxu1 %v1935_v55  ;;  %v1793_v54 = vunpack.c.h.bf16 %v934_v46  ;;  %v1280_v55 = vunpack.c.l.bf16 %v678_v45  ;;  %v1265_v62 = vunpack.c.h.bf16 %v670_v51  ;;  %v862_v45 = vld [vmem:[%s4048_s9 + $0x890] sm:$0xff] }
 0x19d   : > { %2405 = vmatpush2.msra.mxu0 %v1422_v56  ;;  %2476 = vmatpush2.msra.mxu1 %v1934_v57  ;;  %v1792_v56 = vunpack.c.l.bf16 %v934_v46  ;;  %v662_v57 = vld [vmem:[%s4048_s9 + $0x250] sm:$0xff] }
 0x19e   : > { %2406 = vmatprep.subr.mxu0 %v1407_v63  ;;  %2477 = vmatprep.subr.mxu1 %v1919_v1  ;;  %v1777_v63 = vunpack.c.h.bf16 %v926_v52  ;;  %v1264_v1 = vunpack.c.l.bf16 %v670_v51  ;;  %v1249_v5 = vunpack.c.h.bf16 %v662_v57  ;;  %v854_v51 = vld [vmem:[%s4048_s9 + $0x850] sm:$0xff] }
 0x19f   : > { %2407 = vmatpush2.msra.mxu0 %v1406_v2  ;;  %2478 = vmatpush2.msra.mxu1 %v1918_v3  ;;  %v1776_v2 = vunpack.c.l.bf16 %v926_v52  ;;  %v654_v3 = vld [vmem:[%s4048_s9 + $0x210] sm:$0xff] }
 0x1a0   : > { %2408 = vmatprep.subr.mxu0 %v1391_v6  ;;  %2479 = vmatprep.subr.mxu1 %v1903_v7  ;;  %v1761_v6 = vunpack.c.h.bf16 %v918_v59  ;;  %v1248_v7 = vunpack.c.l.bf16 %v662_v57  ;;  %v1233_v11 = vunpack.c.h.bf16 %v654_v3  ;;  %v846_v57 = vld [vmem:[%s4048_s9 + $0x810] sm:$0xff] }
 0x1a1   : > { %2409 = vmatpush2.msra.mxu0 %v1390_v8  ;;  %2480 = vmatpush2.msra.mxu1 %v1902_v9  ;;  %v1760_v8 = vunpack.c.l.bf16 %v918_v59  ;;  %v646_v9 = vld [vmem:[%s4048_s9 + $0x1d0] sm:$0xff] }
 0x1a2   : > { %2410 = vmatprep.subr.mxu0 %v1375_v12  ;;  %2481 = vmatprep.subr.mxu1 %v1887_v13  ;;  %v1745_v12 = vunpack.c.h.bf16 %v910_v4  ;;  %v1232_v13 = vunpack.c.l.bf16 %v654_v3  ;;  %v1216_v19 = vunpack.c.l.bf16 %v646_v9  ;;  %v1094_v3 = vld [vmem:[%s4048_s9 + $0xfd0] sm:$0xff] }
 0x1a3   : > { %2411 = vmatpush2.msra.mxu0 %v1374_v14  ;;  %2482 = vmatpush2.msra.mxu1 %v1886_v15  ;;  %v1744_v14 = vunpack.c.l.bf16 %v910_v4  ;;  %v638_v15 = vld [vmem:[%s4048_s9 + $0x190] sm:$0xff] }
 0x1a4   : > { %2412 = vmatprep.subr.mxu0 %v1359_v16  ;;  %2483 = vmatprep.subr.mxu1 %v1871_v17  ;;  %v894_v16 = vld [vmem:[%s4048_s9 + $0x990] sm:$0xff]  ;;  %v1217_v17 = vunpack.c.h.bf16 %v646_v9  ;;  %v1200_v25 = vunpack.c.l.bf16 %v638_v15 }
 0x1a5   : > { %2413 = vmatpush2.msra.mxu0 %v1358_v20  ;;  %2484 = vmatpush2.msra.mxu1 %v1870_v21  ;;  %v1728_v20 = vunpack.c.l.bf16 %v902_v10  ;;  %v630_v21 = vld [vmem:[%s4048_s9 + $0x150] sm:$0xff]  ;;  %v1713_v24 = vunpack.c.h.bf16 %v894_v16 }
 0x1a6   : > { %2415 = vmatmul.mubr.f32.vlgmr.msra.gmra.mxu0 %v4146_v0  ;;  %2486 = vmatmul.mubr.f32.vlgmr.msra.gmra.mxu1 %v4139_v58  ;;  %v1185_v29 = vunpack.c.h.bf16 %v630_v21  ;;  %v1086_v9 = vld [vmem:[%s4048_s9 + $0xf90] sm:$0xff] }
 0x1a7   : > { %2492 = vmatprep.subr.mxu0 %v1345_v22  ;;  %2563 = vmatprep.subr.mxu1 %v1857_v23  ;;  %v886_v22 = vld [vmem:[%s4048_s9 + $0x950] sm:$0xff]  ;;  %v1201_v23 = vunpack.c.h.bf16 %v638_v15 }
 0x1a8   : > { %2493 = vmatpush1.msra.mxu0 %v1344_v26  ;;  %2556 = vmatprep.mubr.f32.mxu0 %v4142_v60  ;;  %v1712_v26 = vunpack.c.l.bf16 %v894_v16  ;;  %v1078_v15 = vld [vmem:[%s4048_s9 + $0xf50] sm:$0xff] }
 0x1a9   : > { %2564 = vmatpush1.msra.mxu1 %v1856_v27  ;;  %2627 = vmatprep.mubr.f32.mxu1 %v4144_v61  ;;  %v622_v27 = vld [vmem:[%s4048_s9 + $0x110] sm:$0xff] }
 0x1aa   : > { %2494 = vmatprep.subr.mxu0 %v1329_v30  ;;  %2565 = vmatprep.subr.mxu1 %v1841_v31  ;;  %v1697_v30 = vunpack.c.h.bf16 %v886_v22  ;;  %v1184_v31 = vunpack.c.l.bf16 %v630_v21  ;;  %v1169_v35 = vunpack.c.h.bf16 %v622_v27  ;;  %v1070_v21 = vld [vmem:[%s4048_s9 + $0xf10] sm:$0xff] }
 0x1ab   : > { %2495 = vmatpush1.msra.mxu0 %v1328_v32  ;;  %2566 = vmatpush1.msra.mxu1 %v1840_v33  ;;  %v1696_v32 = vunpack.c.l.bf16 %v886_v22  ;;  %v614_v33 = vld [vmem:[%s4048_s9 + $0xd0] sm:$0xff] }
 0x1ac   : > { %2496 = vmatprep.subr.mxu0 %v1313_v36  ;;  %2567 = vmatprep.subr.mxu1 %v1825_v37  ;;  %v1681_v36 = vunpack.c.h.bf16 %v878_v28  ;;  %v1168_v37 = vunpack.c.l.bf16 %v622_v27  ;;  %v1153_v46 = vunpack.c.h.bf16 %v614_v33  ;;  %v1062_v27 = vld [vmem:[%s4048_s9 + $0xed0] sm:$0xff] }
 0x1ad   : > { %2497 = vmatpush1.msra.mxu0 %v1312_v38  ;;  %2568 = vmatpush1.msra.mxu1 %v1824_v42  ;;  %v1680_v38 = vunpack.c.l.bf16 %v878_v28  ;;  %v606_v42 = vld [vmem:[%s4048_s9 + $0x90] sm:$0xff] }
 0x1ae   : > { %2498 = vmatprep.subr.mxu0 %v1297_v47  ;;  %2569 = vmatprep.subr.mxu1 %v1809_v48  ;;  %v1665_v47 = vunpack.c.h.bf16 %v870_v34  ;;  %v1152_v48 = vunpack.c.l.bf16 %v614_v33  ;;  %v1137_v52 = vunpack.c.h.bf16 %v606_v42  ;;  %v1054_v33 = vld [vmem:[%s4048_s9 + $0xe90] sm:$0xff] }
 0x1af   : > { %2499 = vmatpush1.msra.mxu0 %v1296_v49  ;;  %2570 = vmatpush1.msra.mxu1 %v1808_v50  ;;  %v1664_v49 = vunpack.c.l.bf16 %v870_v34  ;;  %v598_v50 = vld [vmem:[%s4048_s9 + $0x50] sm:$0xff] }
 0x1b0   : > { %2500 = vmatprep.subr.mxu0 %v1281_v53  ;;  %2571 = vmatprep.subr.mxu1 %v1793_v54  ;;  %v1649_v53 = vunpack.c.h.bf16 %v862_v45  ;;  %v1136_v54 = vunpack.c.l.bf16 %v606_v42  ;;  %v1121_v59 = vunpack.c.h.bf16 %v598_v50  ;;  %v1046_v42 = vld [vmem:[%s4048_s9 + $0xe50] sm:$0xff] }
 0x1b1   : > { %2501 = vmatpush1.msra.mxu0 %v1280_v55  ;;  %2572 = vmatpush1.msra.mxu1 %v1792_v56  ;;  %v1648_v55 = vunpack.c.l.bf16 %v862_v45  ;;  %v590_v56 = vld [vmem:[%s4048_s9 + $0x10] sm:$0xff] }
 0x1b2   : > { %2502 = vmatprep.subr.mxu0 %v1265_v62  ;;  %2573 = vmatprep.subr.mxu1 %v1777_v63  ;;  %v1633_v62 = vunpack.c.h.bf16 %v854_v51  ;;  %v1120_v63 = vunpack.c.l.bf16 %v598_v50  ;;  %v1105_v4 = vunpack.c.h.bf16 %v590_v56  ;;  %v1038_v50 = vld [vmem:[%s4048_s9 + $0xe10] sm:$0xff] }
 0x1b3   : > { %2503 = vmatpush1.msra.mxu0 %v1264_v1  ;;  %2574 = vmatpush1.msra.mxu1 %v1776_v2  ;;  %v1632_v1 = vunpack.c.l.bf16 %v854_v51  ;;  %v838_v2 = vld [vmem:[%s4048_s9 + $0x7d0] sm:$0xff] }
 0x1b4   : > { %2504 = vmatprep.subr.mxu0 %v1249_v5  ;;  %2575 = vmatprep.subr.mxu1 %v1761_v6  ;;  %v1617_v5 = vunpack.c.h.bf16 %v846_v57  ;;  %v1104_v6 = vunpack.c.l.bf16 %v590_v56  ;;  %v1601_v10 = vunpack.c.h.bf16 %v838_v2  ;;  %v1030_v56 = vld [vmem:[%s4048_s9 + $0xdd0] sm:$0xff] }
 0x1b5   : > { %2505 = vmatpush1.msra.mxu0 %v1248_v7  ;;  %2576 = vmatpush1.msra.mxu1 %v1760_v8  ;;  %v1616_v7 = vunpack.c.l.bf16 %v846_v57  ;;  %v830_v8 = vld [vmem:[%s4048_s9 + $0x790] sm:$0xff] }
 0x1b6   : > { %2506 = vmatprep.subr.mxu0 %v1233_v11  ;;  %2577 = vmatprep.subr.mxu1 %v1745_v12  ;;  %v2113_v11 = vunpack.c.h.bf16 %v1094_v3  ;;  %v1600_v12 = vunpack.c.l.bf16 %v838_v2  ;;  %v1585_v16 = vunpack.c.h.bf16 %v830_v8  ;;  %v1022_v2 = vld [vmem:[%s4048_s9 + $0xd90] sm:$0xff] }
 0x1b7   : > { %2507 = vmatpush1.msra.mxu0 %v1232_v13  ;;  %2578 = vmatpush1.msra.mxu1 %v1744_v14  ;;  %v2112_v13 = vunpack.c.l.bf16 %v1094_v3  ;;  %v822_v14 = vld [vmem:[%s4048_s9 + $0x750] sm:$0xff] }
 0x1b8   : > { %2508 = vmatprep.subr.mxu0 %v1217_v17  ;;  %2579 = vmatprep.subr.mxu1 %v1729_v18  ;;  %v2097_v17 = vunpack.c.h.bf16 %v1086_v9  ;;  %v1584_v18 = vunpack.c.l.bf16 %v830_v8  ;;  %v1569_v22 = vunpack.c.h.bf16 %v822_v14  ;;  %v1014_v8 = vld [vmem:[%s4048_s9 + $0xd50] sm:$0xff] }
 0x1b9   : > { %2509 = vmatpush1.msra.mxu0 %v1216_v19  ;;  %2580 = vmatpush1.msra.mxu1 %v1728_v20  ;;  %v2096_v19 = vunpack.c.l.bf16 %v1086_v9  ;;  %v814_v20 = vld [vmem:[%s4048_s9 + $0x710] sm:$0xff] }
 0x1ba   : > { %2510 = vmatprep.subr.mxu0 %v1201_v23  ;;  %2581 = vmatprep.subr.mxu1 %v1713_v24  ;;  %v2081_v23 = vunpack.c.h.bf16 %v1078_v15  ;;  %v1568_v24 = vunpack.c.l.bf16 %v822_v14  ;;  %v1553_v28 = vunpack.c.h.bf16 %v814_v20  ;;  %v1006_v14 = vld [vmem:[%s4048_s9 + $0xd10] sm:$0xff] }
 0x1bb   : > { %2511 = vmatpush1.msra.mxu0 %v1200_v25  ;;  %2582 = vmatpush1.msra.mxu1 %v1712_v26  ;;  %v2080_v25 = vunpack.c.l.bf16 %v1078_v15  ;;  %v806_v26 = vld [vmem:[%s4048_s9 + $0x6d0] sm:$0xff] }
 0x1bc   : > { %2512 = vmatprep.subr.mxu0 %v1185_v29  ;;  %2583 = vmatprep.subr.mxu1 %v1697_v30  ;;  %v2065_v29 = vunpack.c.h.bf16 %v1070_v21  ;;  %v1552_v30 = vunpack.c.l.bf16 %v814_v20  ;;  %v1537_v34 = vunpack.c.h.bf16 %v806_v26  ;;  %v998_v20 = vld [vmem:[%s4048_s9 + $0xcd0] sm:$0xff] }
 0x1bd   : > { %2513 = vmatpush1.msra.mxu0 %v1184_v31  ;;  %2584 = vmatpush1.msra.mxu1 %v1696_v32  ;;  %v2064_v31 = vunpack.c.l.bf16 %v1070_v21  ;;  %v798_v32 = vld [vmem:[%s4048_s9 + $0x690] sm:$0xff] }
 0x1be   : > { %2514 = vmatprep.subr.mxu0 %v1169_v35  ;;  %2585 = vmatprep.subr.mxu1 %v1681_v36  ;;  %v2049_v35 = vunpack.c.h.bf16 %v1062_v27  ;;  %v1536_v36 = vunpack.c.l.bf16 %v806_v26  ;;  %v1521_v45 = vunpack.c.h.bf16 %v798_v32  ;;  %v990_v26 = vld [vmem:[%s4048_s9 + $0xc90] sm:$0xff] }
 0x1bf   : > { %2515 = vmatpush1.msra.mxu0 %v1168_v37  ;;  %2586 = vmatpush1.msra.mxu1 %v1680_v38  ;;  %v2048_v37 = vunpack.c.l.bf16 %v1062_v27  ;;  %v790_v38 = vld [vmem:[%s4048_s9 + $0x650] sm:$0xff] }
 0x1c0   : > { %2516 = vmatprep.subr.mxu0 %v1153_v46  ;;  %2587 = vmatprep.subr.mxu1 %v1665_v47  ;;  %v2033_v46 = vunpack.c.h.bf16 %v1054_v33  ;;  %v1520_v47 = vunpack.c.l.bf16 %v798_v32  ;;  %v1505_v51 = vunpack.c.h.bf16 %v790_v38  ;;  %v982_v32 = vld [vmem:[%s4048_s9 + $0xc50] sm:$0xff] }
 0x1c1   : > { %2517 = vmatpush1.msra.mxu0 %v1152_v48  ;;  %2588 = vmatpush1.msra.mxu1 %v1664_v49  ;;  %v2032_v48 = vunpack.c.l.bf16 %v1054_v33  ;;  %v782_v49 = vld [vmem:[%s4048_s9 + $0x610] sm:$0xff] }
 0x1c2   : > { %2518 = vmatprep.subr.mxu0 %v1137_v52  ;;  %2589 = vmatprep.subr.mxu1 %v1649_v53  ;;  %v2017_v52 = vunpack.c.h.bf16 %v1046_v42  ;;  %v1504_v53 = vunpack.c.l.bf16 %v790_v38  ;;  %v1489_v57 = vunpack.c.h.bf16 %v782_v49  ;;  %v974_v38 = vld [vmem:[%s4048_s9 + $0xc10] sm:$0xff] }
 0x1c3   : > { %2519 = vmatpush1.msra.mxu0 %v1136_v54  ;;  %2590 = vmatpush1.msra.mxu1 %v1648_v55  ;;  %v2016_v54 = vunpack.c.l.bf16 %v1046_v42  ;;  %v774_v55 = vld [vmem:[%s4048_s9 + $0x5d0] sm:$0xff] }
 0x1c4   : > { %2520 = vmatprep.subr.mxu0 %v1121_v59  ;;  %2591 = vmatprep.subr.mxu1 %v1633_v62  ;;  %v2001_v59 = vunpack.c.h.bf16 %v1038_v50  ;;  %v1488_v62 = vunpack.c.l.bf16 %v782_v49  ;;  %v1473_v3 = vunpack.c.h.bf16 %v774_v55  ;;  %v1873_v49 = vunpack.c.h.bf16 %v974_v38 }
 0x1c5   : > { %2521 = vmatpush1.msra.mxu0 %v1120_v63  ;;  %2592 = vmatpush1.msra.mxu1 %v1632_v1  ;;  %v2000_v63 = vunpack.c.l.bf16 %v1038_v50  ;;  %v766_v1 = vld [vmem:[%s4048_s9 + $0x590] sm:$0xff]  ;;  %v711_v50 = vld [vmem:[%s4048_s9 + $0x3d8] sm:$0xff] }
 0x1c6   : > { %2522 = vmatprep.subr.mxu0 %v1105_v4  ;;  %2593 = vmatprep.subr.mxu1 %v1617_v5  ;;  %v1985_v4 = vunpack.c.h.bf16 %v1030_v56  ;;  %v1472_v5 = vunpack.c.l.bf16 %v774_v55  ;;  %v1457_v9 = vunpack.c.h.bf16 %v766_v1 }
 0x1c7   : > { %2523 = vmatpush1.msra.mxu0 %v1104_v6  ;;  %2594 = vmatpush1.msra.mxu1 %v1616_v7  ;;  %v1984_v6 = vunpack.c.l.bf16 %v1030_v56  ;;  %v758_v7 = vld [vmem:[%s4048_s9 + $0x550] sm:$0xff]  ;;  %v703_v56 = vld [vmem:[%s4048_s9 + $0x398] sm:$0xff] }
 0x1c8   : > { %2524 = vmatprep.subr.mxu0 %v1601_v10  ;;  %2595 = vmatprep.subr.mxu1 %v2113_v11  ;;  %v1969_v10 = vunpack.c.h.bf16 %v1022_v2  ;;  %v1456_v11 = vunpack.c.l.bf16 %v766_v1  ;;  %v1441_v15 = vunpack.c.h.bf16 %v758_v7  ;;  %v951_v1 = vld [vmem:[%s4048_s9 + $0xb58] sm:$0xff] }
 0x1c9   : > { %2525 = vmatpush2.msra.mxu0 %v1600_v12  ;;  %2596 = vmatpush2.msra.mxu1 %v2112_v13  ;;  %v1968_v12 = vunpack.c.l.bf16 %v1022_v2  ;;  %v750_v13 = vld [vmem:[%s4048_s9 + $0x510] sm:$0xff]  ;;  %v1331_v2 = vunpack.c.h.bf16 %v703_v56 }
 0x1ca   : > { %2526 = vmatprep.subr.mxu0 %v1585_v16  ;;  %2597 = vmatprep.subr.mxu1 %v2097_v17  ;;  %v1953_v16 = vunpack.c.h.bf16 %v1014_v8  ;;  %v1440_v17 = vunpack.c.l.bf16 %v758_v7  ;;  %v1425_v21 = vunpack.c.h.bf16 %v750_v13  ;;  %v943_v7 = vld [vmem:[%s4048_s9 + $0xb18] sm:$0xff] }
 0x1cb   : > { %2527 = vmatpush2.msra.mxu0 %v1584_v18  ;;  %2598 = vmatpush2.msra.mxu1 %v2096_v19  ;;  %v1952_v18 = vunpack.c.l.bf16 %v1014_v8  ;;  %v742_v19 = vld [vmem:[%s4048_s9 + $0x4d0] sm:$0xff] }
 0x1cc   : > { %2528 = vmatprep.subr.mxu0 %v1569_v22  ;;  %2599 = vmatprep.subr.mxu1 %v2081_v23  ;;  %v1937_v22 = vunpack.c.h.bf16 %v1006_v14  ;;  %v1424_v23 = vunpack.c.l.bf16 %v750_v13  ;;  %v1409_v27 = vunpack.c.h.bf16 %v742_v19  ;;  %v935_v13 = vld [vmem:[%s4048_s9 + $0xad8] sm:$0xff] }
 0x1cd   : > { %2529 = vmatpush2.msra.mxu0 %v1568_v24  ;;  %2600 = vmatpush2.msra.mxu1 %v2080_v25  ;;  %v1936_v24 = vunpack.c.l.bf16 %v1006_v14  ;;  %v734_v25 = vld [vmem:[%s4048_s9 + $0x490] sm:$0xff] }
 0x1ce   : > { %2530 = vmatprep.subr.mxu0 %v1553_v28  ;;  %2601 = vmatprep.subr.mxu1 %v2065_v29  ;;  %v1921_v28 = vunpack.c.h.bf16 %v998_v20  ;;  %v1408_v29 = vunpack.c.l.bf16 %v742_v19  ;;  %v1393_v33 = vunpack.c.h.bf16 %v734_v25  ;;  %v927_v19 = vld [vmem:[%s4048_s9 + $0xa98] sm:$0xff] }
 0x1cf   : > { %2531 = vmatpush2.msra.mxu0 %v1552_v30  ;;  %2602 = vmatpush2.msra.mxu1 %v2064_v31  ;;  %v1920_v30 = vunpack.c.l.bf16 %v998_v20  ;;  %v726_v31 = vld [vmem:[%s4048_s9 + $0x450] sm:$0xff] }
 0x1d0   : > { %2532 = vmatprep.subr.mxu0 %v1537_v34  ;;  %2603 = vmatprep.subr.mxu1 %v2049_v35  ;;  %v1905_v34 = vunpack.c.h.bf16 %v990_v26  ;;  %v1392_v35 = vunpack.c.l.bf16 %v734_v25  ;;  %v1377_v42 = vunpack.c.h.bf16 %v726_v31  ;;  %v919_v25 = vld [vmem:[%s4048_s9 + $0xa58] sm:$0xff] }
 0x1d1   : > { %2533 = vmatpush2.msra.mxu0 %v1536_v36  ;;  %2604 = vmatpush2.msra.mxu1 %v2048_v37  ;;  %v1904_v36 = vunpack.c.l.bf16 %v990_v26  ;;  %v718_v37 = vld [vmem:[%s4048_s9 + $0x410] sm:$0xff] }
 0x1d2   : > { %2534 = vmatprep.subr.mxu0 %v1521_v45  ;;  %2605 = vmatprep.subr.mxu1 %v2033_v46  ;;  %v1889_v45 = vunpack.c.h.bf16 %v982_v32  ;;  %v1376_v46 = vunpack.c.l.bf16 %v726_v31  ;;  %v911_v31 = vld [vmem:[%s4048_s9 + $0xa18] sm:$0xff] }
 0x1d3   : > { %2535 = vmatpush2.msra.mxu0 %v1520_v47  ;;  %2606 = vmatpush2.msra.mxu1 %v2032_v48  ;;  %v1888_v47 = vunpack.c.l.bf16 %v982_v32  ;;  %v1361_v48 = vunpack.c.h.bf16 %v718_v37 }
 0x1d4   : > { %2536 = vmatprep.subr.mxu0 %v1505_v51  ;;  %2607 = vmatprep.subr.mxu1 %v2017_v52  ;;  %v967_v51 = vld [vmem:[%s4048_s9 + $0xbd8] sm:$0xff]  ;;  %v1360_v52 = vunpack.c.l.bf16 %v718_v37 }
 0x1d5   : > { %2537 = vmatpush2.msra.mxu0 %v1504_v53  ;;  %2608 = vmatpush2.msra.mxu1 %v2016_v54  ;;  %v1872_v53 = vunpack.c.l.bf16 %v974_v38  ;;  %v1347_v54 = vunpack.c.h.bf16 %v711_v50  ;;  %v1859_v55 = vunpack.c.h.bf16 %v967_v51  ;;  %v903_v37 = vld [vmem:[%s4048_s9 + $0x9d8] sm:$0xff] }
 0x1d6   : > { %2538 = vmatprep.subr.mxu0 %v1489_v57  ;;  %2609 = vmatprep.subr.mxu1 %v2001_v59  ;;  %v959_v57 = vld [vmem:[%s4048_s9 + $0xb98] sm:$0xff]  ;;  %v1346_v59 = vunpack.c.l.bf16 %v711_v50  ;;  %v1731_v50 = vunpack.c.h.bf16 %v903_v37 }
 0x1d7   : > { %2539 = vmatpush2.msra.mxu0 %v1488_v62  ;;  %2610 = vmatpush2.msra.mxu1 %v2000_v63  ;;  %v1858_v62 = vunpack.c.l.bf16 %v967_v51  ;;  %v695_v63 = vld [vmem:[%s4048_s9 + $0x358] sm:$0xff] }
 0x1d8   : > { %2540 = vmatprep.subr.mxu0 %v1473_v3  ;;  %2611 = vmatprep.subr.mxu1 %v1985_v4  ;;  %v1843_v3 = vunpack.c.h.bf16 %v959_v57  ;;  %v1330_v4 = vunpack.c.l.bf16 %v703_v56  ;;  %v1315_v8 = vunpack.c.h.bf16 %v695_v63 }
 0x1d9   : > { %2541 = vmatpush2.msra.mxu0 %v1472_v5  ;;  %2612 = vmatpush2.msra.mxu1 %v1984_v6  ;;  %v1842_v5 = vunpack.c.l.bf16 %v959_v57  ;;  %v687_v6 = vld [vmem:[%s4048_s9 + $0x318] sm:$0xff] }
 0x1da   : > { %2542 = vmatprep.subr.mxu0 %v1457_v9  ;;  %2613 = vmatprep.subr.mxu1 %v1969_v10  ;;  %v1827_v9 = vunpack.c.h.bf16 %v951_v1  ;;  %v1314_v10 = vunpack.c.l.bf16 %v695_v63  ;;  %v1299_v14 = vunpack.c.h.bf16 %v687_v6  ;;  %v879_v63 = vld [vmem:[%s4048_s9 + $0x918] sm:$0xff] }
 0x1db   : > { %2543 = vmatpush2.msra.mxu0 %v1456_v11  ;;  %2614 = vmatpush2.msra.mxu1 %v1968_v12  ;;  %v1826_v11 = vunpack.c.l.bf16 %v951_v1  ;;  %v679_v12 = vld [vmem:[%s4048_s9 + $0x2d8] sm:$0xff] }
 0x1dc   : > { %2544 = vmatprep.subr.mxu0 %v1441_v15  ;;  %2615 = vmatprep.subr.mxu1 %v1953_v16  ;;  %v1811_v15 = vunpack.c.h.bf16 %v943_v7  ;;  %v1298_v16 = vunpack.c.l.bf16 %v687_v6  ;;  %v1283_v20 = vunpack.c.h.bf16 %v679_v12  ;;  %v871_v6 = vld [vmem:[%s4048_s9 + $0x8d8] sm:$0xff] }
 0x1dd   : > { %2545 = vmatpush2.msra.mxu0 %v1440_v17  ;;  %2616 = vmatpush2.msra.mxu1 %v1952_v18  ;;  %v1810_v17 = vunpack.c.l.bf16 %v943_v7  ;;  %v671_v18 = vld [vmem:[%s4048_s9 + $0x298] sm:$0xff] }
 0x1de   : > { %2546 = vmatprep.subr.mxu0 %v1425_v21  ;;  %2617 = vmatprep.subr.mxu1 %v1937_v22  ;;  %v1795_v21 = vunpack.c.h.bf16 %v935_v13  ;;  %v1282_v22 = vunpack.c.l.bf16 %v679_v12  ;;  %v1267_v26 = vunpack.c.h.bf16 %v671_v18  ;;  %v863_v12 = vld [vmem:[%s4048_s9 + $0x898] sm:$0xff] }
 0x1df   : > { %2547 = vmatpush2.msra.mxu0 %v1424_v23  ;;  %2618 = vmatpush2.msra.mxu1 %v1936_v24  ;;  %v1794_v23 = vunpack.c.l.bf16 %v935_v13  ;;  %v663_v24 = vld [vmem:[%s4048_s9 + $0x258] sm:$0xff] }
 0x1e0   : > { %2548 = vmatprep.subr.mxu0 %v1409_v27  ;;  %2619 = vmatprep.subr.mxu1 %v1921_v28  ;;  %v1779_v27 = vunpack.c.h.bf16 %v927_v19  ;;  %v1266_v28 = vunpack.c.l.bf16 %v671_v18  ;;  %v1251_v32 = vunpack.c.h.bf16 %v663_v24  ;;  %v855_v18 = vld [vmem:[%s4048_s9 + $0x858] sm:$0xff] }
 0x1e1   : > { %2549 = vmatpush2.msra.mxu0 %v1408_v29  ;;  %2620 = vmatpush2.msra.mxu1 %v1920_v30  ;;  %v1778_v29 = vunpack.c.l.bf16 %v927_v19  ;;  %v655_v30 = vld [vmem:[%s4048_s9 + $0x218] sm:$0xff] }
 0x1e2   : > { %2550 = vmatprep.subr.mxu0 %v1393_v33  ;;  %2621 = vmatprep.subr.mxu1 %v1905_v34  ;;  %v1763_v33 = vunpack.c.h.bf16 %v919_v25  ;;  %v1250_v34 = vunpack.c.l.bf16 %v663_v24  ;;  %v1235_v38 = vunpack.c.h.bf16 %v655_v30  ;;  %v847_v24 = vld [vmem:[%s4048_s9 + $0x818] sm:$0xff] }
 0x1e3   : > { %2551 = vmatpush2.msra.mxu0 %v1392_v35  ;;  %2622 = vmatpush2.msra.mxu1 %v1904_v36  ;;  %v1762_v35 = vunpack.c.l.bf16 %v919_v25  ;;  %v647_v36 = vld [vmem:[%s4048_s9 + $0x1d8] sm:$0xff] }
 0x1e4   : > { %2552 = vmatprep.subr.mxu0 %v1377_v42  ;;  %2623 = vmatprep.subr.mxu1 %v1889_v45  ;;  %v1747_v42 = vunpack.c.h.bf16 %v911_v31  ;;  %v1234_v45 = vunpack.c.l.bf16 %v655_v30  ;;  %v1218_v51 = vunpack.c.l.bf16 %v647_v36  ;;  %v1095_v30 = vld [vmem:[%s4048_s9 + $0xfd8] sm:$0xff] }
 0x1e5   : > { %2553 = vmatpush2.msra.mxu0 %v1376_v46  ;;  %2624 = vmatpush2.msra.mxu1 %v1888_v47  ;;  %v1746_v46 = vunpack.c.l.bf16 %v911_v31  ;;  %v639_v47 = vld [vmem:[%s4048_s9 + $0x198] sm:$0xff] }
 0x1e6   : > { %2554 = vmatprep.subr.mxu0 %v1361_v48  ;;  %2625 = vmatprep.subr.mxu1 %v1873_v49  ;;  %v895_v48 = vld [vmem:[%s4048_s9 + $0x998] sm:$0xff]  ;;  %v1219_v49 = vunpack.c.h.bf16 %v647_v36  ;;  %v1202_v57 = vunpack.c.l.bf16 %v639_v47 }
 0x1e7   : > { %2555 = vmatpush2.msra.mxu0 %v1360_v52  ;;  %2626 = vmatpush2.msra.mxu1 %v1872_v53  ;;  %v1730_v52 = vunpack.c.l.bf16 %v903_v37  ;;  %v631_v53 = vld [vmem:[%s4048_s9 + $0x158] sm:$0xff]  ;;  %v1715_v56 = vunpack.c.h.bf16 %v895_v48 }
 0x1e8   : > { %2557 = vmatmul.mubr.f32.vlgmr.msra.gmra.mxu0 %v4146_v0  ;;  %2628 = vmatmul.mubr.f32.vlgmr.msra.gmra.mxu1 %v4139_v58  ;;  %v1187_v1 = vunpack.c.h.bf16 %v631_v53  ;;  %v1087_v36 = vld [vmem:[%s4048_s9 + $0xf98] sm:$0xff] }
 0x1e9   : > { %2634 = vmatprep.subr.mxu0 %v1347_v54  ;;  %2705 = vmatprep.subr.mxu1 %v1859_v55  ;;  %v887_v54 = vld [vmem:[%s4048_s9 + $0x958] sm:$0xff]  ;;  %v1203_v55 = vunpack.c.h.bf16 %v639_v47 }
 0x1ea   : > { %2635 = vmatpush1.msra.mxu0 %v1346_v59  ;;  %2698 = vmatprep.mubr.f32.mxu0 %v4142_v60  ;;  %v1714_v59 = vunpack.c.l.bf16 %v895_v48  ;;  %v1079_v47 = vld [vmem:[%s4048_s9 + $0xf58] sm:$0xff] }
 0x1eb   : > { %2706 = vmatpush1.msra.mxu1 %v1858_v62  ;;  %2769 = vmatprep.mubr.f32.mxu1 %v4144_v61  ;;  %v623_v62 = vld [vmem:[%s4048_s9 + $0x118] sm:$0xff] }
 0x1ec   : > { %2636 = vmatprep.subr.mxu0 %v1331_v2  ;;  %2707 = vmatprep.subr.mxu1 %v1843_v3  ;;  %v1699_v2 = vunpack.c.h.bf16 %v887_v54  ;;  %v1186_v3 = vunpack.c.l.bf16 %v631_v53  ;;  %v1171_v7 = vunpack.c.h.bf16 %v623_v62  ;;  %v1071_v53 = vld [vmem:[%s4048_s9 + $0xf18] sm:$0xff] }
 0x1ed   : > { %2637 = vmatpush1.msra.mxu0 %v1330_v4  ;;  %2708 = vmatpush1.msra.mxu1 %v1842_v5  ;;  %v1698_v4 = vunpack.c.l.bf16 %v887_v54  ;;  %v615_v5 = vld [vmem:[%s4048_s9 + $0xd8] sm:$0xff] }
 0x1ee   : > { %2638 = vmatprep.subr.mxu0 %v1315_v8  ;;  %2709 = vmatprep.subr.mxu1 %v1827_v9  ;;  %v1683_v8 = vunpack.c.h.bf16 %v879_v63  ;;  %v1170_v9 = vunpack.c.l.bf16 %v623_v62  ;;  %v1155_v13 = vunpack.c.h.bf16 %v615_v5  ;;  %v1063_v62 = vld [vmem:[%s4048_s9 + $0xed8] sm:$0xff] }
 0x1ef   : > { %2639 = vmatpush1.msra.mxu0 %v1314_v10  ;;  %2710 = vmatpush1.msra.mxu1 %v1826_v11  ;;  %v1682_v10 = vunpack.c.l.bf16 %v879_v63  ;;  %v607_v11 = vld [vmem:[%s4048_s9 + $0x98] sm:$0xff] }
 0x1f0   : > { %2640 = vmatprep.subr.mxu0 %v1299_v14  ;;  %2711 = vmatprep.subr.mxu1 %v1811_v15  ;;  %v1667_v14 = vunpack.c.h.bf16 %v871_v6  ;;  %v1154_v15 = vunpack.c.l.bf16 %v615_v5  ;;  %v1139_v19 = vunpack.c.h.bf16 %v607_v11  ;;  %v1055_v5 = vld [vmem:[%s4048_s9 + $0xe98] sm:$0xff] }
 0x1f1   : > { %2641 = vmatpush1.msra.mxu0 %v1298_v16  ;;  %2712 = vmatpush1.msra.mxu1 %v1810_v17  ;;  %v1666_v16 = vunpack.c.l.bf16 %v871_v6  ;;  %v599_v17 = vld [vmem:[%s4048_s9 + $0x58] sm:$0xff] }
 0x1f2   : > { %2642 = vmatprep.subr.mxu0 %v1283_v20  ;;  %2713 = vmatprep.subr.mxu1 %v1795_v21  ;;  %v1651_v20 = vunpack.c.h.bf16 %v863_v12  ;;  %v1138_v21 = vunpack.c.l.bf16 %v607_v11  ;;  %v1123_v25 = vunpack.c.h.bf16 %v599_v17  ;;  %v1047_v11 = vld [vmem:[%s4048_s9 + $0xe58] sm:$0xff] }
 0x1f3   : > { %2643 = vmatpush1.msra.mxu0 %v1282_v22  ;;  %2714 = vmatpush1.msra.mxu1 %v1794_v23  ;;  %v1650_v22 = vunpack.c.l.bf16 %v863_v12  ;;  %v591_v23 = vld [vmem:[%s4048_s9 + $0x18] sm:$0xff] }
 0x1f4   : > { %2644 = vmatprep.subr.mxu0 %v1267_v26  ;;  %2715 = vmatprep.subr.mxu1 %v1779_v27  ;;  %v1635_v26 = vunpack.c.h.bf16 %v855_v18  ;;  %v1122_v27 = vunpack.c.l.bf16 %v599_v17  ;;  %v1107_v31 = vunpack.c.h.bf16 %v591_v23  ;;  %v1039_v17 = vld [vmem:[%s4048_s9 + $0xe18] sm:$0xff] }
 0x1f5   : > { %2645 = vmatpush1.msra.mxu0 %v1266_v28  ;;  %2716 = vmatpush1.msra.mxu1 %v1778_v29  ;;  %v1634_v28 = vunpack.c.l.bf16 %v855_v18  ;;  %v839_v29 = vld [vmem:[%s4048_s9 + $0x7d8] sm:$0xff] }
 0x1f6   : > { %2646 = vmatprep.subr.mxu0 %v1251_v32  ;;  %2717 = vmatprep.subr.mxu1 %v1763_v33  ;;  %v1619_v32 = vunpack.c.h.bf16 %v847_v24  ;;  %v1106_v33 = vunpack.c.l.bf16 %v591_v23  ;;  %v1603_v37 = vunpack.c.h.bf16 %v839_v29  ;;  %v1031_v23 = vld [vmem:[%s4048_s9 + $0xdd8] sm:$0xff] }
 0x1f7   : > { %2647 = vmatpush1.msra.mxu0 %v1250_v34  ;;  %2718 = vmatpush1.msra.mxu1 %v1762_v35  ;;  %v1618_v34 = vunpack.c.l.bf16 %v847_v24  ;;  %v831_v35 = vld [vmem:[%s4048_s9 + $0x798] sm:$0xff] }
 0x1f8   : > { %2648 = vmatprep.subr.mxu0 %v1235_v38  ;;  %2719 = vmatprep.subr.mxu1 %v1747_v42  ;;  %v2115_v38 = vunpack.c.h.bf16 %v1095_v30  ;;  %v1602_v42 = vunpack.c.l.bf16 %v839_v29  ;;  %v1587_v48 = vunpack.c.h.bf16 %v831_v35  ;;  %v1023_v29 = vld [vmem:[%s4048_s9 + $0xd98] sm:$0xff] }
 0x1f9   : > { %2649 = vmatpush1.msra.mxu0 %v1234_v45  ;;  %2720 = vmatpush1.msra.mxu1 %v1746_v46  ;;  %v2114_v45 = vunpack.c.l.bf16 %v1095_v30  ;;  %v823_v46 = vld [vmem:[%s4048_s9 + $0x758] sm:$0xff] }
 0x1fa   : > { %2650 = vmatprep.subr.mxu0 %v1219_v49  ;;  %2721 = vmatprep.subr.mxu1 %v1731_v50  ;;  %v2099_v49 = vunpack.c.h.bf16 %v1087_v36  ;;  %v1586_v50 = vunpack.c.l.bf16 %v831_v35  ;;  %v1571_v54 = vunpack.c.h.bf16 %v823_v46  ;;  %v1015_v35 = vld [vmem:[%s4048_s9 + $0xd58] sm:$0xff] }
 0x1fb   : > { %2651 = vmatpush1.msra.mxu0 %v1218_v51  ;;  %2722 = vmatpush1.msra.mxu1 %v1730_v52  ;;  %v2098_v51 = vunpack.c.l.bf16 %v1087_v36  ;;  %v815_v52 = vld [vmem:[%s4048_s9 + $0x718] sm:$0xff] }
 0x1fc   : > { %2652 = vmatprep.subr.mxu0 %v1203_v55  ;;  %2723 = vmatprep.subr.mxu1 %v1715_v56  ;;  %v2083_v55 = vunpack.c.h.bf16 %v1079_v47  ;;  %v1570_v56 = vunpack.c.l.bf16 %v823_v46  ;;  %v1555_v63 = vunpack.c.h.bf16 %v815_v52  ;;  %v1007_v46 = vld [vmem:[%s4048_s9 + $0xd18] sm:$0xff] }
 0x1fd   : > { %2653 = vmatpush1.msra.mxu0 %v1202_v57  ;;  %2724 = vmatpush1.msra.mxu1 %v1714_v59  ;;  %v2082_v57 = vunpack.c.l.bf16 %v1079_v47  ;;  %v807_v59 = vld [vmem:[%s4048_s9 + $0x6d8] sm:$0xff] }
 0x1fe   : > { %2654 = vmatprep.subr.mxu0 %v1187_v1  ;;  %2725 = vmatprep.subr.mxu1 %v1699_v2  ;;  %v2067_v1 = vunpack.c.h.bf16 %v1071_v53  ;;  %v1554_v2 = vunpack.c.l.bf16 %v815_v52  ;;  %v1539_v6 = vunpack.c.h.bf16 %v807_v59  ;;  %v999_v52 = vld [vmem:[%s4048_s9 + $0xcd8] sm:$0xff] }
 0x1ff   : > { %2655 = vmatpush1.msra.mxu0 %v1186_v3  ;;  %2726 = vmatpush1.msra.mxu1 %v1698_v4  ;;  %v2066_v3 = vunpack.c.l.bf16 %v1071_v53  ;;  %v799_v4 = vld [vmem:[%s4048_s9 + $0x698] sm:$0xff] }
 0x200   : > { %2656 = vmatprep.subr.mxu0 %v1171_v7  ;;  %2727 = vmatprep.subr.mxu1 %v1683_v8  ;;  %v2051_v7 = vunpack.c.h.bf16 %v1063_v62  ;;  %v1538_v8 = vunpack.c.l.bf16 %v807_v59  ;;  %v1523_v12 = vunpack.c.h.bf16 %v799_v4  ;;  %v991_v59 = vld [vmem:[%s4048_s9 + $0xc98] sm:$0xff] }
 0x201   : > { %2657 = vmatpush1.msra.mxu0 %v1170_v9  ;;  %2728 = vmatpush1.msra.mxu1 %v1682_v10  ;;  %v2050_v9 = vunpack.c.l.bf16 %v1063_v62  ;;  %v791_v10 = vld [vmem:[%s4048_s9 + $0x658] sm:$0xff] }
 0x202   : > { %2658 = vmatprep.subr.mxu0 %v1155_v13  ;;  %2729 = vmatprep.subr.mxu1 %v1667_v14  ;;  %v2035_v13 = vunpack.c.h.bf16 %v1055_v5  ;;  %v1522_v14 = vunpack.c.l.bf16 %v799_v4  ;;  %v1507_v18 = vunpack.c.h.bf16 %v791_v10  ;;  %v983_v4 = vld [vmem:[%s4048_s9 + $0xc58] sm:$0xff] }
 0x203   : > { %2659 = vmatpush1.msra.mxu0 %v1154_v15  ;;  %2730 = vmatpush1.msra.mxu1 %v1666_v16  ;;  %v2034_v15 = vunpack.c.l.bf16 %v1055_v5  ;;  %v783_v16 = vld [vmem:[%s4048_s9 + $0x618] sm:$0xff] }
 0x204   : > { %2660 = vmatprep.subr.mxu0 %v1139_v19  ;;  %2731 = vmatprep.subr.mxu1 %v1651_v20  ;;  %v2019_v19 = vunpack.c.h.bf16 %v1047_v11  ;;  %v1506_v20 = vunpack.c.l.bf16 %v791_v10  ;;  %v1491_v24 = vunpack.c.h.bf16 %v783_v16  ;;  %v975_v10 = vld [vmem:[%s4048_s9 + $0xc18] sm:$0xff] }
 0x205   : > { %2661 = vmatpush1.msra.mxu0 %v1138_v21  ;;  %2732 = vmatpush1.msra.mxu1 %v1650_v22  ;;  %v2018_v21 = vunpack.c.l.bf16 %v1047_v11  ;;  %v775_v22 = vld [vmem:[%s4048_s9 + $0x5d8] sm:$0xff] }
 0x206   : > { %2662 = vmatprep.subr.mxu0 %v1123_v25  ;;  %2733 = vmatprep.subr.mxu1 %v1635_v26  ;;  %v2003_v25 = vunpack.c.h.bf16 %v1039_v17  ;;  %v1490_v26 = vunpack.c.l.bf16 %v783_v16  ;;  %v1475_v30 = vunpack.c.h.bf16 %v775_v22  ;;  %v1875_v16 = vunpack.c.h.bf16 %v975_v10 }
 0x207   : > { %2663 = vmatpush1.msra.mxu0 %v1122_v27  ;;  %2734 = vmatpush1.msra.mxu1 %v1634_v28  ;;  %v2002_v27 = vunpack.c.l.bf16 %v1039_v17  ;;  %v767_v28 = vld [vmem:[%s4048_s9 + $0x598] sm:$0xff]  ;;  %v712_v17 = vld [vmem:[%s4048_s9 + $0x3e0] sm:$0xff] }
 0x208   : > { %2664 = vmatprep.subr.mxu0 %v1107_v31  ;;  %2735 = vmatprep.subr.mxu1 %v1619_v32  ;;  %v1987_v31 = vunpack.c.h.bf16 %v1031_v23  ;;  %v1474_v32 = vunpack.c.l.bf16 %v775_v22  ;;  %v1459_v36 = vunpack.c.h.bf16 %v767_v28 }
 0x209   : > { %2665 = vmatpush1.msra.mxu0 %v1106_v33  ;;  %2736 = vmatpush1.msra.mxu1 %v1618_v34  ;;  %v1986_v33 = vunpack.c.l.bf16 %v1031_v23  ;;  %v759_v34 = vld [vmem:[%s4048_s9 + $0x558] sm:$0xff]  ;;  %v704_v23 = vld [vmem:[%s4048_s9 + $0x3a0] sm:$0xff] }
 0x20a   : > { %2666 = vmatprep.subr.mxu0 %v1603_v37  ;;  %2737 = vmatprep.subr.mxu1 %v2115_v38  ;;  %v1971_v37 = vunpack.c.h.bf16 %v1023_v29  ;;  %v1458_v38 = vunpack.c.l.bf16 %v767_v28  ;;  %v1443_v47 = vunpack.c.h.bf16 %v759_v34  ;;  %v952_v28 = vld [vmem:[%s4048_s9 + $0xb60] sm:$0xff] }
 0x20b   : > { %2667 = vmatpush2.msra.mxu0 %v1602_v42  ;;  %2738 = vmatpush2.msra.mxu1 %v2114_v45  ;;  %v1970_v42 = vunpack.c.l.bf16 %v1023_v29  ;;  %v751_v45 = vld [vmem:[%s4048_s9 + $0x518] sm:$0xff]  ;;  %v1333_v29 = vunpack.c.h.bf16 %v704_v23 }
 0x20c   : > { %2668 = vmatprep.subr.mxu0 %v1587_v48  ;;  %2739 = vmatprep.subr.mxu1 %v2099_v49  ;;  %v1955_v48 = vunpack.c.h.bf16 %v1015_v35  ;;  %v1442_v49 = vunpack.c.l.bf16 %v759_v34  ;;  %v1427_v53 = vunpack.c.h.bf16 %v751_v45  ;;  %v944_v34 = vld [vmem:[%s4048_s9 + $0xb20] sm:$0xff] }
 0x20d   : > { %2669 = vmatpush2.msra.mxu0 %v1586_v50  ;;  %2740 = vmatpush2.msra.mxu1 %v2098_v51  ;;  %v1954_v50 = vunpack.c.l.bf16 %v1015_v35  ;;  %v743_v51 = vld [vmem:[%s4048_s9 + $0x4d8] sm:$0xff] }
 0x20e   : > { %2670 = vmatprep.subr.mxu0 %v1571_v54  ;;  %2741 = vmatprep.subr.mxu1 %v2083_v55  ;;  %v1939_v54 = vunpack.c.h.bf16 %v1007_v46  ;;  %v1426_v55 = vunpack.c.l.bf16 %v751_v45  ;;  %v1411_v62 = vunpack.c.h.bf16 %v743_v51  ;;  %v936_v45 = vld [vmem:[%s4048_s9 + $0xae0] sm:$0xff] }
 0x20f   : > { %2671 = vmatpush2.msra.mxu0 %v1570_v56  ;;  %2742 = vmatpush2.msra.mxu1 %v2082_v57  ;;  %v1938_v56 = vunpack.c.l.bf16 %v1007_v46  ;;  %v735_v57 = vld [vmem:[%s4048_s9 + $0x498] sm:$0xff] }
 0x210   : > { %2672 = vmatprep.subr.mxu0 %v1555_v63  ;;  %2743 = vmatprep.subr.mxu1 %v2067_v1  ;;  %v1923_v63 = vunpack.c.h.bf16 %v999_v52  ;;  %v1410_v1 = vunpack.c.l.bf16 %v743_v51  ;;  %v1395_v5 = vunpack.c.h.bf16 %v735_v57  ;;  %v928_v51 = vld [vmem:[%s4048_s9 + $0xaa0] sm:$0xff] }
 0x211   : > { %2673 = vmatpush2.msra.mxu0 %v1554_v2  ;;  %2744 = vmatpush2.msra.mxu1 %v2066_v3  ;;  %v1922_v2 = vunpack.c.l.bf16 %v999_v52  ;;  %v727_v3 = vld [vmem:[%s4048_s9 + $0x458] sm:$0xff] }
 0x212   : > { %2674 = vmatprep.subr.mxu0 %v1539_v6  ;;  %2745 = vmatprep.subr.mxu1 %v2051_v7  ;;  %v1907_v6 = vunpack.c.h.bf16 %v991_v59  ;;  %v1394_v7 = vunpack.c.l.bf16 %v735_v57  ;;  %v1379_v11 = vunpack.c.h.bf16 %v727_v3  ;;  %v920_v57 = vld [vmem:[%s4048_s9 + $0xa60] sm:$0xff] }
 0x213   : > { %2675 = vmatpush2.msra.mxu0 %v1538_v8  ;;  %2746 = vmatpush2.msra.mxu1 %v2050_v9  ;;  %v1906_v8 = vunpack.c.l.bf16 %v991_v59  ;;  %v719_v9 = vld [vmem:[%s4048_s9 + $0x418] sm:$0xff] }
 0x214   : > { %2676 = vmatprep.subr.mxu0 %v1523_v12  ;;  %2747 = vmatprep.subr.mxu1 %v2035_v13  ;;  %v1891_v12 = vunpack.c.h.bf16 %v983_v4  ;;  %v1378_v13 = vunpack.c.l.bf16 %v727_v3  ;;  %v912_v3 = vld [vmem:[%s4048_s9 + $0xa20] sm:$0xff] }
 0x215   : > { %2677 = vmatpush2.msra.mxu0 %v1522_v14  ;;  %2748 = vmatpush2.msra.mxu1 %v2034_v15  ;;  %v1890_v14 = vunpack.c.l.bf16 %v983_v4  ;;  %v1363_v15 = vunpack.c.h.bf16 %v719_v9 }
 0x216   : > { %2678 = vmatprep.subr.mxu0 %v1507_v18  ;;  %2749 = vmatprep.subr.mxu1 %v2019_v19  ;;  %v968_v18 = vld [vmem:[%s4048_s9 + $0xbe0] sm:$0xff]  ;;  %v1362_v19 = vunpack.c.l.bf16 %v719_v9 }
 0x217   : > { %2679 = vmatpush2.msra.mxu0 %v1506_v20  ;;  %2750 = vmatpush2.msra.mxu1 %v2018_v21  ;;  %v1874_v20 = vunpack.c.l.bf16 %v975_v10  ;;  %v1349_v21 = vunpack.c.h.bf16 %v712_v17  ;;  %v1861_v22 = vunpack.c.h.bf16 %v968_v18  ;;  %v904_v9 = vld [vmem:[%s4048_s9 + $0x9e0] sm:$0xff] }
 0x218   : > { %2680 = vmatprep.subr.mxu0 %v1491_v24  ;;  %2751 = vmatprep.subr.mxu1 %v2003_v25  ;;  %v960_v24 = vld [vmem:[%s4048_s9 + $0xba0] sm:$0xff]  ;;  %v1348_v25 = vunpack.c.l.bf16 %v712_v17  ;;  %v1733_v17 = vunpack.c.h.bf16 %v904_v9 }
 0x219   : > { %2681 = vmatpush2.msra.mxu0 %v1490_v26  ;;  %2752 = vmatpush2.msra.mxu1 %v2002_v27  ;;  %v1860_v26 = vunpack.c.l.bf16 %v968_v18  ;;  %v696_v27 = vld [vmem:[%s4048_s9 + $0x360] sm:$0xff] }
 0x21a   : > { %2682 = vmatprep.subr.mxu0 %v1475_v30  ;;  %2753 = vmatprep.subr.mxu1 %v1987_v31  ;;  %v1845_v30 = vunpack.c.h.bf16 %v960_v24  ;;  %v1332_v31 = vunpack.c.l.bf16 %v704_v23  ;;  %v1317_v35 = vunpack.c.h.bf16 %v696_v27 }
 0x21b   : > { %2683 = vmatpush2.msra.mxu0 %v1474_v32  ;;  %2754 = vmatpush2.msra.mxu1 %v1986_v33  ;;  %v1844_v32 = vunpack.c.l.bf16 %v960_v24  ;;  %v688_v33 = vld [vmem:[%s4048_s9 + $0x320] sm:$0xff] }
 0x21c   : > { %2684 = vmatprep.subr.mxu0 %v1459_v36  ;;  %2755 = vmatprep.subr.mxu1 %v1971_v37  ;;  %v1829_v36 = vunpack.c.h.bf16 %v952_v28  ;;  %v1316_v37 = vunpack.c.l.bf16 %v696_v27  ;;  %v1301_v46 = vunpack.c.h.bf16 %v688_v33  ;;  %v880_v27 = vld [vmem:[%s4048_s9 + $0x920] sm:$0xff] }
 0x21d   : > { %2685 = vmatpush2.msra.mxu0 %v1458_v38  ;;  %2756 = vmatpush2.msra.mxu1 %v1970_v42  ;;  %v1828_v38 = vunpack.c.l.bf16 %v952_v28  ;;  %v680_v42 = vld [vmem:[%s4048_s9 + $0x2e0] sm:$0xff] }
 0x21e   : > { %2686 = vmatprep.subr.mxu0 %v1443_v47  ;;  %2757 = vmatprep.subr.mxu1 %v1955_v48  ;;  %v1813_v47 = vunpack.c.h.bf16 %v944_v34  ;;  %v1300_v48 = vunpack.c.l.bf16 %v688_v33  ;;  %v1285_v52 = vunpack.c.h.bf16 %v680_v42  ;;  %v872_v33 = vld [vmem:[%s4048_s9 + $0x8e0] sm:$0xff] }
 0x21f   : > { %2687 = vmatpush2.msra.mxu0 %v1442_v49  ;;  %2758 = vmatpush2.msra.mxu1 %v1954_v50  ;;  %v1812_v49 = vunpack.c.l.bf16 %v944_v34  ;;  %v672_v50 = vld [vmem:[%s4048_s9 + $0x2a0] sm:$0xff] }
 0x220   : > { %2688 = vmatprep.subr.mxu0 %v1427_v53  ;;  %2759 = vmatprep.subr.mxu1 %v1939_v54  ;;  %v1797_v53 = vunpack.c.h.bf16 %v936_v45  ;;  %v1284_v54 = vunpack.c.l.bf16 %v680_v42  ;;  %v1269_v59 = vunpack.c.h.bf16 %v672_v50  ;;  %v864_v42 = vld [vmem:[%s4048_s9 + $0x8a0] sm:$0xff] }
 0x221   : > { %2689 = vmatpush2.msra.mxu0 %v1426_v55  ;;  %2760 = vmatpush2.msra.mxu1 %v1938_v56  ;;  %v1796_v55 = vunpack.c.l.bf16 %v936_v45  ;;  %v664_v56 = vld [vmem:[%s4048_s9 + $0x260] sm:$0xff] }
 0x222   : > { %2690 = vmatprep.subr.mxu0 %v1411_v62  ;;  %2761 = vmatprep.subr.mxu1 %v1923_v63  ;;  %v1781_v62 = vunpack.c.h.bf16 %v928_v51  ;;  %v1268_v63 = vunpack.c.l.bf16 %v672_v50  ;;  %v1253_v4 = vunpack.c.h.bf16 %v664_v56  ;;  %v856_v50 = vld [vmem:[%s4048_s9 + $0x860] sm:$0xff] }
 0x223   : > { %2691 = vmatpush2.msra.mxu0 %v1410_v1  ;;  %2762 = vmatpush2.msra.mxu1 %v1922_v2  ;;  %v1780_v1 = vunpack.c.l.bf16 %v928_v51  ;;  %v656_v2 = vld [vmem:[%s4048_s9 + $0x220] sm:$0xff] }
 0x224   : > { %2692 = vmatprep.subr.mxu0 %v1395_v5  ;;  %2763 = vmatprep.subr.mxu1 %v1907_v6  ;;  %v1765_v5 = vunpack.c.h.bf16 %v920_v57  ;;  %v1252_v6 = vunpack.c.l.bf16 %v664_v56  ;;  %v1237_v10 = vunpack.c.h.bf16 %v656_v2  ;;  %v848_v56 = vld [vmem:[%s4048_s9 + $0x820] sm:$0xff] }
 0x225   : > { %2693 = vmatpush2.msra.mxu0 %v1394_v7  ;;  %2764 = vmatpush2.msra.mxu1 %v1906_v8  ;;  %v1764_v7 = vunpack.c.l.bf16 %v920_v57  ;;  %v648_v8 = vld [vmem:[%s4048_s9 + $0x1e0] sm:$0xff] }
 0x226   : > { %2694 = vmatprep.subr.mxu0 %v1379_v11  ;;  %2765 = vmatprep.subr.mxu1 %v1891_v12  ;;  %v1749_v11 = vunpack.c.h.bf16 %v912_v3  ;;  %v1236_v12 = vunpack.c.l.bf16 %v656_v2  ;;  %v1220_v18 = vunpack.c.l.bf16 %v648_v8  ;;  %v1096_v2 = vld [vmem:[%s4048_s9 + $0xfe0] sm:$0xff] }
 0x227   : > { %2695 = vmatpush2.msra.mxu0 %v1378_v13  ;;  %2766 = vmatpush2.msra.mxu1 %v1890_v14  ;;  %v1748_v13 = vunpack.c.l.bf16 %v912_v3  ;;  %v640_v14 = vld [vmem:[%s4048_s9 + $0x1a0] sm:$0xff] }
 0x228   : > { %2696 = vmatprep.subr.mxu0 %v1363_v15  ;;  %2767 = vmatprep.subr.mxu1 %v1875_v16  ;;  %v896_v15 = vld [vmem:[%s4048_s9 + $0x9a0] sm:$0xff]  ;;  %v1221_v16 = vunpack.c.h.bf16 %v648_v8  ;;  %v1204_v24 = vunpack.c.l.bf16 %v640_v14 }
 0x229   : > { %2697 = vmatpush2.msra.mxu0 %v1362_v19  ;;  %2768 = vmatpush2.msra.mxu1 %v1874_v20  ;;  %v1732_v19 = vunpack.c.l.bf16 %v904_v9  ;;  %v632_v20 = vld [vmem:[%s4048_s9 + $0x160] sm:$0xff]  ;;  %v1717_v23 = vunpack.c.h.bf16 %v896_v15 }
 0x22a   : > { %2699 = vmatmul.mubr.f32.vlgmr.msra.gmra.mxu0 %v4146_v0  ;;  %2770 = vmatmul.mubr.f32.vlgmr.msra.gmra.mxu1 %v4139_v58  ;;  %v1189_v28 = vunpack.c.h.bf16 %v632_v20  ;;  %v1088_v8 = vld [vmem:[%s4048_s9 + $0xfa0] sm:$0xff] }
 0x22b   : > { %2776 = vmatprep.subr.mxu0 %v1349_v21  ;;  %2847 = vmatprep.subr.mxu1 %v1861_v22  ;;  %v888_v21 = vld [vmem:[%s4048_s9 + $0x960] sm:$0xff]  ;;  %v1205_v22 = vunpack.c.h.bf16 %v640_v14 }
 0x22c   : > { %2777 = vmatpush1.msra.mxu0 %v1348_v25  ;;  %2840 = vmatprep.mubr.f32.mxu0 %v4142_v60  ;;  %v1716_v25 = vunpack.c.l.bf16 %v896_v15  ;;  %v1080_v14 = vld [vmem:[%s4048_s9 + $0xf60] sm:$0xff] }
 0x22d   : > { %2848 = vmatpush1.msra.mxu1 %v1860_v26  ;;  %2911 = vmatprep.mubr.f32.mxu1 %v4144_v61  ;;  %v624_v26 = vld [vmem:[%s4048_s9 + $0x120] sm:$0xff] }
 0x22e   : > { %2778 = vmatprep.subr.mxu0 %v1333_v29  ;;  %2849 = vmatprep.subr.mxu1 %v1845_v30  ;;  %v1701_v29 = vunpack.c.h.bf16 %v888_v21  ;;  %v1188_v30 = vunpack.c.l.bf16 %v632_v20  ;;  %v1173_v34 = vunpack.c.h.bf16 %v624_v26  ;;  %v1072_v20 = vld [vmem:[%s4048_s9 + $0xf20] sm:$0xff] }
 0x22f   : > { %2779 = vmatpush1.msra.mxu0 %v1332_v31  ;;  %2850 = vmatpush1.msra.mxu1 %v1844_v32  ;;  %v1700_v31 = vunpack.c.l.bf16 %v888_v21  ;;  %v616_v32 = vld [vmem:[%s4048_s9 + $0xe0] sm:$0xff] }
 0x230   : > { %2780 = vmatprep.subr.mxu0 %v1317_v35  ;;  %2851 = vmatprep.subr.mxu1 %v1829_v36  ;;  %v1685_v35 = vunpack.c.h.bf16 %v880_v27  ;;  %v1172_v36 = vunpack.c.l.bf16 %v624_v26  ;;  %v1157_v45 = vunpack.c.h.bf16 %v616_v32  ;;  %v1064_v26 = vld [vmem:[%s4048_s9 + $0xee0] sm:$0xff] }
 0x231   : > { %2781 = vmatpush1.msra.mxu0 %v1316_v37  ;;  %2852 = vmatpush1.msra.mxu1 %v1828_v38  ;;  %v1684_v37 = vunpack.c.l.bf16 %v880_v27  ;;  %v608_v38 = vld [vmem:[%s4048_s9 + $0xa0] sm:$0xff] }
 0x232   : > { %2782 = vmatprep.subr.mxu0 %v1301_v46  ;;  %2853 = vmatprep.subr.mxu1 %v1813_v47  ;;  %v1669_v46 = vunpack.c.h.bf16 %v872_v33  ;;  %v1156_v47 = vunpack.c.l.bf16 %v616_v32  ;;  %v1141_v51 = vunpack.c.h.bf16 %v608_v38  ;;  %v1056_v32 = vld [vmem:[%s4048_s9 + $0xea0] sm:$0xff] }
 0x233   : > { %2783 = vmatpush1.msra.mxu0 %v1300_v48  ;;  %2854 = vmatpush1.msra.mxu1 %v1812_v49  ;;  %v1668_v48 = vunpack.c.l.bf16 %v872_v33  ;;  %v600_v49 = vld [vmem:[%s4048_s9 + $0x60] sm:$0xff] }
 0x234   : > { %2784 = vmatprep.subr.mxu0 %v1285_v52  ;;  %2855 = vmatprep.subr.mxu1 %v1797_v53  ;;  %v1653_v52 = vunpack.c.h.bf16 %v864_v42  ;;  %v1140_v53 = vunpack.c.l.bf16 %v608_v38  ;;  %v1125_v57 = vunpack.c.h.bf16 %v600_v49  ;;  %v1048_v38 = vld [vmem:[%s4048_s9 + $0xe60] sm:$0xff] }
 0x235   : > { %2785 = vmatpush1.msra.mxu0 %v1284_v54  ;;  %2856 = vmatpush1.msra.mxu1 %v1796_v55  ;;  %v1652_v54 = vunpack.c.l.bf16 %v864_v42  ;;  %v592_v55 = vld [vmem:[%s4048_s9 + $0x20] sm:$0xff] }
 0x236   : > { %2786 = vmatprep.subr.mxu0 %v1269_v59  ;;  %2857 = vmatprep.subr.mxu1 %v1781_v62  ;;  %v1637_v59 = vunpack.c.h.bf16 %v856_v50  ;;  %v1124_v62 = vunpack.c.l.bf16 %v600_v49  ;;  %v1109_v3 = vunpack.c.h.bf16 %v592_v55  ;;  %v1040_v49 = vld [vmem:[%s4048_s9 + $0xe20] sm:$0xff] }
 0x237   : > { %2787 = vmatpush1.msra.mxu0 %v1268_v63  ;;  %2858 = vmatpush1.msra.mxu1 %v1780_v1  ;;  %v1636_v63 = vunpack.c.l.bf16 %v856_v50  ;;  %v840_v1 = vld [vmem:[%s4048_s9 + $0x7e0] sm:$0xff] }
 0x238   : > { %2788 = vmatprep.subr.mxu0 %v1253_v4  ;;  %2859 = vmatprep.subr.mxu1 %v1765_v5  ;;  %v1621_v4 = vunpack.c.h.bf16 %v848_v56  ;;  %v1108_v5 = vunpack.c.l.bf16 %v592_v55  ;;  %v1605_v9 = vunpack.c.h.bf16 %v840_v1  ;;  %v1032_v55 = vld [vmem:[%s4048_s9 + $0xde0] sm:$0xff] }
 0x239   : > { %2789 = vmatpush1.msra.mxu0 %v1252_v6  ;;  %2860 = vmatpush1.msra.mxu1 %v1764_v7  ;;  %v1620_v6 = vunpack.c.l.bf16 %v848_v56  ;;  %v832_v7 = vld [vmem:[%s4048_s9 + $0x7a0] sm:$0xff] }
 0x23a   : > { %2790 = vmatprep.subr.mxu0 %v1237_v10  ;;  %2861 = vmatprep.subr.mxu1 %v1749_v11  ;;  %v2117_v10 = vunpack.c.h.bf16 %v1096_v2  ;;  %v1604_v11 = vunpack.c.l.bf16 %v840_v1  ;;  %v1589_v15 = vunpack.c.h.bf16 %v832_v7  ;;  %v1024_v1 = vld [vmem:[%s4048_s9 + $0xda0] sm:$0xff] }
 0x23b   : > { %2791 = vmatpush1.msra.mxu0 %v1236_v12  ;;  %2862 = vmatpush1.msra.mxu1 %v1748_v13  ;;  %v2116_v12 = vunpack.c.l.bf16 %v1096_v2  ;;  %v824_v13 = vld [vmem:[%s4048_s9 + $0x760] sm:$0xff] }
 0x23c   : > { %2792 = vmatprep.subr.mxu0 %v1221_v16  ;;  %2863 = vmatprep.subr.mxu1 %v1733_v17  ;;  %v2101_v16 = vunpack.c.h.bf16 %v1088_v8  ;;  %v1588_v17 = vunpack.c.l.bf16 %v832_v7  ;;  %v1573_v21 = vunpack.c.h.bf16 %v824_v13  ;;  %v1016_v7 = vld [vmem:[%s4048_s9 + $0xd60] sm:$0xff] }
 0x23d   : > { %2793 = vmatpush1.msra.mxu0 %v1220_v18  ;;  %2864 = vmatpush1.msra.mxu1 %v1732_v19  ;;  %v2100_v18 = vunpack.c.l.bf16 %v1088_v8  ;;  %v816_v19 = vld [vmem:[%s4048_s9 + $0x720] sm:$0xff] }
 0x23e   : > { %2794 = vmatprep.subr.mxu0 %v1205_v22  ;;  %2865 = vmatprep.subr.mxu1 %v1717_v23  ;;  %v2085_v22 = vunpack.c.h.bf16 %v1080_v14  ;;  %v1572_v23 = vunpack.c.l.bf16 %v824_v13  ;;  %v1557_v27 = vunpack.c.h.bf16 %v816_v19  ;;  %v1008_v13 = vld [vmem:[%s4048_s9 + $0xd20] sm:$0xff] }
 0x23f   : > { %2795 = vmatpush1.msra.mxu0 %v1204_v24  ;;  %2866 = vmatpush1.msra.mxu1 %v1716_v25  ;;  %v2084_v24 = vunpack.c.l.bf16 %v1080_v14  ;;  %v808_v25 = vld [vmem:[%s4048_s9 + $0x6e0] sm:$0xff]  ;;  %v2274_v14 = vpop.f32.mrf.mxu0 }
 0x240   : > { %2796 = vmatprep.subr.mxu0 %v1189_v28  ;;  %2867 = vmatprep.subr.mxu1 %v1701_v29  ;;  %v2069_v28 = vunpack.c.h.bf16 %v1072_v20  ;;  %v1556_v29 = vunpack.c.l.bf16 %v816_v19  ;;  %v1541_v33 = vunpack.c.h.bf16 %v808_v25  ;;  %v744_v19 = vld [vmem:[%s4048_s9 + $0x4e0] sm:$0xff] }
 0x241   : > { %2797 = vmatpush1.msra.mxu0 %v1188_v30  ;;  %2868 = vmatpush1.msra.mxu1 %v1700_v31  ;;  %v2068_v30 = vunpack.c.l.bf16 %v1072_v20  ;;  %v800_v31 = vld [vmem:[%s4048_s9 + $0x6a0] sm:$0xff] }
 0x242   : > { %2798 = vmatprep.subr.mxu0 %v1173_v34  ;;  %2869 = vmatprep.subr.mxu1 %v1685_v35  ;;  %v2053_v34 = vunpack.c.h.bf16 %v1064_v26  ;;  %v1540_v35 = vunpack.c.l.bf16 %v808_v25  ;;  %v1525_v42 = vunpack.c.h.bf16 %v800_v31  ;;  %v1000_v20 = vld [vmem:[%s4048_s9 + $0xce0] sm:$0xff] }
 0x243   : > { %2799 = vmatpush1.msra.mxu0 %v1172_v36  ;;  %2870 = vmatpush1.msra.mxu1 %v1684_v37  ;;  %v2052_v36 = vunpack.c.l.bf16 %v1064_v26  ;;  %v792_v37 = vld [vmem:[%s4048_s9 + $0x660] sm:$0xff]  ;;  %v1940_v26 = vunpack.c.l.bf16 %v1008_v13 }
 0x244   : > { %2800 = vmatprep.subr.mxu0 %v1157_v45  ;;  %2871 = vmatprep.subr.mxu1 %v1669_v46  ;;  %v2037_v45 = vunpack.c.h.bf16 %v1056_v32  ;;  %v1524_v46 = vunpack.c.l.bf16 %v800_v31  ;;  %v1509_v50 = vunpack.c.h.bf16 %v792_v37  ;;  %v1413_v31 = vunpack.c.h.bf16 %v744_v19 }
 0x245   : > { %2801 = vmatpush1.msra.mxu0 %v1156_v47  ;;  %2872 = vmatpush1.msra.mxu1 %v1668_v48  ;;  %v2036_v47 = vunpack.c.l.bf16 %v1056_v32  ;;  %v784_v48 = vld [vmem:[%s4048_s9 + $0x620] sm:$0xff]  ;;  %v1925_v32 = vunpack.c.h.bf16 %v1000_v20 }
 0x246   : > { %2802 = vmatprep.subr.mxu0 %v1141_v51  ;;  %2873 = vmatprep.subr.mxu1 %v1653_v52  ;;  %v2021_v51 = vunpack.c.h.bf16 %v1048_v38  ;;  %v1508_v52 = vunpack.c.l.bf16 %v792_v37  ;;  %v1493_v56 = vunpack.c.h.bf16 %v784_v48  ;;  %v984_v37 = vld [vmem:[%s4048_s9 + $0xc60] sm:$0xff] }
 0x247   : > { %2803 = vmatpush1.msra.mxu0 %v1140_v53  ;;  %2874 = vmatpush1.msra.mxu1 %v1652_v54  ;;  %v2020_v53 = vunpack.c.l.bf16 %v1048_v38  ;;  %v776_v54 = vld [vmem:[%s4048_s9 + $0x5e0] sm:$0xff]  ;;  %v3851_v38 = vmov 1983009808  }
 0x248   : > { %2804 = vmatprep.subr.mxu0 %v1125_v57  ;;  %2875 = vmatprep.subr.mxu1 %v1637_v59  ;;  %v2005_v57 = vunpack.c.h.bf16 %v1040_v49  ;;  %v1492_v59 = vunpack.c.l.bf16 %v784_v48  ;;  %v1477_v2 = vunpack.c.h.bf16 %v776_v54 }
 0x249   : > { %2805 = vmatpush1.msra.mxu0 %v1124_v62  ;;  %2876 = vmatpush1.msra.mxu1 %v1636_v63  ;;  %v2004_v62 = vunpack.c.l.bf16 %v1040_v49  ;;  %v768_v63 = vld [vmem:[%s4048_s9 + $0x5a0] sm:$0xff] }
 0x24a   : > { %2806 = vmatprep.subr.mxu0 %v1109_v3  ;;  %2877 = vmatprep.subr.mxu1 %v1621_v4  ;;  %v1989_v3 = vunpack.c.h.bf16 %v1032_v55  ;;  %v1476_v4 = vunpack.c.l.bf16 %v776_v54  ;;  %v1461_v8 = vunpack.c.h.bf16 %v768_v63 }
 0x24b   : > { %2807 = vmatpush1.msra.mxu0 %v1108_v5  ;;  %2878 = vmatpush1.msra.mxu1 %v1620_v6  ;;  %v1988_v5 = vunpack.c.l.bf16 %v1032_v55  ;;  %v760_v6 = vld [vmem:[%s4048_s9 + $0x560] sm:$0xff]  ;;  %v1893_v55 = vunpack.c.h.bf16 %v984_v37 }
 0x24c   : > { %2808 = vmatprep.subr.mxu0 %v1605_v9  ;;  %2879 = vmatprep.subr.mxu1 %v2117_v10  ;;  %v1973_v9 = vunpack.c.h.bf16 %v1024_v1  ;;  %v1460_v10 = vunpack.c.l.bf16 %v768_v63 }
 0x24d   : > { %2809 = vmatpush2.msra.mxu0 %v1604_v11  ;;  %2880 = vmatpush2.msra.mxu1 %v2116_v12  ;;  %v1972_v11 = vunpack.c.l.bf16 %v1024_v1  ;;  %v752_v12 = vld [vmem:[%s4048_s9 + $0x520] sm:$0xff] }
 0x24e   : > { %2810 = vmatprep.subr.mxu0 %v1589_v15  ;;  %2881 = vmatprep.subr.mxu1 %v2101_v16  ;;  %v1445_v15 = vunpack.c.h.bf16 %v760_v6  ;;  %v1957_v16 = vunpack.c.h.bf16 %v1016_v7  ;;  %v1428_v25 = vunpack.c.l.bf16 %v752_v12 }
 0x24f   : > { %2811 = vmatpush2.msra.mxu0 %v1588_v17  ;;  %2882 = vmatpush2.msra.mxu1 %v2100_v18  ;;  %v1444_v17 = vunpack.c.l.bf16 %v760_v6  ;;  %v1956_v18 = vunpack.c.l.bf16 %v1016_v7  ;;  %v969_v6 = vld [vmem:[%s4048_s9 + $0xbe8] sm:$0xff] }
 0x250   : > { %2812 = vmatprep.subr.mxu0 %v1573_v21  ;;  %2883 = vmatprep.subr.mxu1 %v2085_v22  ;;  %v4420_v21 = vld [vmem:[%s4417_s26] sm:$0xff]  ;;  %v1429_v22 = vunpack.c.h.bf16 %v752_v12 }
 0x251   : > { %2813 = vmatpush2.msra.mxu0 %v1572_v23  ;;  %2884 = vmatpush2.msra.mxu1 %v2084_v24  ;;  %v1941_v23 = vunpack.c.h.bf16 %v1008_v13  ;;  %v2135_v24 = vrot.slane %v4420_v21, %v4129_v43 }
 0x252   : > { %2814 = vmatprep.subr.mxu0 %v1557_v27  ;;  %2885 = vmatprep.subr.mxu1 %v2069_v28  ;;  %v736_v27 = vld [vmem:[%s4048_s9 + $0x4a0] sm:$0xff] }
 0x253   : > { %2815 = vmatpush2.msra.mxu0 %v1556_v29  ;;  %2886 = vmatpush2.msra.mxu1 %v2068_v30  ;;  %v992_v28 = vld [vmem:[%s4048_s9 + $0xca0] sm:$0xff]  ;;  %v2345_v29 = vpop.f32.mrf.mxu1  ;;  %v2276_v30 = vpop.f32.mrf.mxu0  ;;  %v1396_v48 = vunpack.c.l.bf16 %v736_v27 }
 0x254   : > { %2816 = vmatprep.subr.mxu0 %v1541_v33  ;;  %2887 = vmatprep.subr.mxu1 %v2053_v34  ;;  %v2131_v33 = vrot.slane %v4420_v21, %v4126_v41  ;;  %v1412_v34 = vunpack.c.l.bf16 %v744_v19  ;;  %v1908_v49 = vunpack.c.l.bf16 %v992_v28 }
 0x255   : > { %2817 = vmatpush2.msra.mxu0 %v1540_v35  ;;  %2888 = vmatpush2.msra.mxu1 %v2052_v36  ;;  %v1924_v35 = vunpack.c.l.bf16 %v1000_v20  ;;  %v728_v36 = vld [vmem:[%s4048_s9 + $0x460] sm:$0xff] }
 0x256   : > { %2818 = vmatprep.subr.mxu0 %v1525_v42  ;;  %2889 = vmatprep.subr.mxu1 %v2037_v45  ;;  %v3363_v42 = vunpack.c.l.s4 %v3851_v38  ;;  %v1397_v45 = vunpack.c.h.bf16 %v736_v27  ;;  %v1381_v54 = vunpack.c.h.bf16 %v728_v36 }
 0x257   : > { %2819 = vmatpush2.msra.mxu0 %v1524_v46  ;;  %2890 = vmatpush2.msra.mxu1 %v2036_v47  ;;  %v1909_v46 = vunpack.c.h.bf16 %v992_v28  ;;  %v2277_v47 = vadd.f32 %v2276_v30, %v2135_v24 }
 0x258   : > { %2820 = vmatprep.subr.mxu0 %v1509_v50  ;;  %2891 = vmatprep.subr.mxu1 %v2021_v51  ;;  %v720_v50 = vld [vmem:[%s4048_s9 + $0x420] sm:$0xff]  ;;  %v3364_v63 = vunpack.c.0.s8 %v3363_v42 }
 0x259   : > { %2821 = vmatpush2.msra.mxu0 %v1508_v52  ;;  %2892 = vmatpush2.msra.mxu1 %v2020_v53  ;;  %v976_v51 = vld [vmem:[%s4048_s9 + $0xc20] sm:$0xff]  ;;  %v2139_v52 = vrot.slane %v4420_v21, %v4123_v40  ;;  %v2347_v53 = vpop.f32.mrf.mxu1  ;;  %v1365_v1 = vunpack.c.h.bf16 %v720_v50 }
 0x25a   : > { %2822 = vmatprep.subr.mxu0 %v1493_v56  ;;  %2893 = vmatprep.subr.mxu1 %v2005_v57  ;;  %v2275_v56 = vadd.f32 %v2274_v14, %v2131_v33  ;;  %v1380_v57 = vunpack.c.l.bf16 %v728_v36  ;;  %v2348_v7 = vadd.f32 %v2347_v53, %v2277_v47  ;;  %v1863_v14 = vunpack.c.h.bf16 %v969_v6  ;;  %v945_v33 = vld [vmem:[%s4048_s9 + $0xb28] sm:$0xff] }
 0x25b   : > { %2823 = vmatpush2.msra.mxu0 %v1492_v59  ;;  %2894 = vmatpush2.msra.mxu1 %v2004_v62  ;;  %v1892_v59 = vunpack.c.l.bf16 %v984_v37  ;;  %v2143_v62 = vrot.slane %v4420_v21, %v4132_v44  ;;  %v929_v53 = vld [vmem:[%s4048_s9 + $0xaa8] sm:$0xff] }
 0x25c   : > { %2824 = vmatprep.subr.mxu0 %v1477_v2  ;;  %2895 = vmatprep.subr.mxu1 %v1989_v3  ;;  %v1877_v2 = vunpack.c.h.bf16 %v976_v51  ;;  %v2346_v12 = vadd.f32 %v2345_v29, %v2275_v56 }
 0x25d   : > { %2825 = vmatpush2.msra.mxu0 %v1476_v4  ;;  %2896 = vmatpush2.msra.mxu1 %v1988_v5  ;;  %v713_v5 = vld [vmem:[%s4048_s9 + $0x3e8] sm:$0xff] }
 0x25e   : > { %2826 = vmatprep.subr.mxu0 %v1461_v8  ;;  %2897 = vmatprep.subr.mxu1 %v1973_v9  ;;  %v1364_v8 = vunpack.c.l.bf16 %v720_v50  ;;  %v1876_v9 = vunpack.c.l.bf16 %v976_v51  ;;  %v1351_v13 = vunpack.c.h.bf16 %v713_v5  ;;  %v1350_v19 = vunpack.c.l.bf16 %v713_v5  ;;  %v913_v5 = vld [vmem:[%s4048_s9 + $0xa28] sm:$0xff] }
 0x25f   : > { %2827 = vmatpush2.msra.mxu0 %v1460_v10  ;;  %2898 = vmatpush2.msra.mxu1 %v1972_v11  ;;  %v3360_v21 = vcombine.low %v2346_v12, %v2348_v7  ;;  %v1814_v51 = vunpack.c.l.bf16 %v945_v33 }
 0x260   : > { %2828 = vmatprep.subr.mxu0 %v1445_v15  ;;  %2899 = vmatprep.subr.mxu1 %v1957_v16  ;;  %v705_v16 = vld [vmem:[%s4048_s9 + $0x3a8] sm:$0xff] }
 0x261   : > { %2829 = vmatpush2.msra.mxu0 %v1444_v17  ;;  %2900 = vmatpush2.msra.mxu1 %v1956_v18  ;;  %v961_v17 = vld [vmem:[%s4048_s9 + $0xba8] sm:$0xff]  ;;  %v4454_v18 = vsub.s32 %v3364_v63, %v4120_v39  ;;  %v1335_v27 = vunpack.c.h.bf16 %v705_v16  ;;  %v1334_v30 = vunpack.c.l.bf16 %v705_v16 }
 0x262   : > { %2830 = vmatprep.subr.mxu0 %v1429_v22  ;;  %2901 = vmatprep.subr.mxu1 %v1941_v23  ;;  %v1862_v23 = vunpack.c.l.bf16 %v969_v6  ;;  %v1847_v28 = vunpack.c.h.bf16 %v961_v17  ;;  %v641_v16 = vld [vmem:[%s4048_s9 + $0x1a8] sm:$0xff] }
 0x263   : > { %2831 = vmatpush2.msra.mxu0 %v1428_v25  ;;  %2902 = vmatpush2.msra.mxu1 %v1940_v26  ;;  %v697_v25 = vld [vmem:[%s4048_s9 + $0x368] sm:$0xff]  ;;  %v3368_v36 = vrot.slane %v3360_v21, %v4454_v18 }
 0x264   : > { %2832 = vmatprep.subr.mxu0 %v1413_v31  ;;  %2903 = vmatprep.subr.mxu1 %v1925_v32  ;;  %v953_v26 = vld [vmem:[%s4048_s9 + $0xb68] sm:$0xff]  ;;  %v1846_v31 = vunpack.c.l.bf16 %v961_v17  ;;  %v1318_v38 = vunpack.c.l.bf16 %v697_v25 }
 0x265   : > { %2833 = vmatpush2.msra.mxu0 %v1412_v34  ;;  %2904 = vmatpush2.msra.mxu1 %v1924_v35  ;;  %v689_v32 = vld [vmem:[%s4048_s9 + $0x328] sm:$0xff]  ;;  %v1319_v34 = vunpack.c.h.bf16 %v697_v25  ;;  %v1831_v35 = vunpack.c.h.bf16 %v953_v26  ;;  %v1830_v42 = vunpack.c.l.bf16 %v953_v26  ;;  %v1207_v25 = vunpack.c.h.bf16 %v641_v16 }
 0x266   : > { %2834 = vmatprep.subr.mxu0 %v1397_v45  ;;  %2905 = vmatprep.subr.mxu1 %v1909_v46  ;;  %v2416_v3 = vpop.f32.mrf.mxu0  ;;  %v2487_v4 = vpop.f32.mrf.mxu1  ;;  %v681_v45 = vld [vmem:[%s4048_s9 + $0x2e8] sm:$0xff]  ;;  %v1303_v47 = vunpack.c.h.bf16 %v689_v32  ;;  %v1302_v50 = vunpack.c.l.bf16 %v689_v32 }
 0x267   : > { %2835 = vmatpush2.msra.mxu0 %v1396_v48  ;;  %2906 = vmatpush2.msra.mxu1 %v1908_v49  ;;  %v2417_v10 = vadd.f32 %v2416_v3, %v2139_v52  ;;  %v937_v46 = vld [vmem:[%s4048_s9 + $0xae8] sm:$0xff]  ;;  %v1815_v48 = vunpack.c.h.bf16 %v945_v33  ;;  %v1286_v56 = vunpack.c.l.bf16 %v681_v45  ;;  %v1782_v3 = vunpack.c.l.bf16 %v929_v53 }
 0x268   : > { %2836 = vmatprep.subr.mxu0 %v1381_v54  ;;  %2907 = vmatprep.subr.mxu1 %v1893_v55  ;;  %v2418_v11 = vpop.f32.mrf.mxu0  ;;  %v2489_v20 = vpop.f32.mrf.mxu1  ;;  %v673_v52 = vld [vmem:[%s4048_s9 + $0x2a8] sm:$0xff]  ;;  %v1287_v54 = vunpack.c.h.bf16 %v681_v45  ;;  %v1799_v55 = vunpack.c.h.bf16 %v937_v46 }
 0x269   : > { %2837 = vmatpush2.msra.mxu0 %v1380_v57  ;;  %2908 = vmatpush2.msra.mxu1 %v1892_v59  ;;  %v2419_v15 = vadd.f32 %v2418_v11, %v2143_v62  ;;  %v2488_v22 = vadd.f32 %v2487_v4, %v2417_v10  ;;  %v1798_v57 = vunpack.c.l.bf16 %v937_v46  ;;  %v665_v59 = vld [vmem:[%s4048_s9 + $0x268] sm:$0xff]  ;;  %v1271_v63 = vunpack.c.h.bf16 %v673_v52 }
 0x26a   : > { %2838 = vmatprep.subr.mxu0 %v1365_v1  ;;  %2909 = vmatprep.subr.mxu1 %v1877_v2  ;;  %v921_v62 = vld [vmem:[%s4048_s9 + $0xa68] sm:$0xff]  ;;  %v1783_v1 = vunpack.c.h.bf16 %v929_v53  ;;  %v1270_v2 = vunpack.c.l.bf16 %v673_v52  ;;  %v1255_v6 = vunpack.c.h.bf16 %v665_v59 }
 0x26b   : > { %2839 = vmatpush2.msra.mxu0 %v1364_v8  ;;  %2910 = vmatpush2.msra.mxu1 %v1876_v9  ;;  %v2490_v24 = vadd.f32 %v2489_v20, %v2419_v15  ;;  %v657_v4 = vld [vmem:[%s4048_s9 + $0x228] sm:$0xff]  ;;  %v1767_v7 = vunpack.c.h.bf16 %v921_v62  ;;  %v1254_v8 = vunpack.c.l.bf16 %v665_v59  ;;  %v1766_v9 = vunpack.c.l.bf16 %v921_v62 }
 0x26c   : > { %2841 = vmatmul.mubr.f32.vlgmr.msra.gmra.mxu0 %v4146_v0  ;;  %2912 = vmatmul.mubr.f32.vlgmr.msra.gmra.mxu1 %v4139_v58  ;;  %v649_v10 = vld [vmem:[%s4048_s9 + $0x1e8] sm:$0xff]  ;;  %v1239_v12 = vunpack.c.h.bf16 %v657_v4  ;;  %v1750_v15 = vunpack.c.l.bf16 %v913_v5 }
 0x26d   : > { %2918 = vmatprep.subr.mxu0 %v1351_v13  ;;  %2989 = vmatprep.subr.mxu1 %v1863_v14  ;;  %v3361_v29 = vcombine.low %v2488_v22, %v2490_v24  ;;  %v905_v11 = vld [vmem:[%s4048_s9 + $0x9e8] sm:$0xff]  ;;  %v1751_v13 = vunpack.c.h.bf16 %v913_v5  ;;  %v1238_v14 = vunpack.c.l.bf16 %v657_v4  ;;  %v1222_v21 = vunpack.c.l.bf16 %v649_v10 }
 0x26e   : > { %2919 = vmatpush1.msra.mxu0 %v1350_v19  ;;  %2982 = vmatprep.mubr.f32.mxu0 %v4142_v60  ;;  %v897_v17 = vld [vmem:[%s4048_s9 + $0x9a8] sm:$0xff]  ;;  %v1223_v19 = vunpack.c.h.bf16 %v649_v10  ;;  %v1735_v20 = vunpack.c.h.bf16 %v905_v11  ;;  %v1734_v22 = vunpack.c.l.bf16 %v905_v11 }
 0x26f   : > { %2990 = vmatpush1.msra.mxu1 %v1862_v23  ;;  %3053 = vmatprep.mubr.f32.mxu1 %v4144_v61  ;;  %v3375_v37 = vrot.slane %v3361_v29, %v4454_v18  ;;  %v633_v23 = vld [vmem:[%s4048_s9 + $0x168] sm:$0xff]  ;;  %v1719_v26 = vunpack.c.h.bf16 %v897_v17 }
 0x270   : > { %2920 = vmatprep.subr.mxu0 %v1335_v27  ;;  %2991 = vmatprep.subr.mxu1 %v1847_v28  ;;  %v889_v24 = vld [vmem:[%s4048_s9 + $0x968] sm:$0xff]  ;;  %v1206_v27 = vunpack.c.l.bf16 %v641_v16  ;;  %v1718_v28 = vunpack.c.l.bf16 %v897_v17  ;;  %v1190_v33 = vunpack.c.l.bf16 %v633_v23 }
 0x271   : > { %v3376_v49 = vcombine.low %v3368_v36, %v3375_v37  ;;  %2921 = vmatpush1.msra.mxu0 %v1334_v30  ;;  %2992 = vmatpush1.msra.mxu1 %v1846_v31  ;;  %v625_v29 = vld [vmem:[%s4048_s9 + $0x128] sm:$0xff]  ;;  %v1191_v31 = vunpack.c.h.bf16 %v633_v23  ;;  %v1703_v32 = vunpack.c.h.bf16 %v889_v24 }
 0x272   : > { %2922 = vmatprep.subr.mxu0 %v1319_v34  ;;  %2993 = vmatprep.subr.mxu1 %v1831_v35  ;;  %v881_v30 = vld [vmem:[%s4048_s9 + $0x928] sm:$0xff]  ;;  %v1702_v34 = vunpack.c.l.bf16 %v889_v24  ;;  %v1175_v37 = vunpack.c.h.bf16 %v625_v29 }
 0x273   : > { %3432 = vst [vmem:[%s4472_s13] sm:$0xff] %v3376_v49  ;;  %2923 = vmatpush1.msra.mxu0 %v1318_v38  ;;  %2994 = vmatpush1.msra.mxu1 %v1830_v42  ;;  %v617_v35 = vld [vmem:[%s4048_s9 + $0xe8] sm:$0xff]  ;;  %v1687_v38 = vunpack.c.h.bf16 %v881_v30  ;;  %v1174_v42 = vunpack.c.l.bf16 %v625_v29  ;;  %v1686_v45 = vunpack.c.l.bf16 %v881_v30 }
 0x274   : > { %2924 = vmatprep.subr.mxu0 %v1303_v47  ;;  %2995 = vmatprep.subr.mxu1 %v1815_v48  ;;  %v873_v36 = vld [vmem:[%s4048_s9 + $0x8e8] sm:$0xff]  ;;  %v1159_v48 = vunpack.c.h.bf16 %v617_v35 }
 0x275   : > { %2925 = vmatpush1.msra.mxu0 %v1302_v50  ;;  %2996 = vmatpush1.msra.mxu1 %v1814_v51  ;;  %v609_v46 = vld [vmem:[%s4048_s9 + $0xa8] sm:$0xff]  ;;  %v1671_v49 = vunpack.c.h.bf16 %v873_v36  ;;  %v1158_v50 = vunpack.c.l.bf16 %v617_v35  ;;  %v1670_v51 = vunpack.c.l.bf16 %v873_v36 }
 0x276   : > { %2926 = vmatprep.subr.mxu0 %v1287_v54  ;;  %2997 = vmatprep.subr.mxu1 %v1799_v55  ;;  %v865_v47 = vld [vmem:[%s4048_s9 + $0x8a8] sm:$0xff]  ;;  %v1143_v54 = vunpack.c.h.bf16 %v609_v46 }
 0x277   : > { %2927 = vmatpush1.msra.mxu0 %v1286_v56  ;;  %2998 = vmatpush1.msra.mxu1 %v1798_v57  ;;  %v601_v52 = vld [vmem:[%s4048_s9 + $0x68] sm:$0xff]  ;;  %v1655_v55 = vunpack.c.h.bf16 %v865_v47  ;;  %v1142_v56 = vunpack.c.l.bf16 %v609_v46  ;;  %v1654_v57 = vunpack.c.l.bf16 %v865_v47 }
 0x278   : > { %2928 = vmatprep.subr.mxu0 %v1271_v63  ;;  %2999 = vmatprep.subr.mxu1 %v1783_v1  ;;  %v857_v53 = vld [vmem:[%s4048_s9 + $0x868] sm:$0xff]  ;;  %v1127_v63 = vunpack.c.h.bf16 %v601_v52 }
 0x279   : > { %2929 = vmatpush1.msra.mxu0 %v1270_v2  ;;  %3000 = vmatpush1.msra.mxu1 %v1782_v3  ;;  %v593_v59 = vld [vmem:[%s4048_s9 + $0x28] sm:$0xff]  ;;  %v1639_v1 = vunpack.c.h.bf16 %v857_v53  ;;  %v1126_v2 = vunpack.c.l.bf16 %v601_v52  ;;  %v1638_v3 = vunpack.c.l.bf16 %v857_v53 }
 0x27a   : > { %2930 = vmatprep.subr.mxu0 %v1255_v6  ;;  %3001 = vmatprep.subr.mxu1 %v1767_v7  ;;  %v849_v62 = vld [vmem:[%s4048_s9 + $0x828] sm:$0xff]  ;;  %v1111_v6 = vunpack.c.h.bf16 %v593_v59 }
 0x27b   : > { %2931 = vmatpush1.msra.mxu0 %v1254_v8  ;;  %3002 = vmatpush1.msra.mxu1 %v1766_v9  ;;  %v841_v4 = vld [vmem:[%s4048_s9 + $0x7e8] sm:$0xff]  ;;  %v1623_v7 = vunpack.c.h.bf16 %v849_v62  ;;  %v1110_v8 = vunpack.c.l.bf16 %v593_v59  ;;  %v1622_v9 = vunpack.c.l.bf16 %v849_v62 }
 0x27c   : > { %2932 = vmatprep.subr.mxu0 %v1239_v12  ;;  %3003 = vmatprep.subr.mxu1 %v1751_v13  ;;  %v1097_v5 = vld [vmem:[%s4048_s9 + $0xfe8] sm:$0xff]  ;;  %v1607_v12 = vunpack.c.h.bf16 %v841_v4 }
 0x27d   : > { %2933 = vmatpush1.msra.mxu0 %v1238_v14  ;;  %3004 = vmatpush1.msra.mxu1 %v1750_v15  ;;  %v833_v10 = vld [vmem:[%s4048_s9 + $0x7a8] sm:$0xff]  ;;  %v2119_v13 = vunpack.c.h.bf16 %v1097_v5  ;;  %v1606_v14 = vunpack.c.l.bf16 %v841_v4  ;;  %v2118_v15 = vunpack.c.l.bf16 %v1097_v5 }
 0x27e   : > { %2934 = vmatprep.subr.mxu0 %v1223_v19  ;;  %3005 = vmatprep.subr.mxu1 %v1735_v20  ;;  %v1089_v11 = vld [vmem:[%s4048_s9 + $0xfa8] sm:$0xff]  ;;  %v1591_v19 = vunpack.c.h.bf16 %v833_v10 }
 0x27f   : > { %2935 = vmatpush1.msra.mxu0 %v1222_v21  ;;  %3006 = vmatpush1.msra.mxu1 %v1734_v22  ;;  %v825_v16 = vld [vmem:[%s4048_s9 + $0x768] sm:$0xff]  ;;  %v2103_v20 = vunpack.c.h.bf16 %v1089_v11  ;;  %v1590_v21 = vunpack.c.l.bf16 %v833_v10  ;;  %v2102_v22 = vunpack.c.l.bf16 %v1089_v11 }
 0x280   : > { %2936 = vmatprep.subr.mxu0 %v1207_v25  ;;  %3007 = vmatprep.subr.mxu1 %v1719_v26  ;;  %v1081_v17 = vld [vmem:[%s4048_s9 + $0xf68] sm:$0xff]  ;;  %v1575_v25 = vunpack.c.h.bf16 %v825_v16 }
 0x281   : > { %2937 = vmatpush1.msra.mxu0 %v1206_v27  ;;  %3008 = vmatpush1.msra.mxu1 %v1718_v28  ;;  %v817_v23 = vld [vmem:[%s4048_s9 + $0x728] sm:$0xff]  ;;  %v2087_v26 = vunpack.c.h.bf16 %v1081_v17  ;;  %v1574_v27 = vunpack.c.l.bf16 %v825_v16  ;;  %v2086_v28 = vunpack.c.l.bf16 %v1081_v17 }
 0x282   : > { %2938 = vmatprep.subr.mxu0 %v1191_v31  ;;  %3009 = vmatprep.subr.mxu1 %v1703_v32  ;;  %v1073_v24 = vld [vmem:[%s4048_s9 + $0xf28] sm:$0xff]  ;;  %v1559_v31 = vunpack.c.h.bf16 %v817_v23 }
 0x283   : > { %2939 = vmatpush1.msra.mxu0 %v1190_v33  ;;  %3010 = vmatpush1.msra.mxu1 %v1702_v34  ;;  %v809_v29 = vld [vmem:[%s4048_s9 + $0x6e8] sm:$0xff]  ;;  %v2071_v32 = vunpack.c.h.bf16 %v1073_v24  ;;  %v1558_v33 = vunpack.c.l.bf16 %v817_v23  ;;  %v2070_v34 = vunpack.c.l.bf16 %v1073_v24 }
 0x284   : > { %2940 = vmatprep.subr.mxu0 %v1175_v37  ;;  %3011 = vmatprep.subr.mxu1 %v1687_v38  ;;  %v1065_v30 = vld [vmem:[%s4048_s9 + $0xee8] sm:$0xff]  ;;  %v1543_v37 = vunpack.c.h.bf16 %v809_v29 }
 0x285   : > { %2941 = vmatpush1.msra.mxu0 %v1174_v42  ;;  %3012 = vmatpush1.msra.mxu1 %v1686_v45  ;;  %v801_v35 = vld [vmem:[%s4048_s9 + $0x6a8] sm:$0xff]  ;;  %v2055_v38 = vunpack.c.h.bf16 %v1065_v30  ;;  %v1542_v42 = vunpack.c.l.bf16 %v809_v29  ;;  %v2054_v45 = vunpack.c.l.bf16 %v1065_v30 }
 0x286   : > { %2942 = vmatprep.subr.mxu0 %v1159_v48  ;;  %3013 = vmatprep.subr.mxu1 %v1671_v49  ;;  %v1057_v36 = vld [vmem:[%s4048_s9 + $0xea8] sm:$0xff]  ;;  %v1527_v48 = vunpack.c.h.bf16 %v801_v35 }
 0x287   : > { %2943 = vmatpush1.msra.mxu0 %v1158_v50  ;;  %3014 = vmatpush1.msra.mxu1 %v1670_v51  ;;  %v793_v46 = vld [vmem:[%s4048_s9 + $0x668] sm:$0xff]  ;;  %v2039_v49 = vunpack.c.h.bf16 %v1057_v36  ;;  %v1526_v50 = vunpack.c.l.bf16 %v801_v35  ;;  %v2038_v51 = vunpack.c.l.bf16 %v1057_v36 }
 0x288   : > { %2944 = vmatprep.subr.mxu0 %v1143_v54  ;;  %3015 = vmatprep.subr.mxu1 %v1655_v55  ;;  %v1049_v47 = vld [vmem:[%s4048_s9 + $0xe68] sm:$0xff]  ;;  %v1511_v54 = vunpack.c.h.bf16 %v793_v46 }
 0x289   : > { %2945 = vmatpush1.msra.mxu0 %v1142_v56  ;;  %3016 = vmatpush1.msra.mxu1 %v1654_v57  ;;  %v785_v52 = vld [vmem:[%s4048_s9 + $0x628] sm:$0xff]  ;;  %v2023_v55 = vunpack.c.h.bf16 %v1049_v47  ;;  %v1510_v56 = vunpack.c.l.bf16 %v793_v46  ;;  %v2022_v57 = vunpack.c.l.bf16 %v1049_v47 }
 0x28a   : > { %2946 = vmatprep.subr.mxu0 %v1127_v63  ;;  %3017 = vmatprep.subr.mxu1 %v1639_v1  ;;  %v1041_v53 = vld [vmem:[%s4048_s9 + $0xe28] sm:$0xff]  ;;  %v1495_v63 = vunpack.c.h.bf16 %v785_v52 }
 0x28b   : > { %2947 = vmatpush1.msra.mxu0 %v1126_v2  ;;  %3018 = vmatpush1.msra.mxu1 %v1638_v3  ;;  %v777_v59 = vld [vmem:[%s4048_s9 + $0x5e8] sm:$0xff]  ;;  %v2007_v1 = vunpack.c.h.bf16 %v1041_v53  ;;  %v1494_v2 = vunpack.c.l.bf16 %v785_v52  ;;  %v2006_v3 = vunpack.c.l.bf16 %v1041_v53 }
 0x28c   : > { %2948 = vmatprep.subr.mxu0 %v1111_v6  ;;  %3019 = vmatprep.subr.mxu1 %v1623_v7  ;;  %v1033_v62 = vld [vmem:[%s4048_s9 + $0xde8] sm:$0xff]  ;;  %v1479_v6 = vunpack.c.h.bf16 %v777_v59 }
 0x28d   : > { %2949 = vmatpush1.msra.mxu0 %v1110_v8  ;;  %3020 = vmatpush1.msra.mxu1 %v1622_v9  ;;  %v769_v4 = vld [vmem:[%s4048_s9 + $0x5a8] sm:$0xff]  ;;  %v1991_v7 = vunpack.c.h.bf16 %v1033_v62  ;;  %v1478_v8 = vunpack.c.l.bf16 %v777_v59  ;;  %v1990_v9 = vunpack.c.l.bf16 %v1033_v62 }
 0x28e   : > { %2950 = vmatprep.subr.mxu0 %v1607_v12  ;;  %3021 = vmatprep.subr.mxu1 %v2119_v13  ;;  %v1025_v5 = vld [vmem:[%s4048_s9 + $0xda8] sm:$0xff]  ;;  %v1463_v12 = vunpack.c.h.bf16 %v769_v4 }
 0x28f   : > { %2951 = vmatpush2.msra.mxu0 %v1606_v14  ;;  %3022 = vmatpush2.msra.mxu1 %v2118_v15  ;;  %v761_v10 = vld [vmem:[%s4048_s9 + $0x568] sm:$0xff]  ;;  %v1975_v13 = vunpack.c.h.bf16 %v1025_v5  ;;  %v1462_v14 = vunpack.c.l.bf16 %v769_v4  ;;  %v1974_v15 = vunpack.c.l.bf16 %v1025_v5  ;;  %v698_v4 = vld [vmem:[%s4048_s9 + $0x370] sm:$0xff] }
 0x290   : > { %2952 = vmatprep.subr.mxu0 %v1591_v19  ;;  %3023 = vmatprep.subr.mxu1 %v2103_v20  ;;  %v1017_v11 = vld [vmem:[%s4048_s9 + $0xd68] sm:$0xff]  ;;  %v1447_v19 = vunpack.c.h.bf16 %v761_v10  ;;  %v954_v5 = vld [vmem:[%s4048_s9 + $0xb70] sm:$0xff] }
 0x291   : > { %2953 = vmatpush2.msra.mxu0 %v1590_v21  ;;  %3024 = vmatpush2.msra.mxu1 %v2102_v22  ;;  %v753_v16 = vld [vmem:[%s4048_s9 + $0x528] sm:$0xff]  ;;  %v1959_v20 = vunpack.c.h.bf16 %v1017_v11  ;;  %v1446_v21 = vunpack.c.l.bf16 %v761_v10  ;;  %v1958_v22 = vunpack.c.l.bf16 %v1017_v11  ;;  %v690_v10 = vld [vmem:[%s4048_s9 + $0x330] sm:$0xff] }
 0x292   : > { %2954 = vmatprep.subr.mxu0 %v1575_v25  ;;  %3025 = vmatprep.subr.mxu1 %v2087_v26  ;;  %v1009_v17 = vld [vmem:[%s4048_s9 + $0xd28] sm:$0xff]  ;;  %v1431_v25 = vunpack.c.h.bf16 %v753_v16  ;;  %v946_v11 = vld [vmem:[%s4048_s9 + $0xb30] sm:$0xff] }
 0x293   : > { %2955 = vmatpush2.msra.mxu0 %v1574_v27  ;;  %3026 = vmatpush2.msra.mxu1 %v2086_v28  ;;  %v745_v23 = vld [vmem:[%s4048_s9 + $0x4e8] sm:$0xff]  ;;  %v1943_v26 = vunpack.c.h.bf16 %v1009_v17  ;;  %v1430_v27 = vunpack.c.l.bf16 %v753_v16  ;;  %v1942_v28 = vunpack.c.l.bf16 %v1009_v17  ;;  %v682_v16 = vld [vmem:[%s4048_s9 + $0x2f0] sm:$0xff] }
 0x294   : > { %2956 = vmatprep.subr.mxu0 %v1559_v31  ;;  %3027 = vmatprep.subr.mxu1 %v2071_v32  ;;  %v1001_v24 = vld [vmem:[%s4048_s9 + $0xce8] sm:$0xff]  ;;  %v1415_v31 = vunpack.c.h.bf16 %v745_v23  ;;  %v938_v17 = vld [vmem:[%s4048_s9 + $0xaf0] sm:$0xff] }
 0x295   : > { %2957 = vmatpush2.msra.mxu0 %v1558_v33  ;;  %3028 = vmatpush2.msra.mxu1 %v2070_v34  ;;  %v737_v29 = vld [vmem:[%s4048_s9 + $0x4a8] sm:$0xff]  ;;  %v1927_v32 = vunpack.c.h.bf16 %v1001_v24  ;;  %v1414_v33 = vunpack.c.l.bf16 %v745_v23  ;;  %v1926_v34 = vunpack.c.l.bf16 %v1001_v24  ;;  %v674_v23 = vld [vmem:[%s4048_s9 + $0x2b0] sm:$0xff] }
 0x296   : > { %2958 = vmatprep.subr.mxu0 %v1543_v37  ;;  %3029 = vmatprep.subr.mxu1 %v2055_v38  ;;  %v993_v30 = vld [vmem:[%s4048_s9 + $0xca8] sm:$0xff]  ;;  %v1399_v37 = vunpack.c.h.bf16 %v737_v29  ;;  %v930_v24 = vld [vmem:[%s4048_s9 + $0xab0] sm:$0xff] }
 0x297   : > { %2959 = vmatpush2.msra.mxu0 %v1542_v42  ;;  %3030 = vmatpush2.msra.mxu1 %v2054_v45  ;;  %v729_v35 = vld [vmem:[%s4048_s9 + $0x468] sm:$0xff]  ;;  %v1911_v38 = vunpack.c.h.bf16 %v993_v30  ;;  %v1398_v42 = vunpack.c.l.bf16 %v737_v29  ;;  %v1910_v45 = vunpack.c.l.bf16 %v993_v30  ;;  %v666_v29 = vld [vmem:[%s4048_s9 + $0x270] sm:$0xff] }
 0x298   : > { %2960 = vmatprep.subr.mxu0 %v1527_v48  ;;  %3031 = vmatprep.subr.mxu1 %v2039_v49  ;;  %v985_v36 = vld [vmem:[%s4048_s9 + $0xc68] sm:$0xff]  ;;  %v1383_v48 = vunpack.c.h.bf16 %v729_v35  ;;  %v922_v30 = vld [vmem:[%s4048_s9 + $0xa70] sm:$0xff] }
 0x299   : > { %2961 = vmatpush2.msra.mxu0 %v1526_v50  ;;  %3032 = vmatpush2.msra.mxu1 %v2038_v51  ;;  %v721_v46 = vld [vmem:[%s4048_s9 + $0x428] sm:$0xff]  ;;  %v1895_v49 = vunpack.c.h.bf16 %v985_v36  ;;  %v1382_v50 = vunpack.c.l.bf16 %v729_v35  ;;  %v1894_v51 = vunpack.c.l.bf16 %v985_v36  ;;  %v658_v35 = vld [vmem:[%s4048_s9 + $0x230] sm:$0xff] }
 0x29a   : > { %2962 = vmatprep.subr.mxu0 %v1511_v54  ;;  %3033 = vmatprep.subr.mxu1 %v2023_v55  ;;  %v977_v47 = vld [vmem:[%s4048_s9 + $0xc28] sm:$0xff]  ;;  %v1367_v52 = vunpack.c.h.bf16 %v721_v46  ;;  %v714_v54 = vld [vmem:[%s4048_s9 + $0x3f0] sm:$0xff] }
 0x29b   : > { %2963 = vmatpush2.msra.mxu0 %v1510_v56  ;;  %3034 = vmatpush2.msra.mxu1 %v2022_v57  ;;  %v1879_v53 = vunpack.c.h.bf16 %v977_v47  ;;  %v970_v55 = vld [vmem:[%s4048_s9 + $0xbf0] sm:$0xff]  ;;  %v1366_v56 = vunpack.c.l.bf16 %v721_v46  ;;  %v1878_v57 = vunpack.c.l.bf16 %v977_v47  ;;  %v1353_v59 = vunpack.c.h.bf16 %v714_v54 }
 0x29c   : > { %2964 = vmatprep.subr.mxu0 %v1495_v63  ;;  %3035 = vmatprep.subr.mxu1 %v2007_v1  ;;  %v1865_v62 = vunpack.c.h.bf16 %v970_v55  ;;  %v706_v63 = vld [vmem:[%s4048_s9 + $0x3b0] sm:$0xff] }
 0x29d   : > { %2965 = vmatpush2.msra.mxu0 %v1494_v2  ;;  %3036 = vmatpush2.msra.mxu1 %v2006_v3  ;;  %v962_v1 = vld [vmem:[%s4048_s9 + $0xbb0] sm:$0xff]  ;;  %v1352_v2 = vunpack.c.l.bf16 %v714_v54  ;;  %v1864_v3 = vunpack.c.l.bf16 %v970_v55 }
 0x29e   : > { %2966 = vmatprep.subr.mxu0 %v1479_v6  ;;  %3037 = vmatprep.subr.mxu1 %v1991_v7  ;;  %v1337_v6 = vunpack.c.h.bf16 %v706_v63  ;;  %v1849_v7 = vunpack.c.h.bf16 %v962_v1  ;;  %v914_v36 = vld [vmem:[%s4048_s9 + $0xa30] sm:$0xff] }
 0x29f   : > { %2967 = vmatpush2.msra.mxu0 %v1478_v8  ;;  %3038 = vmatpush2.msra.mxu1 %v1990_v9  ;;  %v1336_v8 = vunpack.c.l.bf16 %v706_v63  ;;  %v1848_v9 = vunpack.c.l.bf16 %v962_v1  ;;  %v650_v46 = vld [vmem:[%s4048_s9 + $0x1f0] sm:$0xff] }
 0x2a0   : > { %2968 = vmatprep.subr.mxu0 %v1463_v12  ;;  %3039 = vmatprep.subr.mxu1 %v1975_v13  ;;  %v1321_v12 = vunpack.c.h.bf16 %v698_v4  ;;  %v1833_v13 = vunpack.c.h.bf16 %v954_v5  ;;  %v906_v47 = vld [vmem:[%s4048_s9 + $0x9f0] sm:$0xff]  ;;  %v1225_v54 = vunpack.c.h.bf16 %v650_v46 }
 0x2a1   : > { %2969 = vmatpush2.msra.mxu0 %v1462_v14  ;;  %3040 = vmatpush2.msra.mxu1 %v1974_v15  ;;  %v1320_v14 = vunpack.c.l.bf16 %v698_v4  ;;  %v1832_v15 = vunpack.c.l.bf16 %v954_v5  ;;  %v1737_v55 = vunpack.c.h.bf16 %v906_v47  ;;  %v626_v4 = vld [vmem:[%s4048_s9 + $0x130] sm:$0xff] }
 0x2a2   : > { %2970 = vmatprep.subr.mxu0 %v1447_v19  ;;  %3041 = vmatprep.subr.mxu1 %v1959_v20  ;;  %v1305_v19 = vunpack.c.h.bf16 %v690_v10  ;;  %v1817_v20 = vunpack.c.h.bf16 %v946_v11  ;;  %v882_v5 = vld [vmem:[%s4048_s9 + $0x930] sm:$0xff] }
 0x2a3   : > { %2971 = vmatpush2.msra.mxu0 %v1446_v21  ;;  %3042 = vmatpush2.msra.mxu1 %v1958_v22  ;;  %v1304_v21 = vunpack.c.l.bf16 %v690_v10  ;;  %v1816_v22 = vunpack.c.l.bf16 %v946_v11  ;;  %v618_v10 = vld [vmem:[%s4048_s9 + $0xf0] sm:$0xff] }
 0x2a4   : > { %2972 = vmatprep.subr.mxu0 %v1431_v25  ;;  %3043 = vmatprep.subr.mxu1 %v1943_v26  ;;  %v1289_v25 = vunpack.c.h.bf16 %v682_v16  ;;  %v1801_v26 = vunpack.c.h.bf16 %v938_v17  ;;  %v874_v11 = vld [vmem:[%s4048_s9 + $0x8f0] sm:$0xff] }
 0x2a5   : > { %2973 = vmatpush2.msra.mxu0 %v1430_v27  ;;  %3044 = vmatpush2.msra.mxu1 %v1942_v28  ;;  %v1288_v27 = vunpack.c.l.bf16 %v682_v16  ;;  %v1800_v28 = vunpack.c.l.bf16 %v938_v17  ;;  %v610_v16 = vld [vmem:[%s4048_s9 + $0xb0] sm:$0xff] }
 0x2a6   : > { %2974 = vmatprep.subr.mxu0 %v1415_v31  ;;  %3045 = vmatprep.subr.mxu1 %v1927_v32  ;;  %v1273_v31 = vunpack.c.h.bf16 %v674_v23  ;;  %v1785_v32 = vunpack.c.h.bf16 %v930_v24  ;;  %v866_v17 = vld [vmem:[%s4048_s9 + $0x8b0] sm:$0xff] }
 0x2a7   : > { %2975 = vmatpush2.msra.mxu0 %v1414_v33  ;;  %3046 = vmatpush2.msra.mxu1 %v1926_v34  ;;  %v1272_v33 = vunpack.c.l.bf16 %v674_v23  ;;  %v1784_v34 = vunpack.c.l.bf16 %v930_v24  ;;  %v602_v23 = vld [vmem:[%s4048_s9 + $0x70] sm:$0xff] }
 0x2a8   : > { %2976 = vmatprep.subr.mxu0 %v1399_v37  ;;  %3047 = vmatprep.subr.mxu1 %v1911_v38  ;;  %v1257_v37 = vunpack.c.h.bf16 %v666_v29  ;;  %v1769_v38 = vunpack.c.h.bf16 %v922_v30  ;;  %v858_v24 = vld [vmem:[%s4048_s9 + $0x870] sm:$0xff] }
 0x2a9   : > { %2977 = vmatpush2.msra.mxu0 %v1398_v42  ;;  %3048 = vmatpush2.msra.mxu1 %v1910_v45  ;;  %v1256_v42 = vunpack.c.l.bf16 %v666_v29  ;;  %v1768_v45 = vunpack.c.l.bf16 %v922_v30  ;;  %v594_v29 = vld [vmem:[%s4048_s9 + $0x30] sm:$0xff] }
 0x2aa   : > { %2978 = vmatprep.subr.mxu0 %v1383_v48  ;;  %3049 = vmatprep.subr.mxu1 %v1895_v49  ;;  %v1241_v48 = vunpack.c.h.bf16 %v658_v35  ;;  %v1753_v49 = vunpack.c.h.bf16 %v914_v36  ;;  %v850_v30 = vld [vmem:[%s4048_s9 + $0x830] sm:$0xff] }
 0x2ab   : > { %2979 = vmatpush2.msra.mxu0 %v1382_v50  ;;  %3050 = vmatpush2.msra.mxu1 %v1894_v51  ;;  %v1240_v50 = vunpack.c.l.bf16 %v658_v35  ;;  %v1752_v51 = vunpack.c.l.bf16 %v914_v36  ;;  %v842_v35 = vld [vmem:[%s4048_s9 + $0x7f0] sm:$0xff] }
 0x2ac   : > { %2980 = vmatprep.subr.mxu0 %v1367_v52  ;;  %3051 = vmatprep.subr.mxu1 %v1879_v53  ;;  %v642_v52 = vld [vmem:[%s4048_s9 + $0x1b0] sm:$0xff] }
 0x2ad   : > { %2981 = vmatpush2.msra.mxu0 %v1366_v56  ;;  %3052 = vmatpush2.msra.mxu1 %v1878_v57  ;;  %v898_v53 = vld [vmem:[%s4048_s9 + $0x9b0] sm:$0xff]  ;;  %v1224_v56 = vunpack.c.l.bf16 %v650_v46  ;;  %v1736_v57 = vunpack.c.l.bf16 %v906_v47  ;;  %v1209_v63 = vunpack.c.h.bf16 %v642_v52 }
 0x2ae   : > { %2983 = vmatmul.mubr.f32.vlgmr.msra.gmra.mxu0 %v4146_v0  ;;  %3054 = vmatmul.mubr.f32.vlgmr.msra.gmra.mxu1 %v4139_v58  ;;  %v1721_v1 = vunpack.c.h.bf16 %v898_v53  ;;  %v1098_v36 = vld [vmem:[%s4048_s9 + $0xff0] sm:$0xff] }
 0x2af   : > { %3060 = vmatprep.subr.mxu0 %v1353_v59  ;;  %3131 = vmatprep.subr.mxu1 %v1865_v62  ;;  %v634_v59 = vld [vmem:[%s4048_s9 + $0x170] sm:$0xff] }
 0x2b0   : > { %3061 = vmatpush1.msra.mxu0 %v1352_v2  ;;  %3124 = vmatprep.mubr.f32.mxu0 %v4142_v60  ;;  %v890_v62 = vld [vmem:[%s4048_s9 + $0x970] sm:$0xff]  ;;  %v1208_v2 = vunpack.c.l.bf16 %v642_v52 }
 0x2b1   : > { %3132 = vmatpush1.msra.mxu1 %v1864_v3  ;;  %3195 = vmatprep.mubr.f32.mxu1 %v4144_v61  ;;  %v1720_v3 = vunpack.c.l.bf16 %v898_v53  ;;  %v834_v46 = vld [vmem:[%s4048_s9 + $0x7b0] sm:$0xff] }
 0x2b2   : > { %3062 = vmatprep.subr.mxu0 %v1337_v6  ;;  %3133 = vmatprep.subr.mxu1 %v1849_v7  ;;  %v1193_v6 = vunpack.c.h.bf16 %v634_v59  ;;  %v1705_v7 = vunpack.c.h.bf16 %v890_v62  ;;  %v1090_v47 = vld [vmem:[%s4048_s9 + $0xfb0] sm:$0xff] }
 0x2b3   : > { %3063 = vmatpush1.msra.mxu0 %v1336_v8  ;;  %3134 = vmatpush1.msra.mxu1 %v1848_v9  ;;  %v1192_v8 = vunpack.c.l.bf16 %v634_v59  ;;  %v1704_v9 = vunpack.c.l.bf16 %v890_v62  ;;  %v826_v52 = vld [vmem:[%s4048_s9 + $0x770] sm:$0xff] }
 0x2b4   : > { %3064 = vmatprep.subr.mxu0 %v1321_v12  ;;  %3135 = vmatprep.subr.mxu1 %v1833_v13  ;;  %v1177_v12 = vunpack.c.h.bf16 %v626_v4  ;;  %v1689_v13 = vunpack.c.h.bf16 %v882_v5  ;;  %v1082_v53 = vld [vmem:[%s4048_s9 + $0xf70] sm:$0xff] }
 0x2b5   : > { %3065 = vmatpush1.msra.mxu0 %v1320_v14  ;;  %3136 = vmatpush1.msra.mxu1 %v1832_v15  ;;  %v1176_v14 = vunpack.c.l.bf16 %v626_v4  ;;  %v1688_v15 = vunpack.c.l.bf16 %v882_v5  ;;  %v818_v59 = vld [vmem:[%s4048_s9 + $0x730] sm:$0xff] }
 0x2b6   : > { %3066 = vmatprep.subr.mxu0 %v1305_v19  ;;  %3137 = vmatprep.subr.mxu1 %v1817_v20  ;;  %v1161_v19 = vunpack.c.h.bf16 %v618_v10  ;;  %v1673_v20 = vunpack.c.h.bf16 %v874_v11  ;;  %v1074_v62 = vld [vmem:[%s4048_s9 + $0xf30] sm:$0xff] }
 0x2b7   : > { %3067 = vmatpush1.msra.mxu0 %v1304_v21  ;;  %3138 = vmatpush1.msra.mxu1 %v1816_v22  ;;  %v1160_v21 = vunpack.c.l.bf16 %v618_v10  ;;  %v1672_v22 = vunpack.c.l.bf16 %v874_v11  ;;  %v810_v4 = vld [vmem:[%s4048_s9 + $0x6f0] sm:$0xff] }
 0x2b8   : > { %3068 = vmatprep.subr.mxu0 %v1289_v25  ;;  %3139 = vmatprep.subr.mxu1 %v1801_v26  ;;  %v1145_v25 = vunpack.c.h.bf16 %v610_v16  ;;  %v1657_v26 = vunpack.c.h.bf16 %v866_v17  ;;  %v1066_v5 = vld [vmem:[%s4048_s9 + $0xef0] sm:$0xff] }
 0x2b9   : > { %3069 = vmatpush1.msra.mxu0 %v1288_v27  ;;  %3140 = vmatpush1.msra.mxu1 %v1800_v28  ;;  %v1144_v27 = vunpack.c.l.bf16 %v610_v16  ;;  %v1656_v28 = vunpack.c.l.bf16 %v866_v17  ;;  %v802_v10 = vld [vmem:[%s4048_s9 + $0x6b0] sm:$0xff] }
 0x2ba   : > { %3070 = vmatprep.subr.mxu0 %v1273_v31  ;;  %3141 = vmatprep.subr.mxu1 %v1785_v32  ;;  %v1129_v31 = vunpack.c.h.bf16 %v602_v23  ;;  %v1641_v32 = vunpack.c.h.bf16 %v858_v24  ;;  %v1058_v11 = vld [vmem:[%s4048_s9 + $0xeb0] sm:$0xff] }
 0x2bb   : > { %3071 = vmatpush1.msra.mxu0 %v1272_v33  ;;  %3142 = vmatpush1.msra.mxu1 %v1784_v34  ;;  %v1128_v33 = vunpack.c.l.bf16 %v602_v23  ;;  %v1640_v34 = vunpack.c.l.bf16 %v858_v24  ;;  %v794_v16 = vld [vmem:[%s4048_s9 + $0x670] sm:$0xff] }
 0x2bc   : > { %3072 = vmatprep.subr.mxu0 %v1257_v37  ;;  %3143 = vmatprep.subr.mxu1 %v1769_v38  ;;  %v1113_v37 = vunpack.c.h.bf16 %v594_v29  ;;  %v1625_v38 = vunpack.c.h.bf16 %v850_v30  ;;  %v1050_v17 = vld [vmem:[%s4048_s9 + $0xe70] sm:$0xff] }
 0x2bd   : > { %3073 = vmatpush1.msra.mxu0 %v1256_v42  ;;  %3144 = vmatpush1.msra.mxu1 %v1768_v45  ;;  %v1112_v42 = vunpack.c.l.bf16 %v594_v29  ;;  %v1624_v45 = vunpack.c.l.bf16 %v850_v30  ;;  %v786_v23 = vld [vmem:[%s4048_s9 + $0x630] sm:$0xff] }
 0x2be   : > { %3074 = vmatprep.subr.mxu0 %v1241_v48  ;;  %3145 = vmatprep.subr.mxu1 %v1753_v49  ;;  %v1609_v48 = vunpack.c.h.bf16 %v842_v35  ;;  %v2121_v49 = vunpack.c.h.bf16 %v1098_v36  ;;  %v1042_v24 = vld [vmem:[%s4048_s9 + $0xe30] sm:$0xff] }
 0x2bf   : > { %3075 = vmatpush1.msra.mxu0 %v1240_v50  ;;  %3146 = vmatpush1.msra.mxu1 %v1752_v51  ;;  %v1608_v50 = vunpack.c.l.bf16 %v842_v35  ;;  %v2120_v51 = vunpack.c.l.bf16 %v1098_v36  ;;  %v778_v29 = vld [vmem:[%s4048_s9 + $0x5f0] sm:$0xff] }
 0x2c0   : > { %3076 = vmatprep.subr.mxu0 %v1225_v54  ;;  %3147 = vmatprep.subr.mxu1 %v1737_v55  ;;  %v1593_v54 = vunpack.c.h.bf16 %v834_v46  ;;  %v2105_v55 = vunpack.c.h.bf16 %v1090_v47  ;;  %v1034_v30 = vld [vmem:[%s4048_s9 + $0xdf0] sm:$0xff] }
 0x2c1   : > { %3077 = vmatpush1.msra.mxu0 %v1224_v56  ;;  %3148 = vmatpush1.msra.mxu1 %v1736_v57  ;;  %v1592_v56 = vunpack.c.l.bf16 %v834_v46  ;;  %v2104_v57 = vunpack.c.l.bf16 %v1090_v47  ;;  %v770_v35 = vld [vmem:[%s4048_s9 + $0x5b0] sm:$0xff] }
 0x2c2   : > { %3078 = vmatprep.subr.mxu0 %v1209_v63  ;;  %3149 = vmatprep.subr.mxu1 %v1721_v1  ;;  %v1577_v63 = vunpack.c.h.bf16 %v826_v52  ;;  %v2089_v1 = vunpack.c.h.bf16 %v1082_v53  ;;  %v1026_v36 = vld [vmem:[%s4048_s9 + $0xdb0] sm:$0xff] }
 0x2c3   : > { %3079 = vmatpush1.msra.mxu0 %v1208_v2  ;;  %3150 = vmatpush1.msra.mxu1 %v1720_v3  ;;  %v1576_v2 = vunpack.c.l.bf16 %v826_v52  ;;  %v2088_v3 = vunpack.c.l.bf16 %v1082_v53  ;;  %v762_v46 = vld [vmem:[%s4048_s9 + $0x570] sm:$0xff]  ;;  %v1976_v52 = vunpack.c.l.bf16 %v1026_v36 }
 0x2c4   : > { %3080 = vmatprep.subr.mxu0 %v1193_v6  ;;  %3151 = vmatprep.subr.mxu1 %v1705_v7  ;;  %v1561_v6 = vunpack.c.h.bf16 %v818_v59  ;;  %v2073_v7 = vunpack.c.h.bf16 %v1074_v62  ;;  %v1018_v47 = vld [vmem:[%s4048_s9 + $0xd70] sm:$0xff] }
 0x2c5   : > { %3081 = vmatpush1.msra.mxu0 %v1192_v8  ;;  %3152 = vmatpush1.msra.mxu1 %v1704_v9  ;;  %v1560_v8 = vunpack.c.l.bf16 %v818_v59  ;;  %v2072_v9 = vunpack.c.l.bf16 %v1074_v62  ;;  %v754_v53 = vld [vmem:[%s4048_s9 + $0x530] sm:$0xff]  ;;  %v2146_v59 = vsub.s32 4, %v4120_v39  ;;  %v1448_v62 = vunpack.c.l.bf16 %v762_v46 }
 0x2c6   : > { %3082 = vmatprep.subr.mxu0 %v1177_v12  ;;  %3153 = vmatprep.subr.mxu1 %v1689_v13  ;;  %v1545_v12 = vunpack.c.h.bf16 %v810_v4  ;;  %v2057_v13 = vunpack.c.h.bf16 %v1066_v5 }
 0x2c7   : > { %3083 = vmatpush1.msra.mxu0 %v1176_v14  ;;  %3154 = vmatpush1.msra.mxu1 %v1688_v15  ;;  %v1544_v14 = vunpack.c.l.bf16 %v810_v4  ;;  %v2056_v15 = vunpack.c.l.bf16 %v1066_v5  ;;  %v3661_v5 = vld [vmem:[%s4417_s26] sm:$0xff] }
 0x2c8   : > { %3084 = vmatprep.subr.mxu0 %v1161_v19  ;;  %3155 = vmatprep.subr.mxu1 %v1673_v20  ;;  %v1529_v19 = vunpack.c.h.bf16 %v802_v10  ;;  %v2041_v20 = vunpack.c.h.bf16 %v1058_v11 }
 0x2c9   : > { %3085 = vmatpush1.msra.mxu0 %v1160_v21  ;;  %3156 = vmatpush1.msra.mxu1 %v1672_v22  ;;  %v1528_v21 = vunpack.c.l.bf16 %v802_v10  ;;  %v2040_v22 = vunpack.c.l.bf16 %v1058_v11  ;;  %v994_v10 = vld [vmem:[%s4048_s9 + $0xcb0] sm:$0xff]  ;;  %v2154_v11 = vsub.s32 6, %v4120_v39 }
 0x2ca   : > { %3086 = vmatprep.subr.mxu0 %v1145_v25  ;;  %3157 = vmatprep.subr.mxu1 %v1657_v26  ;;  %v1513_v25 = vunpack.c.h.bf16 %v794_v16  ;;  %v2025_v26 = vunpack.c.h.bf16 %v1050_v17 }
 0x2cb   : > { %3087 = vmatpush1.msra.mxu0 %v1144_v27  ;;  %3158 = vmatpush1.msra.mxu1 %v1656_v28  ;;  %v1512_v27 = vunpack.c.l.bf16 %v794_v16  ;;  %v2024_v28 = vunpack.c.l.bf16 %v1050_v17  ;;  %v2147_v16 = vrot.slane %v3661_v5, %v2146_v59 }
 0x2cc   : > { %3088 = vmatprep.subr.mxu0 %v1129_v31  ;;  %3159 = vmatprep.subr.mxu1 %v1641_v32  ;;  %v1497_v31 = vunpack.c.h.bf16 %v786_v23  ;;  %v2009_v32 = vunpack.c.h.bf16 %v1042_v24 }
 0x2cd   : > { %3089 = vmatpush1.msra.mxu0 %v1128_v33  ;;  %3160 = vmatpush1.msra.mxu1 %v1640_v34  ;;  %v1496_v33 = vunpack.c.l.bf16 %v786_v23  ;;  %v2008_v34 = vunpack.c.l.bf16 %v1042_v24  ;;  %v1913_v24 = vunpack.c.h.bf16 %v994_v10 }
 0x2ce   : > { %3090 = vmatprep.subr.mxu0 %v1113_v37  ;;  %3161 = vmatprep.subr.mxu1 %v1625_v38  ;;  %v1481_v37 = vunpack.c.h.bf16 %v778_v29  ;;  %v1993_v38 = vunpack.c.h.bf16 %v1034_v30 }
 0x2cf   : > { %3091 = vmatpush1.msra.mxu0 %v1112_v42  ;;  %3162 = vmatpush1.msra.mxu1 %v1624_v45  ;;  %v1480_v42 = vunpack.c.l.bf16 %v778_v29  ;;  %v1992_v45 = vunpack.c.l.bf16 %v1034_v30  ;;  %v978_v29 = vld [vmem:[%s4048_s9 + $0xc30] sm:$0xff]  ;;  %v2155_v30 = vrot.slane %v3661_v5, %v2154_v11 }
 0x2d0   : > { %3092 = vmatprep.subr.mxu0 %v1609_v48  ;;  %3163 = vmatprep.subr.mxu1 %v2121_v49  ;;  %v1465_v48 = vunpack.c.h.bf16 %v770_v35  ;;  %v1977_v49 = vunpack.c.h.bf16 %v1026_v36 }
 0x2d1   : > { %3093 = vmatpush2.msra.mxu0 %v1608_v50  ;;  %3164 = vmatpush2.msra.mxu1 %v2120_v51  ;;  %v2150_v50 = vsub.s32 5, %v4120_v39  ;;  %v1464_v51 = vunpack.c.l.bf16 %v770_v35 }
 0x2d2   : > { %3094 = vmatprep.subr.mxu0 %v1593_v54  ;;  %3165 = vmatprep.subr.mxu1 %v2105_v55  ;;  %v1010_v54 = vld [vmem:[%s4048_s9 + $0xd30] sm:$0xff]  ;;  %v2558_v55 = vpop.f32.mrf.mxu0 }
 0x2d3   : > { %3095 = vmatpush2.msra.mxu0 %v1592_v56  ;;  %3166 = vmatpush2.msra.mxu1 %v2104_v57  ;;  %v1449_v56 = vunpack.c.h.bf16 %v762_v46  ;;  %v1961_v57 = vunpack.c.h.bf16 %v1018_v47  ;;  %v1945_v4 = vunpack.c.h.bf16 %v1010_v54 }
 0x2d4   : > { %3096 = vmatprep.subr.mxu0 %v1577_v63  ;;  %3167 = vmatprep.subr.mxu1 %v2089_v1  ;;  %v1960_v63 = vunpack.c.l.bf16 %v1018_v47  ;;  %v746_v1 = vld [vmem:[%s4048_s9 + $0x4f0] sm:$0xff]  ;;  %v715_v47 = vld [vmem:[%s4048_s9 + $0x3f8] sm:$0xff] }
 0x2d5   : > { %3097 = vmatpush2.msra.mxu0 %v1576_v2  ;;  %3168 = vmatpush2.msra.mxu1 %v2088_v3  ;;  %v1002_v2 = vld [vmem:[%s4048_s9 + $0xcf0] sm:$0xff]  ;;  %v1433_v3 = vunpack.c.h.bf16 %v754_v53  ;;  %v1416_v17 = vunpack.c.l.bf16 %v746_v1 }
 0x2d6   : > { %3098 = vmatprep.subr.mxu0 %v1561_v6  ;;  %3169 = vmatprep.subr.mxu1 %v2073_v7  ;;  %v2151_v6 = vrot.slane %v3661_v5, %v2150_v50  ;;  %v1432_v7 = vunpack.c.l.bf16 %v754_v53 }
 0x2d7   : > { %3099 = vmatpush2.msra.mxu0 %v1560_v8  ;;  %3170 = vmatpush2.msra.mxu1 %v2072_v9  ;;  %v1944_v8 = vunpack.c.l.bf16 %v1010_v54  ;;  %v738_v9 = vld [vmem:[%s4048_s9 + $0x4b0] sm:$0xff] }
 0x2d8   : > { %3100 = vmatprep.subr.mxu0 %v1545_v12  ;;  %3171 = vmatprep.subr.mxu1 %v2057_v13  ;;  %v2629_v12 = vpop.f32.mrf.mxu1  ;;  %v2560_v13 = vpop.f32.mrf.mxu0  ;;  %v1401_v23 = vunpack.c.h.bf16 %v738_v9 }
 0x2d9   : > { %3101 = vmatpush2.msra.mxu0 %v1544_v14  ;;  %3172 = vmatpush2.msra.mxu1 %v2056_v15  ;;  %v1417_v14 = vunpack.c.h.bf16 %v746_v1  ;;  %v1929_v15 = vunpack.c.h.bf16 %v1002_v2  ;;  %v963_v1 = vld [vmem:[%s4048_s9 + $0xbb8] sm:$0xff] }
 0x2da   : > { %3102 = vmatprep.subr.mxu0 %v1529_v19  ;;  %3173 = vmatprep.subr.mxu1 %v2041_v20  ;;  %v1928_v19 = vunpack.c.l.bf16 %v1002_v2  ;;  %v730_v20 = vld [vmem:[%s4048_s9 + $0x470] sm:$0xff]  ;;  %v1354_v2 = vunpack.c.l.bf16 %v715_v47 }
 0x2db   : > { %3103 = vmatpush2.msra.mxu0 %v1528_v21  ;;  %3174 = vmatpush2.msra.mxu1 %v2040_v22  ;;  %v986_v21 = vld [vmem:[%s4048_s9 + $0xc70] sm:$0xff]  ;;  %v2158_v22 = vsub.s32 7, %v4120_v39  ;;  %v1384_v35 = vunpack.c.l.bf16 %v730_v20 }
 0x2dc   : > { %3104 = vmatprep.subr.mxu0 %v1513_v25  ;;  %3175 = vmatprep.subr.mxu1 %v2025_v26  ;;  %v2561_v25 = vadd.f32 %v2560_v13, %v2151_v6  ;;  %v1400_v26 = vunpack.c.l.bf16 %v738_v9  ;;  %v1896_v36 = vunpack.c.l.bf16 %v986_v21  ;;  %v955_v9 = vld [vmem:[%s4048_s9 + $0xb78] sm:$0xff] }
 0x2dd   : > { %3105 = vmatpush2.msra.mxu0 %v1512_v27  ;;  %3176 = vmatpush2.msra.mxu1 %v2024_v28  ;;  %v1912_v27 = vunpack.c.l.bf16 %v994_v10  ;;  %v722_v28 = vld [vmem:[%s4048_s9 + $0x430] sm:$0xff] }
 0x2de   : > { %3106 = vmatprep.subr.mxu0 %v1497_v31  ;;  %3177 = vmatprep.subr.mxu1 %v2009_v32  ;;  %v2631_v31 = vpop.f32.mrf.mxu1  ;;  %v1385_v32 = vunpack.c.h.bf16 %v730_v20  ;;  %v1835_v20 = vunpack.c.h.bf16 %v955_v9 }
 0x2df   : > { %3107 = vmatpush2.msra.mxu0 %v1496_v33  ;;  %3178 = vmatpush2.msra.mxu1 %v2008_v34  ;;  %v1897_v33 = vunpack.c.h.bf16 %v986_v21  ;;  %v2559_v34 = vadd.f32 %v2558_v55, %v2147_v16  ;;  %v691_v16 = vld [vmem:[%s4048_s9 + $0x338] sm:$0xff] }
 0x2e0   : > { %3108 = vmatprep.subr.mxu0 %v1481_v37  ;;  %3179 = vmatprep.subr.mxu1 %v1993_v38  ;;  %v2159_v37 = vrot.slane %v3661_v5, %v2158_v22  ;;  %v1369_v38 = vunpack.c.h.bf16 %v722_v28 }
 0x2e1   : > { %3109 = vmatpush2.msra.mxu0 %v1480_v42  ;;  %3180 = vmatpush2.msra.mxu1 %v1992_v45  ;;  %v1881_v42 = vunpack.c.h.bf16 %v978_v29  ;;  %v2630_v55 = vadd.f32 %v2629_v12, %v2559_v34  ;;  %v1851_v12 = vunpack.c.h.bf16 %v963_v1 }
 0x2e2   : > { %3110 = vmatprep.subr.mxu0 %v1465_v48  ;;  %3181 = vmatprep.subr.mxu1 %v1977_v49  ;;  %v971_v48 = vld [vmem:[%s4048_s9 + $0xbf8] sm:$0xff]  ;;  %v2632_v49 = vadd.f32 %v2631_v31, %v2561_v25  ;;  %v1834_v25 = vunpack.c.l.bf16 %v955_v9 }
 0x2e3   : > { %3111 = vmatpush2.msra.mxu0 %v1464_v51  ;;  %3182 = vmatpush2.msra.mxu1 %v1976_v52  ;;  %v1368_v51 = vunpack.c.l.bf16 %v722_v28  ;;  %v1880_v52 = vunpack.c.l.bf16 %v978_v29  ;;  %v1866_v6 = vunpack.c.l.bf16 %v971_v48  ;;  %v1307_v28 = vunpack.c.h.bf16 %v691_v16  ;;  %v891_v9 = vld [vmem:[%s4048_s9 + $0x978] sm:$0xff] }
 0x2e4   : > { %3112 = vmatprep.subr.mxu0 %v1449_v56  ;;  %3183 = vmatprep.subr.mxu1 %v1961_v57  ;;  %v1355_v56 = vunpack.c.h.bf16 %v715_v47  ;;  %v1867_v57 = vunpack.c.h.bf16 %v971_v48  ;;  %v659_v48 = vld [vmem:[%s4048_s9 + $0x238] sm:$0xff] }
 0x2e5   : > { %3113 = vmatpush2.msra.mxu0 %v1448_v62  ;;  %3184 = vmatpush2.msra.mxu1 %v1960_v63  ;;  %v707_v63 = vld [vmem:[%s4048_s9 + $0x3b8] sm:$0xff] }
 0x2e6   : > { %3114 = vmatprep.subr.mxu0 %v1433_v3  ;;  %3185 = vmatprep.subr.mxu1 %v1945_v4  ;;  %v3377_v4 = vcombine.low %v2630_v55, %v2632_v49  ;;  %v1339_v10 = vunpack.c.h.bf16 %v707_v63  ;;  %v915_v49 = vld [vmem:[%s4048_s9 + $0xa38] sm:$0xff] }
 0x2e7   : > { %3115 = vmatpush2.msra.mxu0 %v1432_v7  ;;  %3186 = vmatpush2.msra.mxu1 %v1944_v8  ;;  %v699_v8 = vld [vmem:[%s4048_s9 + $0x378] sm:$0xff] }
 0x2e8   : > { %3116 = vmatprep.subr.mxu0 %v1417_v14  ;;  %3187 = vmatprep.subr.mxu1 %v1929_v15  ;;  %v1338_v14 = vunpack.c.l.bf16 %v707_v63  ;;  %v1850_v15 = vunpack.c.l.bf16 %v963_v1  ;;  %v3385_v21 = vrot.slane %v3377_v4, %v4454_v18  ;;  %v651_v55 = vld [vmem:[%s4048_s9 + $0x1f8] sm:$0xff]  ;;  %v1242_v63 = vunpack.c.l.bf16 %v659_v48 }
 0x2e9   : > { %3117 = vmatpush2.msra.mxu0 %v1416_v17  ;;  %3188 = vmatpush2.msra.mxu1 %v1928_v19  ;;  %v947_v17 = vld [vmem:[%s4048_s9 + $0xb38] sm:$0xff]  ;;  %v1323_v19 = vunpack.c.h.bf16 %v699_v8  ;;  %v1754_v1 = vunpack.c.l.bf16 %v915_v49  ;;  %v1227_v4 = vunpack.c.h.bf16 %v651_v55 }
 0x2ea   : > { %3118 = vmatprep.subr.mxu0 %v1401_v23  ;;  %3189 = vmatprep.subr.mxu1 %v1913_v24  ;;  %v2700_v45 = vpop.f32.mrf.mxu0  ;;  %v2771_v46 = vpop.f32.mrf.mxu1  ;;  %v1322_v24 = vunpack.c.l.bf16 %v699_v8  ;;  %v1818_v31 = vunpack.c.l.bf16 %v947_v17  ;;  %v635_v8 = vld [vmem:[%s4048_s9 + $0x178] sm:$0xff] }
 0x2eb   : > { %3119 = vmatpush2.msra.mxu0 %v1400_v26  ;;  %3190 = vmatpush2.msra.mxu1 %v1912_v27  ;;  %v2701_v53 = vadd.f32 %v2700_v45, %v2155_v30  ;;  %v683_v26 = vld [vmem:[%s4048_s9 + $0x2f8] sm:$0xff]  ;;  %v1306_v30 = vunpack.c.l.bf16 %v691_v16 }
 0x2ec   : > { %3120 = vmatprep.subr.mxu0 %v1385_v32  ;;  %3191 = vmatprep.subr.mxu1 %v1897_v33  ;;  %v2702_v54 = vpop.f32.mrf.mxu0  ;;  %v2773_v3 = vpop.f32.mrf.mxu1  ;;  %v939_v27 = vld [vmem:[%s4048_s9 + $0xaf8] sm:$0xff]  ;;  %v1291_v33 = vunpack.c.h.bf16 %v683_v26 }
 0x2ed   : > { %3121 = vmatpush2.msra.mxu0 %v1384_v35  ;;  %3192 = vmatpush2.msra.mxu1 %v1896_v36  ;;  %v2703_v62 = vadd.f32 %v2702_v54, %v2159_v37  ;;  %v2772_v5 = vadd.f32 %v2771_v46, %v2701_v53  ;;  %v931_v32 = vld [vmem:[%s4048_s9 + $0xab8] sm:$0xff]  ;;  %v1803_v34 = vunpack.c.h.bf16 %v939_v27  ;;  %v1290_v35 = vunpack.c.l.bf16 %v683_v26 }
 0x2ee   : > { %3122 = vmatprep.subr.mxu0 %v1369_v38  ;;  %3193 = vmatprep.subr.mxu1 %v1881_v42  ;;  %v1802_v36 = vunpack.c.l.bf16 %v939_v27  ;;  %v667_v37 = vld [vmem:[%s4048_s9 + $0x278] sm:$0xff]  ;;  %v1787_v45 = vunpack.c.h.bf16 %v931_v32  ;;  %v1786_v47 = vunpack.c.l.bf16 %v931_v32 }
 0x2ef   : > { %3123 = vmatpush2.msra.mxu0 %v1368_v51  ;;  %3194 = vmatpush2.msra.mxu1 %v1880_v52  ;;  %v2774_v7 = vadd.f32 %v2773_v3, %v2703_v62  ;;  %v923_v38 = vld [vmem:[%s4048_s9 + $0xa78] sm:$0xff]  ;;  %v1259_v51 = vunpack.c.h.bf16 %v667_v37  ;;  %v1258_v53 = vunpack.c.l.bf16 %v667_v37  ;;  %v1755_v62 = vunpack.c.h.bf16 %v915_v49 }
 0x2f0   : > { %3125 = vmatmul.mubr.f32.vlgmr.msra.gmra.mxu0 %v4146_v0  ;;  %3196 = vmatmul.mubr.f32.vlgmr.msra.gmra.mxu1 %v4139_v58  ;;  %v1771_v52 = vunpack.c.h.bf16 %v923_v38  ;;  %v1770_v54 = vunpack.c.l.bf16 %v923_v38  ;;  %v899_v3 = vld [vmem:[%s4048_s9 + $0x9b8] sm:$0xff] }
 0x2f1   : > { %3202 = vmatprep.subr.mxu0 %v1355_v56  ;;  %3273 = vmatprep.subr.mxu1 %v1867_v57  ;;  %v3378_v13 = vcombine.low %v2772_v5, %v2774_v7  ;;  %v907_v56 = vld [vmem:[%s4048_s9 + $0x9f8] sm:$0xff]  ;;  %v1243_v57 = vunpack.c.h.bf16 %v659_v48 }
 0x2f2   : > { %3203 = vmatpush1.msra.mxu0 %v1354_v2  ;;  %3266 = vmatprep.mubr.f32.mxu0 %v4142_v60  ;;  %v1819_v60 = vunpack.c.h.bf16 %v947_v17  ;;  %v643_v2 = vld [vmem:[%s4048_s9 + $0x1b8] sm:$0xff]  ;;  %v1739_v5 = vunpack.c.h.bf16 %v907_v56  ;;  %v1738_v7 = vunpack.c.l.bf16 %v907_v56  ;;  %v1195_v17 = vunpack.c.h.bf16 %v635_v8 }
 0x2f3   : > { %3274 = vmatpush1.msra.mxu1 %v1866_v6  ;;  %3337 = vmatprep.mubr.f32.mxu1 %v4144_v61  ;;  %v3392_v23 = vrot.slane %v3378_v13, %v4454_v18  ;;  %v675_v61 = vld [vmem:[%s4048_s9 + $0x2b8] sm:$0xff]  ;;  %v1226_v6 = vunpack.c.l.bf16 %v651_v55  ;;  %v1210_v13 = vunpack.c.l.bf16 %v643_v2 }
 0x2f4   : > { %3204 = vmatprep.subr.mxu0 %v1339_v10  ;;  %3275 = vmatprep.subr.mxu1 %v1851_v12  ;;  %v1275_v42 = vunpack.c.h.bf16 %v675_v61  ;;  %v1274_v46 = vunpack.c.l.bf16 %v675_v61  ;;  %v1211_v10 = vunpack.c.h.bf16 %v643_v2  ;;  %v1723_v12 = vunpack.c.h.bf16 %v899_v3  ;;  %v883_v16 = vld [vmem:[%s4048_s9 + $0x938] sm:$0xff] }
 0x2f5   : > { %v3393_v29 = vcombine.low %v3385_v21, %v3392_v23  ;;  %3205 = vmatpush1.msra.mxu0 %v1338_v14  ;;  %3276 = vmatpush1.msra.mxu1 %v1850_v15  ;;  %v1722_v14 = vunpack.c.l.bf16 %v899_v3  ;;  %v627_v15 = vld [vmem:[%s4048_s9 + $0x138] sm:$0xff]  ;;  %v1706_v21 = vunpack.c.l.bf16 %v891_v9  ;;  %v1691_v26 = vunpack.c.h.bf16 %v883_v16 }
 0x2f6   : > { %3206 = vmatprep.subr.mxu0 %v1323_v19  ;;  %3277 = vmatprep.subr.mxu1 %v1835_v20  ;;  %v1707_v19 = vunpack.c.h.bf16 %v891_v9  ;;  %v1194_v20 = vunpack.c.l.bf16 %v635_v8  ;;  %v619_v23 = vld [vmem:[%s4048_s9 + $0xf8] sm:$0xff]  ;;  %v1178_v27 = vunpack.c.l.bf16 %v627_v15 }
 0x2f7   : > { %3433 = vst [vmem:[%s4472_s13 + $0x8] sm:$0xff] %v3393_v29  ;;  %3207 = vmatpush1.msra.mxu0 %v1322_v24  ;;  %3278 = vmatpush1.msra.mxu1 %v1834_v25  ;;  %v875_v24 = vld [vmem:[%s4048_s9 + $0x8f8] sm:$0xff]  ;;  %v1179_v25 = vunpack.c.h.bf16 %v627_v15  ;;  %v1162_v61 = vunpack.c.l.bf16 %v619_v23 }
 0x2f8   : > { %3208 = vmatprep.subr.mxu0 %v1307_v28  ;;  %3279 = vmatprep.subr.mxu1 %v1819_v60  ;;  %v1690_v28 = vunpack.c.l.bf16 %v883_v16  ;;  %v611_v60 = vld [vmem:[%s4048_s9 + $0xb8] sm:$0xff]  ;;  %v1674_v32 = vunpack.c.l.bf16 %v875_v24 }
 0x2f9   : > { %3209 = vmatpush1.msra.mxu0 %v1306_v30  ;;  %3280 = vmatpush1.msra.mxu1 %v1818_v31  ;;  %v867_v29 = vld [vmem:[%s4048_s9 + $0x8b8] sm:$0xff]  ;;  %v1163_v30 = vunpack.c.h.bf16 %v619_v23  ;;  %v1675_v31 = vunpack.c.h.bf16 %v875_v24  ;;  %v1146_v37 = vunpack.c.l.bf16 %v611_v60 }
 0x2fa   : > { %3210 = vmatprep.subr.mxu0 %v1291_v33  ;;  %3281 = vmatprep.subr.mxu1 %v1803_v34  ;;  %v603_v33 = vld [vmem:[%s4048_s9 + $0x78] sm:$0xff]  ;;  %v1658_v38 = vunpack.c.l.bf16 %v867_v29 }
 0x2fb   : > { %3211 = vmatpush1.msra.mxu0 %v1290_v35  ;;  %3282 = vmatpush1.msra.mxu1 %v1802_v36  ;;  %v859_v34 = vld [vmem:[%s4048_s9 + $0x878] sm:$0xff]  ;;  %v1147_v35 = vunpack.c.h.bf16 %v611_v60  ;;  %v1659_v36 = vunpack.c.h.bf16 %v867_v29  ;;  %v1130_v48 = vunpack.c.l.bf16 %v603_v33 }
 0x2fc   : > { %3212 = vmatprep.subr.mxu0 %v1275_v42  ;;  %3283 = vmatprep.subr.mxu1 %v1787_v45  ;;  %v595_v42 = vld [vmem:[%s4048_s9 + $0x38] sm:$0xff]  ;;  %v1642_v49 = vunpack.c.l.bf16 %v859_v34 }
 0x2fd   : > { %3213 = vmatpush1.msra.mxu0 %v1274_v46  ;;  %3284 = vmatpush1.msra.mxu1 %v1786_v47  ;;  %v851_v45 = vld [vmem:[%s4048_s9 + $0x838] sm:$0xff]  ;;  %v1131_v46 = vunpack.c.h.bf16 %v603_v33  ;;  %v1643_v47 = vunpack.c.h.bf16 %v859_v34  ;;  %v1114_v55 = vunpack.c.l.bf16 %v595_v42 }
 0x2fe   : > { %3214 = vmatprep.subr.mxu0 %v1259_v51  ;;  %3285 = vmatprep.subr.mxu1 %v1771_v52  ;;  %v843_v51 = vld [vmem:[%s4048_s9 + $0x7f8] sm:$0xff]  ;;  %v1626_v56 = vunpack.c.l.bf16 %v851_v45 }
 0x2ff   : > { %3215 = vmatpush1.msra.mxu0 %v1258_v53  ;;  %3286 = vmatpush1.msra.mxu1 %v1770_v54  ;;  %v1099_v52 = vld [vmem:[%s4048_s9 + $0xff8] sm:$0xff]  ;;  %v1115_v53 = vunpack.c.h.bf16 %v595_v42  ;;  %v1627_v54 = vunpack.c.h.bf16 %v851_v45  ;;  %v1610_v2 = vunpack.c.l.bf16 %v843_v51 }
 0x300   : > { %3216 = vmatprep.subr.mxu0 %v1243_v57  ;;  %3287 = vmatprep.subr.mxu1 %v1755_v62  ;;  %v835_v57 = vld [vmem:[%s4048_s9 + $0x7b8] sm:$0xff]  ;;  %v2122_v3 = vunpack.c.l.bf16 %v1099_v52 }
 0x301   : > { %3217 = vmatpush1.msra.mxu0 %v1242_v63  ;;  %3288 = vmatpush1.msra.mxu1 %v1754_v1  ;;  %v1091_v62 = vld [vmem:[%s4048_s9 + $0xfb8] sm:$0xff]  ;;  %v1611_v63 = vunpack.c.h.bf16 %v843_v51  ;;  %v2123_v1 = vunpack.c.h.bf16 %v1099_v52  ;;  %v1594_v8 = vunpack.c.l.bf16 %v835_v57 }
 0x302   : > { %3218 = vmatprep.subr.mxu0 %v1227_v4  ;;  %3289 = vmatprep.subr.mxu1 %v1739_v5  ;;  %v827_v4 = vld [vmem:[%s4048_s9 + $0x778] sm:$0xff]  ;;  %v2106_v9 = vunpack.c.l.bf16 %v1091_v62 }
 0x303   : > { %3219 = vmatpush1.msra.mxu0 %v1226_v6  ;;  %3290 = vmatpush1.msra.mxu1 %v1738_v7  ;;  %v1083_v5 = vld [vmem:[%s4048_s9 + $0xf78] sm:$0xff]  ;;  %v1595_v6 = vunpack.c.h.bf16 %v835_v57  ;;  %v2107_v7 = vunpack.c.h.bf16 %v1091_v62  ;;  %v1578_v15 = vunpack.c.l.bf16 %v827_v4 }
 0x304   : > { %3220 = vmatprep.subr.mxu0 %v1211_v10  ;;  %3291 = vmatprep.subr.mxu1 %v1723_v12  ;;  %v819_v10 = vld [vmem:[%s4048_s9 + $0x738] sm:$0xff]  ;;  %v2090_v16 = vunpack.c.l.bf16 %v1083_v5 }
 0x305   : > { %3221 = vmatpush1.msra.mxu0 %v1210_v13  ;;  %3292 = vmatpush1.msra.mxu1 %v1722_v14  ;;  %v1075_v12 = vld [vmem:[%s4048_s9 + $0xf38] sm:$0xff]  ;;  %v1579_v13 = vunpack.c.h.bf16 %v827_v4  ;;  %v2091_v14 = vunpack.c.h.bf16 %v1083_v5  ;;  %v1562_v23 = vunpack.c.l.bf16 %v819_v10 }
 0x306   : > { %3222 = vmatprep.subr.mxu0 %v1195_v17  ;;  %3293 = vmatprep.subr.mxu1 %v1707_v19  ;;  %v811_v17 = vld [vmem:[%s4048_s9 + $0x6f8] sm:$0xff]  ;;  %v2074_v24 = vunpack.c.l.bf16 %v1075_v12 }
 0x307   : > { %3223 = vmatpush1.msra.mxu0 %v1194_v20  ;;  %3294 = vmatpush1.msra.mxu1 %v1706_v21  ;;  %v1067_v19 = vld [vmem:[%s4048_s9 + $0xef8] sm:$0xff]  ;;  %v1563_v20 = vunpack.c.h.bf16 %v819_v10  ;;  %v2075_v21 = vunpack.c.h.bf16 %v1075_v12  ;;  %v1546_v60 = vunpack.c.l.bf16 %v811_v17 }
 0x308   : > { %3224 = vmatprep.subr.mxu0 %v1179_v25  ;;  %3295 = vmatprep.subr.mxu1 %v1691_v26  ;;  %v803_v25 = vld [vmem:[%s4048_s9 + $0x6b8] sm:$0xff]  ;;  %v2058_v29 = vunpack.c.l.bf16 %v1067_v19 }
 0x309   : > { %3225 = vmatpush1.msra.mxu0 %v1178_v27  ;;  %3296 = vmatpush1.msra.mxu1 %v1690_v28  ;;  %v1059_v26 = vld [vmem:[%s4048_s9 + $0xeb8] sm:$0xff]  ;;  %v1547_v27 = vunpack.c.h.bf16 %v811_v17  ;;  %v2059_v28 = vunpack.c.h.bf16 %v1067_v19  ;;  %v1530_v33 = vunpack.c.l.bf16 %v803_v25 }
 0x30a   : > { %3226 = vmatprep.subr.mxu0 %v1163_v30  ;;  %3297 = vmatprep.subr.mxu1 %v1675_v31  ;;  %v795_v30 = vld [vmem:[%s4048_s9 + $0x678] sm:$0xff]  ;;  %v2042_v34 = vunpack.c.l.bf16 %v1059_v26 }
 0x30b   : > { %3227 = vmatpush1.msra.mxu0 %v1162_v61  ;;  %3298 = vmatpush1.msra.mxu1 %v1674_v32  ;;  %v1051_v31 = vld [vmem:[%s4048_s9 + $0xe78] sm:$0xff]  ;;  %v1531_v61 = vunpack.c.h.bf16 %v803_v25  ;;  %v2043_v32 = vunpack.c.h.bf16 %v1059_v26  ;;  %v1514_v42 = vunpack.c.l.bf16 %v795_v30 }
 0x30c   : > { %3228 = vmatprep.subr.mxu0 %v1147_v35  ;;  %3299 = vmatprep.subr.mxu1 %v1659_v36  ;;  %v787_v35 = vld [vmem:[%s4048_s9 + $0x638] sm:$0xff]  ;;  %v2026_v45 = vunpack.c.l.bf16 %v1051_v31 }
 0x30d   : > { %3229 = vmatpush1.msra.mxu0 %v1146_v37  ;;  %3300 = vmatpush1.msra.mxu1 %v1658_v38  ;;  %v1043_v36 = vld [vmem:[%s4048_s9 + $0xe38] sm:$0xff]  ;;  %v1515_v37 = vunpack.c.h.bf16 %v795_v30  ;;  %v2027_v38 = vunpack.c.h.bf16 %v1051_v31  ;;  %v1498_v51 = vunpack.c.l.bf16 %v787_v35 }
 0x30e   : > { %3230 = vmatprep.subr.mxu0 %v1131_v46  ;;  %3301 = vmatprep.subr.mxu1 %v1643_v47  ;;  %v779_v46 = vld [vmem:[%s4048_s9 + $0x5f8] sm:$0xff]  ;;  %v2010_v52 = vunpack.c.l.bf16 %v1043_v36 }
 0x30f   : > { %3231 = vmatpush1.msra.mxu0 %v1130_v48  ;;  %3302 = vmatpush1.msra.mxu1 %v1642_v49  ;;  %v1035_v47 = vld [vmem:[%s4048_s9 + $0xdf8] sm:$0xff]  ;;  %v1499_v48 = vunpack.c.h.bf16 %v787_v35  ;;  %v2011_v49 = vunpack.c.h.bf16 %v1043_v36  ;;  %v1482_v57 = vunpack.c.l.bf16 %v779_v46 }
 0x310   : > { %3232 = vmatprep.subr.mxu0 %v1115_v53  ;;  %3303 = vmatprep.subr.mxu1 %v1627_v54  ;;  %v771_v53 = vld [vmem:[%s4048_s9 + $0x5b8] sm:$0xff]  ;;  %v1994_v62 = vunpack.c.l.bf16 %v1035_v47 }
 0x311   : > { %3233 = vmatpush1.msra.mxu0 %v1114_v55  ;;  %3304 = vmatpush1.msra.mxu1 %v1626_v56  ;;  %v1027_v54 = vld [vmem:[%s4048_s9 + $0xdb8] sm:$0xff]  ;;  %v1483_v55 = vunpack.c.h.bf16 %v779_v46  ;;  %v1995_v56 = vunpack.c.h.bf16 %v1035_v47  ;;  %v1466_v4 = vunpack.c.l.bf16 %v771_v53 }
 0x312   : > { %3234 = vmatprep.subr.mxu0 %v1611_v63  ;;  %3305 = vmatprep.subr.mxu1 %v2123_v1  ;;  %v763_v63 = vld [vmem:[%s4048_s9 + $0x578] sm:$0xff]  ;;  %v1978_v5 = vunpack.c.l.bf16 %v1027_v54 }
 0x313   : > { %3235 = vmatpush2.msra.mxu0 %v1610_v2  ;;  %3306 = vmatpush2.msra.mxu1 %v2122_v3  ;;  %v1019_v1 = vld [vmem:[%s4048_s9 + $0xd78] sm:$0xff]  ;;  %v1467_v2 = vunpack.c.h.bf16 %v771_v53  ;;  %v1979_v3 = vunpack.c.h.bf16 %v1027_v54  ;;  %v1450_v10 = vunpack.c.l.bf16 %v763_v63 }
 0x314   : > { %3236 = vmatprep.subr.mxu0 %v1595_v6  ;;  %3307 = vmatprep.subr.mxu1 %v2107_v7  ;;  %v755_v6 = vld [vmem:[%s4048_s9 + $0x538] sm:$0xff]  ;;  %v1962_v12 = vunpack.c.l.bf16 %v1019_v1 }
 0x315   : > { %3237 = vmatpush2.msra.mxu0 %v1594_v8  ;;  %3308 = vmatpush2.msra.mxu1 %v2106_v9  ;;  %v1011_v7 = vld [vmem:[%s4048_s9 + $0xd38] sm:$0xff]  ;;  %v1451_v8 = vunpack.c.h.bf16 %v763_v63  ;;  %v1963_v9 = vunpack.c.h.bf16 %v1019_v1  ;;  %v1434_v17 = vunpack.c.l.bf16 %v755_v6 }
 0x316   : > { %3238 = vmatprep.subr.mxu0 %v1579_v13  ;;  %3309 = vmatprep.subr.mxu1 %v2091_v14  ;;  %v747_v13 = vld [vmem:[%s4048_s9 + $0x4f8] sm:$0xff]  ;;  %v1946_v19 = vunpack.c.l.bf16 %v1011_v7 }
 0x317   : > { %3239 = vmatpush2.msra.mxu0 %v1578_v15  ;;  %3310 = vmatpush2.msra.mxu1 %v2090_v16  ;;  %v1003_v14 = vld [vmem:[%s4048_s9 + $0xcf8] sm:$0xff]  ;;  %v1435_v15 = vunpack.c.h.bf16 %v755_v6  ;;  %v1947_v16 = vunpack.c.h.bf16 %v1011_v7  ;;  %v1418_v25 = vunpack.c.l.bf16 %v747_v13 }
 0x318   : > { %3240 = vmatprep.subr.mxu0 %v1563_v20  ;;  %3311 = vmatprep.subr.mxu1 %v2075_v21  ;;  %v739_v20 = vld [vmem:[%s4048_s9 + $0x4b8] sm:$0xff]  ;;  %v1930_v26 = vunpack.c.l.bf16 %v1003_v14 }
 0x319   : > { %3241 = vmatpush2.msra.mxu0 %v1562_v23  ;;  %3312 = vmatpush2.msra.mxu1 %v2074_v24  ;;  %v995_v21 = vld [vmem:[%s4048_s9 + $0xcb8] sm:$0xff]  ;;  %v1419_v23 = vunpack.c.h.bf16 %v747_v13  ;;  %v1931_v24 = vunpack.c.h.bf16 %v1003_v14  ;;  %v1402_v30 = vunpack.c.l.bf16 %v739_v20 }
 0x31a   : > { %3242 = vmatprep.subr.mxu0 %v1547_v27  ;;  %3313 = vmatprep.subr.mxu1 %v2059_v28  ;;  %v731_v27 = vld [vmem:[%s4048_s9 + $0x478] sm:$0xff]  ;;  %v1914_v31 = vunpack.c.l.bf16 %v995_v21 }
 0x31b   : > { %3243 = vmatpush2.msra.mxu0 %v1546_v60  ;;  %3314 = vmatpush2.msra.mxu1 %v2058_v29  ;;  %v987_v28 = vld [vmem:[%s4048_s9 + $0xc78] sm:$0xff]  ;;  %v1403_v60 = vunpack.c.h.bf16 %v739_v20  ;;  %v1915_v29 = vunpack.c.h.bf16 %v995_v21  ;;  %v1386_v35 = vunpack.c.l.bf16 %v731_v27 }
 0x31c   : > { %3244 = vmatprep.subr.mxu0 %v1531_v61  ;;  %3315 = vmatprep.subr.mxu1 %v2043_v32  ;;  %v723_v61 = vld [vmem:[%s4048_s9 + $0x438] sm:$0xff]  ;;  %v1898_v36 = vunpack.c.l.bf16 %v987_v28 }
 0x31d   : > { %3245 = vmatpush2.msra.mxu0 %v1530_v33  ;;  %3316 = vmatpush2.msra.mxu1 %v2042_v34  ;;  %v979_v32 = vld [vmem:[%s4048_s9 + $0xc38] sm:$0xff]  ;;  %v1387_v33 = vunpack.c.h.bf16 %v731_v27  ;;  %v1899_v34 = vunpack.c.h.bf16 %v987_v28 }
 0x31e   : > { %3246 = vmatprep.subr.mxu0 %v1515_v37  ;;  %3317 = vmatprep.subr.mxu1 %v2027_v38  ;;  %v1371_v37 = vunpack.c.h.bf16 %v723_v61  ;;  %v1883_v38 = vunpack.c.h.bf16 %v979_v32  ;;  %v2125_v47 = vld [vmem:[%s4417_s26 + $0x8] sm:$0xff] }
 0x31f   : > { %3247 = vmatpush2.msra.mxu0 %v1514_v42  ;;  %3318 = vmatpush2.msra.mxu1 %v2026_v45  ;;  %v1370_v42 = vunpack.c.l.bf16 %v723_v61  ;;  %v1882_v45 = vunpack.c.l.bf16 %v979_v32  ;;  %v2171_v54 = vrot.slane %v2125_v47, %v4123_v40  ;;  %v2179_v13 = vrot.slane %v2125_v47, %v2146_v59 }
 0x320   : > { %3248 = vmatprep.subr.mxu0 %v1499_v48  ;;  %3319 = vmatprep.subr.mxu1 %v2011_v49  ;;  %v2167_v48 = vrot.slane %v2125_v47, %v4129_v43 }
 0x321   : > { %3249 = vmatpush2.msra.mxu0 %v1498_v51  ;;  %3320 = vmatpush2.msra.mxu1 %v2010_v52  ;;  %v2163_v52 = vrot.slane %v2125_v47, %v4126_v41 }
 0x322   : > { %3250 = vmatprep.subr.mxu0 %v1483_v55  ;;  %3321 = vmatprep.subr.mxu1 %v1995_v56 }
 0x323   : > { %3251 = vmatpush2.msra.mxu0 %v1482_v57  ;;  %3322 = vmatpush2.msra.mxu1 %v1994_v62  ;;  %v2175_v57 = vrot.slane %v2125_v47, %v4132_v44 }
 0x324   : > { %3252 = vmatprep.subr.mxu0 %v1467_v2  ;;  %3323 = vmatprep.subr.mxu1 %v1979_v3 }
 0x325   : > { %3253 = vmatpush2.msra.mxu0 %v1466_v4  ;;  %3324 = vmatpush2.msra.mxu1 %v1978_v5 }
 0x326   : > { %3254 = vmatprep.subr.mxu0 %v1451_v8  ;;  %3325 = vmatprep.subr.mxu1 %v1963_v9  ;;  %v2183_v9 = vrot.slane %v2125_v47, %v2150_v50 }
 0x327   : > { %3255 = vmatpush2.msra.mxu0 %v1450_v10  ;;  %3326 = vmatpush2.msra.mxu1 %v1962_v12 }
 0x328   : > { %3256 = vmatprep.subr.mxu0 %v1435_v15  ;;  %3327 = vmatprep.subr.mxu1 %v1947_v16  ;;  %v2187_v15 = vrot.slane %v2125_v47, %v2154_v11 }
 0x329   : > { %3257 = vmatpush2.msra.mxu0 %v1434_v17  ;;  %3328 = vmatpush2.msra.mxu1 %v1946_v19  ;;  %v2191_v19 = vrot.slane %v2125_v47, %v2158_v22 }
 0x32a   : > { %3258 = vmatprep.subr.mxu0 %v1419_v23  ;;  %3329 = vmatprep.subr.mxu1 %v1931_v24 }
 0x32b   : > { %3259 = vmatpush2.msra.mxu0 %v1418_v25  ;;  %3330 = vmatpush2.msra.mxu1 %v1930_v26 }
 0x32c   : > { %3260 = vmatprep.subr.mxu0 %v1403_v60  ;;  %3331 = vmatprep.subr.mxu1 %v1915_v29  ;;  %v2842_v46 = vpop.f32.mrf.mxu0  ;;  %v2913_v49 = vpop.f32.mrf.mxu1 }
 0x32d   : > { %3261 = vmatpush2.msra.mxu0 %v1402_v30  ;;  %3332 = vmatpush2.msra.mxu1 %v1914_v31  ;;  %v2843_v56 = vadd.f32 %v2842_v46, %v2163_v52 }
 0x32e   : > { %3262 = vmatprep.subr.mxu0 %v1387_v33  ;;  %3333 = vmatprep.subr.mxu1 %v1899_v34  ;;  %v2844_v51 = vpop.f32.mrf.mxu0  ;;  %v2915_v55 = vpop.f32.mrf.mxu1 }
 0x32f   : > { %3263 = vmatpush2.msra.mxu0 %v1386_v35  ;;  %3334 = vmatpush2.msra.mxu1 %v1898_v36  ;;  %v2845_v53 = vadd.f32 %v2844_v51, %v2167_v48  ;;  %v2914_v2 = vadd.f32 %v2913_v49, %v2843_v56 }
 0x330   : > { %3264 = vmatprep.subr.mxu0 %v1371_v37  ;;  %3335 = vmatprep.subr.mxu1 %v1883_v38 }
 0x331   : > { %3265 = vmatpush2.msra.mxu0 %v1370_v42  ;;  %3336 = vmatpush2.msra.mxu1 %v1882_v45  ;;  %v2916_v63 = vadd.f32 %v2915_v55, %v2845_v53 }
 0x332   : > { %3267 = vmatmul.mubr.f32.vlgmr.msra.gmra.mxu0 %v4146_v0  ;;  %3338 = vmatmul.mubr.f32.vlgmr.msra.gmra.mxu1 %v4139_v58 }
 0x333   : > { %v3394_v4 = vcombine.low %v2914_v2, %v2916_v63 }
 0x335   : > { %v3402_v7 = vrot.slane %v3394_v4, %v4454_v18 }
 0x36e   : > { %v2984_v62 = vpop.f32.mrf.mxu0  ;;  %v3055_v0 = vpop.f32.mrf.mxu1 }
 0x36f   : > { %v2985_v58 = vadd.f32 %v2984_v62, %v2171_v54 }
 0x370   : > { %v2986_v1 = vpop.f32.mrf.mxu0  ;;  %v3057_v43 = vpop.f32.mrf.mxu1 }
 0x371   : > { %v2987_v3 = vadd.f32 %v2986_v1, %v2175_v57  ;;  %v3056_v5 = vadd.f32 %v3055_v0, %v2985_v58 }
 0x373   : > { %v3058_v6 = vadd.f32 %v3057_v43, %v2987_v3 }
 0x375   : > { %v3395_v41 = vcombine.low %v3056_v5, %v3058_v6 }
 0x377   : > { %v3409_v40 = vrot.slane %v3395_v41, %v4454_v18 }
 0x379   : > { %v3410_v8 = vcombine.low %v3402_v7, %v3409_v40 }
 0x37b   : > { %3434 = vst [vmem:[%s4472_s13 + $0x10] sm:$0xff] %v3410_v8 }
 0x3b0   : > { %v3126_v44 = vpop.f32.mrf.mxu0  ;;  %v3197_v10 = vpop.f32.mrf.mxu1 }
 0x3b1   : > { %v3127_v17 = vadd.f32 %v3126_v44, %v2179_v13 }
 0x3b2   : > { %v3128_v12 = vpop.f32.mrf.mxu0  ;;  %v3199_v16 = vpop.f32.mrf.mxu1 }
 0x3b3   : > { %v3129_v14 = vadd.f32 %v3128_v12, %v2183_v9  ;;  %v3198_v25 = vadd.f32 %v3197_v10, %v3127_v17 }
 0x3b5   : > { %v3200_v23 = vadd.f32 %v3199_v16, %v3129_v14 }
 0x3b7   : > { %v3411_v28 = vcombine.low %v3198_v25, %v3200_v23 }
 0x3b9   : > { %v3419_v11 = vrot.slane %v3411_v28, %v4454_v18 }
 0x3f2   : > { %v3268_v20 = vpop.f32.mrf.mxu0  ;;  %v3339_v21 = vpop.f32.mrf.mxu1 }
 0x3f3   : > { %v3269_v24 = vadd.f32 %v3268_v20, %v2187_v15 }
 0x3f4   : > { %v3270_v50 = vpop.f32.mrf.mxu0  ;;  %v3341_v27 = vpop.f32.mrf.mxu1 }
 0x3f5   : > { %v3271_v26 = vadd.f32 %v3270_v50, %v2191_v19  ;;  %v3340_v59 = vadd.f32 %v3339_v21, %v3269_v24 }
 0x3f7   : > { %v3342_v60 = vadd.f32 %v3341_v27, %v3271_v26 }
 0x3f9   : > { %v3412_v29 = vcombine.low %v3340_v59, %v3342_v60 }
 0x3fb   : > { %v3426_v30 = vrot.slane %v3412_v29, %v4454_v18 }
 0x3fd   : > { %v3427_v31 = vcombine.low %v3419_v11, %v3426_v30 }
 0x3ff   : > { %3435 = vst [vmem:[%s4472_s13 + $0x18] sm:$0xff] %v3427_v31 }
 0x400 PF: > { %s4740_s7 = sld [smem:[#allocation13_spill]]  ;;  %p17_p1 = scmp.ge.s32.totalorder %s3904_s23, 4  }
 0x401   : > { %s4741_s18 = smov %s3830_s19  ;;  %s4742_s19 = smov %s3834_s20 }
 0x402   : > { %s4744_s21 = smov %s3904_s23  ;;  %19 = sbr.rel (!%p17_p1) target bundleno = 5 (0x5), region = 104 }
 0x406   : > { %s4743_s20 = smov %s4740_s7 }
 0x407   :  { %3458 = vsyncpa [#allocation3], 1 }
 0x408   :  { %3460 = vsyncpa [#allocation3 + $0x1], 1 }
 0x409   :  { %3461 = vsyncpa [#allocation5], 1 }
 0x40a   :  { %3462 = vsyncpa [#allocation8], 1 }
 0x40b   :  { %3464 = vsyncpa [#allocation8 + $0x1], 1 }

</bundles_post_ra>
